<compile_context>
chip_gen: v5e
topology: v5e:2x2
jax: 0.10.0
libtpu: 0.0.40
codegen_flags: <defaults>
</compile_context>

<pallas_src>
import functools

import jax
import jax.numpy as jnp
from jax.experimental import pallas as pl
from jax.experimental.pallas import tpu as pltpu

LANE = 128


def _round_up(x, m):
    return ((x + m - 1) // m) * m


def _espcn_kernel(p1_ref, w1_ref, b1_ref, w2_ref, b2_ref, w3_ref, b3_ref,
                  o_ref, pad2, pad3, *, H, W, NF, HID, K2, K3, C_OUT_P):
    """Fused conv1(pre-im2col'd 5x5)+tanh -> conv2(3x3)+tanh -> conv3(3x3)
    for one batch element; both intermediate activations stay in VMEM."""

    # conv1: patches already im2col'd + lane-padded to 128 in the wrapper ->
    # one aligned (H*W,128)x(128,NF) MXU matmul, f32 accumulation.
    a1 = jnp.tanh(
        jnp.dot(p1_ref[0], w1_ref[...], preferred_element_type=jnp.float32)
        + b1_ref[...])                                        # (H*W, NF)

    def conv_per_tap(pad_ref, x_hwc, w_ref, b_ref, K, C, Cout, apply_tanh):
        """'same' conv via per-(kh,kw)-tap MXU accumulation (no lane concat)."""
        ph = K // 2
        Hp, Wp = H + K - 1, W + K - 1
        # Zero ONLY the halo strips; the interior is fully overwritten below.
        pad_ref[0:ph, :, :] = jnp.zeros((ph, Wp, C), jnp.float32)
        pad_ref[ph + H:Hp, :, :] = jnp.zeros((ph, Wp, C), jnp.float32)
        pad_ref[:, 0:ph, :] = jnp.zeros((Hp, ph, C), jnp.float32)
        pad_ref[:, ph + W:Wp, :] = jnp.zeros((Hp, ph, C), jnp.float32)
        pad_ref[ph:ph + H, ph:ph + W, :] = x_hwc
        acc = jnp.zeros((H * W, Cout), jnp.float32)
        for kh in range(K):
            for kw in range(K):
                win = pad_ref[kh:kh + H, kw:kw + W, :].reshape(H * W, C)
                acc = acc + jnp.dot(win, w_ref[kh * K + kw],
                                    preferred_element_type=jnp.float32)
        acc = acc + b_ref[...]
        return jnp.tanh(acc) if apply_tanh else acc

    a2 = conv_per_tap(pad2, a1.reshape(H, W, NF), w2_ref, b2_ref,
                      K2, NF, HID, True)                      # (H*W, HID)
    a3 = conv_per_tap(pad3, a2.reshape(H, W, HID), w3_ref, b3_ref,
                      K3, HID, C_OUT_P, False)                # (H*W, 128)
    # Lane-dense store (last dim = 128): unmasked vst + dense output DMA.
    o_ref[0] = a3.astype(o_ref.dtype)


def espcn_conv_stack(x_nhwc, params):
    """Runs the fused 3-conv stack; returns NHWC output before PixelShuffle."""
    N, H, W, C_in = x_nhwc.shape
    w1, b1 = params["w1"], params["b1"]
    w2, b2 = params["w2"], params["b2"]
    w3, b3 = params["w3"], params["b3"]
    K1, _, _, NF = w1.shape
    K2, _, _, HID = w2.shape
    K3, _, _, C_out = w3.shape

    # ---- conv1 im2col hoisted to XLA (pure layout prep) ------------------
    KC1 = K1 * K1 * C_in                    # 100
    KC1p = _round_up(KC1, LANE)             # 128
    ph1 = K1 // 2
    xp = jnp.pad(x_nhwc, ((0, 0), (ph1, ph1), (ph1, ph1), (0, 0)))
    taps = [xp[:, kh:kh + H, kw:kw + W, :]
            for kh in range(K1) for kw in range(K1)]
    p1 = jnp.concatenate(taps, axis=-1).reshape(N, H * W, KC1)
    p1 = jnp.pad(p1, ((0, 0), (0, 0), (0, KC1p - KC1)))       # (N, 256, 128)

    # ---- weights: conv1 flattened + row-padded; conv2/3 as (K*K, Cin, Cout)
    #      per-tap stacks; conv3 output channels zero-padded to 128 lanes. --
    C_out_p = _round_up(C_out, LANE)        # 128
    w1f = jnp.pad(w1.reshape(KC1, NF), ((0, KC1p - KC1), (0, 0)))
    w2r = w2.reshape(K2 * K2, NF, HID)
    w3r = jnp.pad(w3.reshape(K3 * K3, HID, C_out),
                  ((0, 0), (0, 0), (0, C_out_p - C_out)))
    b1r = b1.reshape(1, NF)
    b2r = b2.reshape(1, HID)
    b3r = jnp.pad(b3, (0, C_out_p - C_out)).reshape(1, C_out_p)

    kernel = functools.partial(
        _espcn_kernel, H=H, W=W, NF=NF, HID=HID, K2=K2, K3=K3,
        C_OUT_P=C_out_p)

    out = pl.pallas_call(
        kernel,
        out_shape=jax.ShapeDtypeStruct((N, H * W, C_out_p), jnp.float32),
        grid=(N,),
        in_specs=[
            pl.BlockSpec((1, H * W, KC1p), lambda n: (n, 0, 0)),
            pl.BlockSpec(w1f.shape, lambda n: (0, 0)),
            pl.BlockSpec(b1r.shape, lambda n: (0, 0)),
            pl.BlockSpec(w2r.shape, lambda n: (0, 0, 0)),
            pl.BlockSpec(b2r.shape, lambda n: (0, 0)),
            pl.BlockSpec(w3r.shape, lambda n: (0, 0, 0)),
            pl.BlockSpec(b3r.shape, lambda n: (0, 0)),
        ],
        out_specs=pl.BlockSpec((1, H * W, C_out_p), lambda n: (n, 0, 0)),
        scratch_shapes=[
            pltpu.VMEM((H + K2 - 1, W + K2 - 1, NF), jnp.float32),
            pltpu.VMEM((H + K3 - 1, W + K3 - 1, HID), jnp.float32),
        ],
        compiler_params=pltpu.CompilerParams(
            dimension_semantics=("parallel",)),
    )(p1, w1f, b1r, w2r, b2r, w3r, b3r)

    # Strip lane padding and restore NHWC.
    return out[:, :, :C_out].reshape(N, H, W, C_out)


def pixel_shuffle_from_nhwc(y_nhwc, r):
    """nn.PixelShuffle(r) on an NHWC conv output, producing NCHW.
    y[n,h,w, c*r*r + i*r + j] -> out[n, c, h*r + i, w*r + j]."""
    N, H, W, C = y_nhwc.shape
    c = C // (r * r)
    y = y_nhwc.reshape(N, H, W, c, r, r)
    y = y.transpose(0, 3, 1, 4, 2, 5)          # N, c, H, r, W, r
    return y.reshape(N, c, H * r, W * r)


def espcn_forward(x_nchw, params, factor=4):
    x = jnp.transpose(x_nchw, (0, 2, 3, 1))    # NCHW -> NHWC
    y = espcn_conv_stack(x, params)            # fused Pallas kernel
    return pixel_shuffle_from_nhwc(y, factor)  # pure layout op in XLA


def _init_params(key, in_ch, nf, factor):
    """Deterministic synthetic weights; PyTorch OIHW init, stored as HWIO."""
    hid_nf = nf // 2
    out_ch = in_ch * factor ** 2
    ks = jax.random.split(key, 6)

    def conv_w(k, cout, cin, kh, kw):
        w_oihw = jax.random.normal(k, (cout, cin, kh, kw), jnp.float32)
        w_oihw = w_oihw * (1.0 / jnp.sqrt(cin * kh * kw))
        return jnp.transpose(w_oihw, (2, 3, 1, 0))  # OIHW -> HWIO

    return {
        "w1": conv_w(ks[0], nf, in_ch, 5, 5),
        "b1": 0.01 * jax.random.normal(ks[1], (nf,), jnp.float32),
        "w2": conv_w(ks[2], hid_nf, nf, 3, 3),
        "b2": 0.01 * jax.random.normal(ks[3], (hid_nf,), jnp.float32),
        "w3": conv_w(ks[4], out_ch, hid_nf, 3, 3),
        "b3": 0.01 * jax.random.normal(ks[5], (out_ch,), jnp.float32),
    }


def _espcn_reference(x_nchw, params, factor=4):
    """Pure-JAX reference (lax.conv) for correctness checking."""
    def conv(x, w, b):
        y = jax.lax.conv_general_dilated(
            x, w, (1, 1), "SAME",
            dimension_numbers=("NHWC", "HWIO", "NHWC"),
            precision=jax.lax.Precision.HIGHEST)
        return y + b
    x = jnp.transpose(x_nchw, (0, 2, 3, 1))
    x = jnp.tanh(conv(x, params["w1"], params["b1"]))
    x = jnp.tanh(conv(x, params["w2"], params["b2"]))
    x = conv(x, params["w3"], params["b3"])
    return pixel_shuffle_from_nhwc(x, factor)


if __name__ == "__main__":
    in_ch, nf, factor = 4, 32, 4
    N, H, W = 2, 16, 16

    key = jax.random.PRNGKey(0)
    kx, kp = jax.random.split(key)
    x = jax.random.normal(kx, (N, in_ch, H, W), jnp.float32)
    params = _init_params(kp, in_ch, nf, factor)

    fwd = jax.jit(espcn_forward, static_argnums=(2,))  # factor must be static
    out = jax.block_until_ready(fwd(x, params, factor))
    assert out.shape == (N, in_ch, H * factor, W * factor), out.shape

    ref = jax.block_until_ready(_espcn_reference(x, params, factor))
    max_err = float(jnp.max(jnp.abs(out - ref)))
    assert jnp.allclose(out, ref, atol=2e-3, rtol=2e-3), max_err

    print("KERNEL_OK")
</pallas_src>

<mosaic_0001>
module attributes {stable_mosaic.version = 11 : i64} {
  func.func @_espcn_kernel(%arg0: i32, %arg1: memref<1x256x128xf32, #tpu.memory_space<vmem>>, %arg2: memref<128x32xf32, #tpu.memory_space<vmem>>, %arg3: memref<1x32xf32, #tpu.memory_space<vmem>>, %arg4: memref<9x32x16xf32, #tpu.memory_space<vmem>>, %arg5: memref<1x16xf32, #tpu.memory_space<vmem>>, %arg6: memref<9x16x128xf32, #tpu.memory_space<vmem>>, %arg7: memref<1x128xf32, #tpu.memory_space<vmem>>, %arg8: memref<1x256x128xf32, #tpu.memory_space<vmem>>, %arg9: memref<18x18x32xf32, #tpu.memory_space<vmem>>, %arg10: memref<18x18x16xf32, #tpu.memory_space<vmem>>) attributes {dimension_semantics = [#tpu.dimension_semantics<parallel>], iteration_bounds = array<i64: 2>, scalar_prefetch = 0 : i64, scratch_operands = 2 : i64, tpu.core_type = #tpu.core_type<tc>, window_params = [{transform_indices = @transform_0, window_bounds = array<i64: 1, 256, 128>}, {pipeline_mode = #tpu.pipeline_mode<synchronous>, transform_indices = @transform_1, window_bounds = array<i64: 128, 32>}, {pipeline_mode = #tpu.pipeline_mode<synchronous>, transform_indices = @transform_2, window_bounds = array<i64: 1, 32>}, {pipeline_mode = #tpu.pipeline_mode<synchronous>, transform_indices = @transform_3, window_bounds = array<i64: 9, 32, 16>}, {pipeline_mode = #tpu.pipeline_mode<synchronous>, transform_indices = @transform_4, window_bounds = array<i64: 1, 16>}, {pipeline_mode = #tpu.pipeline_mode<synchronous>, transform_indices = @transform_5, window_bounds = array<i64: 9, 16, 128>}, {pipeline_mode = #tpu.pipeline_mode<synchronous>, transform_indices = @transform_6, window_bounds = array<i64: 1, 128>}, {transform_indices = @transform_7, window_bounds = array<i64: 1, 256, 128>}]} {
    %c0 = arith.constant 0 : index
    %c0_0 = arith.constant 0 : index
    %c0_1 = arith.constant 0 : index
    %0 = vector.load %arg1[%c0, %c0_0, %c0_1] : memref<1x256x128xf32, #tpu.memory_space<vmem>>, vector<1x256x128xf32>
    %1 = vector.shape_cast %0 : vector<1x256x128xf32> to vector<256x128xf32>
    %c0_2 = arith.constant 0 : index
    %c0_3 = arith.constant 0 : index
    %2 = vector.load %arg2[%c0_2, %c0_3] : memref<128x32xf32, #tpu.memory_space<vmem>>, vector<128x32xf32>
    %cst = arith.constant dense<0.000000e+00> : vector<256x32xf32>
    %3 = tpu.matmul %1, %2, %cst {dimension_numbers = #tpu.dot_dimension_numbers<[1], [0], [0], [1], [0, 0, 1, 1], [], []>} : vector<256x128xf32>, vector<128x32xf32>, vector<256x32xf32> -> vector<256x32xf32>
    %c0_4 = arith.constant 0 : index
    %c0_5 = arith.constant 0 : index
    %4 = vector.load %arg3[%c0_4, %c0_5] : memref<1x32xf32, #tpu.memory_space<vmem>>, vector<1x32xf32>
    %5 = vector.broadcast %4 : vector<1x32xf32> to vector<256x32xf32>
    %6 = arith.addf %3, %5 : vector<256x32xf32>
    %7 = math.tanh %6 : vector<256x32xf32>
    %8 = vector.shape_cast %7 : vector<256x32xf32> to vector<16x16x32xf32>
    %cst_6 = arith.constant 0.000000e+00 : f32
    %9 = vector.broadcast %cst_6 : f32 to vector<1x18x32xf32>
    %c0_7 = arith.constant 0 : index
    %c0_8 = arith.constant 0 : index
    %c0_9 = arith.constant 0 : index
    %10 = vector.load %arg9[%c0_7, %c0_8, %c0_9] : memref<18x18x32xf32, #tpu.memory_space<vmem>>, vector<1x18x32xf32>
    tpu.vector_store %arg9[%c0_7, %c0_8, %c0_9], %9 {strides = array<i32>} : memref<18x18x32xf32, #tpu.memory_space<vmem>>, vector<1x18x32xf32>,
    %cst_10 = arith.constant 0.000000e+00 : f32
    %11 = vector.broadcast %cst_10 : f32 to vector<1x18x32xf32>
    %c17 = arith.constant 17 : index
    %c0_11 = arith.constant 0 : index
    %c0_12 = arith.constant 0 : index
    %12 = vector.load %arg9[%c17, %c0_11, %c0_12] : memref<18x18x32xf32, #tpu.memory_space<vmem>>, vector<1x18x32xf32>
    tpu.vector_store %arg9[%c17, %c0_11, %c0_12], %11 {strides = array<i32>} : memref<18x18x32xf32, #tpu.memory_space<vmem>>, vector<1x18x32xf32>,
    %cst_13 = arith.constant 0.000000e+00 : f32
    %13 = vector.broadcast %cst_13 : f32 to vector<18x1x32xf32>
    %c0_14 = arith.constant 0 : index
    %c0_15 = arith.constant 0 : index
    %c0_16 = arith.constant 0 : index
    %14 = vector.load %arg9[%c0_14, %c0_15, %c0_16] : memref<18x18x32xf32, #tpu.memory_space<vmem>>, vector<18x1x32xf32>
    tpu.vector_store %arg9[%c0_14, %c0_15, %c0_16], %13 {strides = array<i32>} : memref<18x18x32xf32, #tpu.memory_space<vmem>>, vector<18x1x32xf32>,
    %cst_17 = arith.constant 0.000000e+00 : f32
    %15 = vector.broadcast %cst_17 : f32 to vector<18x1x32xf32>
    %c0_18 = arith.constant 0 : index
    %c17_19 = arith.constant 17 : index
    %c0_20 = arith.constant 0 : index
    %16 = vector.load %arg9[%c0_18, %c17_19, %c0_20] : memref<18x18x32xf32, #tpu.memory_space<vmem>>, vector<18x1x32xf32>
    tpu.vector_store %arg9[%c0_18, %c17_19, %c0_20], %15 {strides = array<i32>} : memref<18x18x32xf32, #tpu.memory_space<vmem>>, vector<18x1x32xf32>,
    %c1 = arith.constant 1 : index
    %c1_21 = arith.constant 1 : index
    %c0_22 = arith.constant 0 : index
    %17 = vector.load %arg9[%c1, %c1_21, %c0_22] : memref<18x18x32xf32, #tpu.memory_space<vmem>>, vector<16x16x32xf32>
    tpu.vector_store %arg9[%c1, %c1_21, %c0_22], %8 {strides = array<i32>} : memref<18x18x32xf32, #tpu.memory_space<vmem>>, vector<16x16x32xf32>,
    %cst_23 = arith.constant 0.000000e+00 : f32
    %18 = vector.broadcast %cst_23 : f32 to vector<256x16xf32>
    %c0_24 = arith.constant 0 : index
    %c0_25 = arith.constant 0 : index
    %c0_26 = arith.constant 0 : index
    %19 = vector.load %arg9[%c0_24, %c0_25, %c0_26] : memref<18x18x32xf32, #tpu.memory_space<vmem>>, vector<16x16x32xf32>
    %20 = vector.shape_cast %19 : vector<16x16x32xf32> to vector<256x32xf32>
    %c0_27 = arith.constant 0 : index
    %c0_28 = arith.constant 0 : index
    %c0_29 = arith.constant 0 : index
    %21 = vector.load %arg4[%c0_27, %c0_28, %c0_29] : memref<9x32x16xf32, #tpu.memory_space<vmem>>, vector<1x32x16xf32>
    %22 = vector.shape_cast %21 : vector<1x32x16xf32> to vector<32x16xf32>
    %cst_30 = arith.constant dense<0.000000e+00> : vector<256x16xf32>
    %23 = tpu.matmul %20, %22, %cst_30 {dimension_numbers = #tpu.dot_dimension_numbers<[1], [0], [0], [1], [0, 0, 1, 1], [], []>} : vector<256x32xf32>, vector<32x16xf32>, vector<256x16xf32> -> vector<256x16xf32>
    %24 = arith.addf %18, %23 : vector<256x16xf32>
    %c0_31 = arith.constant 0 : index
    %c1_32 = arith.constant 1 : index
    %c0_33 = arith.constant 0 : index
    %25 = vector.load %arg9[%c0_31, %c1_32, %c0_33] : memref<18x18x32xf32, #tpu.memory_space<vmem>>, vector<16x16x32xf32>
    %26 = vector.shape_cast %25 : vector<16x16x32xf32> to vector<256x32xf32>
    %c1_34 = arith.constant 1 : index
    %c0_35 = arith.constant 0 : index
    %c0_36 = arith.constant 0 : index
    %27 = vector.load %arg4[%c1_34, %c0_35, %c0_36] : memref<9x32x16xf32, #tpu.memory_space<vmem>>, vector<1x32x16xf32>
    %28 = vector.shape_cast %27 : vector<1x32x16xf32> to vector<32x16xf32>
    %cst_37 = arith.constant dense<0.000000e+00> : vector<256x16xf32>
    %29 = tpu.matmul %26, %28, %cst_37 {dimension_numbers = #tpu.dot_dimension_numbers<[1], [0], [0], [1], [0, 0, 1, 1], [], []>} : vector<256x32xf32>, vector<32x16xf32>, vector<256x16xf32> -> vector<256x16xf32>
    %30 = arith.addf %24, %29 : vector<256x16xf32>
    %c0_38 = arith.constant 0 : index
    %c2 = arith.constant 2 : index
    %c0_39 = arith.constant 0 : index
    %31 = vector.load %arg9[%c0_38, %c2, %c0_39] : memref<18x18x32xf32, #tpu.memory_space<vmem>>, vector<16x16x32xf32>
    %32 = vector.shape_cast %31 : vector<16x16x32xf32> to vector<256x32xf32>
    %c2_40 = arith.constant 2 : index
    %c0_41 = arith.constant 0 : index
    %c0_42 = arith.constant 0 : index
    %33 = vector.load %arg4[%c2_40, %c0_41, %c0_42] : memref<9x32x16xf32, #tpu.memory_space<vmem>>, vector<1x32x16xf32>
    %34 = vector.shape_cast %33 : vector<1x32x16xf32> to vector<32x16xf32>
    %cst_43 = arith.constant dense<0.000000e+00> : vector<256x16xf32>
    %35 = tpu.matmul %32, %34, %cst_43 {dimension_numbers = #tpu.dot_dimension_numbers<[1], [0], [0], [1], [0, 0, 1, 1], [], []>} : vector<256x32xf32>, vector<32x16xf32>, vector<256x16xf32> -> vector<256x16xf32>
    %36 = arith.addf %30, %35 : vector<256x16xf32>
    %c1_44 = arith.constant 1 : index
    %c0_45 = arith.constant 0 : index
    %c0_46 = arith.constant 0 : index
    %37 = vector.load %arg9[%c1_44, %c0_45, %c0_46] : memref<18x18x32xf32, #tpu.memory_space<vmem>>, vector<16x16x32xf32>
    %38 = vector.shape_cast %37 : vector<16x16x32xf32> to vector<256x32xf32>
    %c3 = arith.constant 3 : index
    %c0_47 = arith.constant 0 : index
    %c0_48 = arith.constant 0 : index
    %39 = vector.load %arg4[%c3, %c0_47, %c0_48] : memref<9x32x16xf32, #tpu.memory_space<vmem>>, vector<1x32x16xf32>
    %40 = vector.shape_cast %39 : vector<1x32x16xf32> to vector<32x16xf32>
    %cst_49 = arith.constant dense<0.000000e+00> : vector<256x16xf32>
    %41 = tpu.matmul %38, %40, %cst_49 {dimension_numbers = #tpu.dot_dimension_numbers<[1], [0], [0], [1], [0, 0, 1, 1], [], []>} : vector<256x32xf32>, vector<32x16xf32>, vector<256x16xf32> -> vector<256x16xf32>
    %42 = arith.addf %36, %41 : vector<256x16xf32>
    %c1_50 = arith.constant 1 : index
    %c1_51 = arith.constant 1 : index
    %c0_52 = arith.constant 0 : index
    %43 = vector.load %arg9[%c1_50, %c1_51, %c0_52] : memref<18x18x32xf32, #tpu.memory_space<vmem>>, vector<16x16x32xf32>
    %44 = vector.shape_cast %43 : vector<16x16x32xf32> to vector<256x32xf32>
    %c4 = arith.constant 4 : index
    %c0_53 = arith.constant 0 : index
    %c0_54 = arith.constant 0 : index
    %45 = vector.load %arg4[%c4, %c0_53, %c0_54] : memref<9x32x16xf32, #tpu.memory_space<vmem>>, vector<1x32x16xf32>
    %46 = vector.shape_cast %45 : vector<1x32x16xf32> to vector<32x16xf32>
    %cst_55 = arith.constant dense<0.000000e+00> : vector<256x16xf32>
    %47 = tpu.matmul %44, %46, %cst_55 {dimension_numbers = #tpu.dot_dimension_numbers<[1], [0], [0], [1], [0, 0, 1, 1], [], []>} : vector<256x32xf32>, vector<32x16xf32>, vector<256x16xf32> -> vector<256x16xf32>
    %48 = arith.addf %42, %47 : vector<256x16xf32>
    %c1_56 = arith.constant 1 : index
    %c2_57 = arith.constant 2 : index
    %c0_58 = arith.constant 0 : index
    %49 = vector.load %arg9[%c1_56, %c2_57, %c0_58] : memref<18x18x32xf32, #tpu.memory_space<vmem>>, vector<16x16x32xf32>
    %50 = vector.shape_cast %49 : vector<16x16x32xf32> to vector<256x32xf32>
    %c5 = arith.constant 5 : index
    %c0_59 = arith.constant 0 : index
    %c0_60 = arith.constant 0 : index
    %51 = vector.load %arg4[%c5, %c0_59, %c0_60] : memref<9x32x16xf32, #tpu.memory_space<vmem>>, vector<1x32x16xf32>
    %52 = vector.shape_cast %51 : vector<1x32x16xf32> to vector<32x16xf32>
    %cst_61 = arith.constant dense<0.000000e+00> : vector<256x16xf32>
    %53 = tpu.matmul %50, %52, %cst_61 {dimension_numbers = #tpu.dot_dimension_numbers<[1], [0], [0], [1], [0, 0, 1, 1], [], []>} : vector<256x32xf32>, vector<32x16xf32>, vector<256x16xf32> -> vector<256x16xf32>
    %54 = arith.addf %48, %53 : vector<256x16xf32>
    %c2_62 = arith.constant 2 : index
    %c0_63 = arith.constant 0 : index
    %c0_64 = arith.constant 0 : index
    %55 = vector.load %arg9[%c2_62, %c0_63, %c0_64] : memref<18x18x32xf32, #tpu.memory_space<vmem>>, vector<16x16x32xf32>
    %56 = vector.shape_cast %55 : vector<16x16x32xf32> to vector<256x32xf32>
    %c6 = arith.constant 6 : index
    %c0_65 = arith.constant 0 : index
    %c0_66 = arith.constant 0 : index
    %57 = vector.load %arg4[%c6, %c0_65, %c0_66] : memref<9x32x16xf32, #tpu.memory_space<vmem>>, vector<1x32x16xf32>
    %58 = vector.shape_cast %57 : vector<1x32x16xf32> to vector<32x16xf32>
    %cst_67 = arith.constant dense<0.000000e+00> : vector<256x16xf32>
    %59 = tpu.matmul %56, %58, %cst_67 {dimension_numbers = #tpu.dot_dimension_numbers<[1], [0], [0], [1], [0, 0, 1, 1], [], []>} : vector<256x32xf32>, vector<32x16xf32>, vector<256x16xf32> -> vector<256x16xf32>
    %60 = arith.addf %54, %59 : vector<256x16xf32>
    %c2_68 = arith.constant 2 : index
    %c1_69 = arith.constant 1 : index
    %c0_70 = arith.constant 0 : index
    %61 = vector.load %arg9[%c2_68, %c1_69, %c0_70] : memref<18x18x32xf32, #tpu.memory_space<vmem>>, vector<16x16x32xf32>
    %62 = vector.shape_cast %61 : vector<16x16x32xf32> to vector<256x32xf32>
    %c7 = arith.constant 7 : index
    %c0_71 = arith.constant 0 : index
    %c0_72 = arith.constant 0 : index
    %63 = vector.load %arg4[%c7, %c0_71, %c0_72] : memref<9x32x16xf32, #tpu.memory_space<vmem>>, vector<1x32x16xf32>
    %64 = vector.shape_cast %63 : vector<1x32x16xf32> to vector<32x16xf32>
    %cst_73 = arith.constant dense<0.000000e+00> : vector<256x16xf32>
    %65 = tpu.matmul %62, %64, %cst_73 {dimension_numbers = #tpu.dot_dimension_numbers<[1], [0], [0], [1], [0, 0, 1, 1], [], []>} : vector<256x32xf32>, vector<32x16xf32>, vector<256x16xf32> -> vector<256x16xf32>
    %66 = arith.addf %60, %65 : vector<256x16xf32>
    %c2_74 = arith.constant 2 : index
    %c2_75 = arith.constant 2 : index
    %c0_76 = arith.constant 0 : index
    %67 = vector.load %arg9[%c2_74, %c2_75, %c0_76] : memref<18x18x32xf32, #tpu.memory_space<vmem>>, vector<16x16x32xf32>
    %68 = vector.shape_cast %67 : vector<16x16x32xf32> to vector<256x32xf32>
    %c8 = arith.constant 8 : index
    %c0_77 = arith.constant 0 : index
    %c0_78 = arith.constant 0 : index
    %69 = vector.load %arg4[%c8, %c0_77, %c0_78] : memref<9x32x16xf32, #tpu.memory_space<vmem>>, vector<1x32x16xf32>
    %70 = vector.shape_cast %69 : vector<1x32x16xf32> to vector<32x16xf32>
    %cst_79 = arith.constant dense<0.000000e+00> : vector<256x16xf32>
    %71 = tpu.matmul %68, %70, %cst_79 {dimension_numbers = #tpu.dot_dimension_numbers<[1], [0], [0], [1], [0, 0, 1, 1], [], []>} : vector<256x32xf32>, vector<32x16xf32>, vector<256x16xf32> -> vector<256x16xf32>
    %72 = arith.addf %66, %71 : vector<256x16xf32>
    %c0_80 = arith.constant 0 : index
    %c0_81 = arith.constant 0 : index
    %73 = vector.load %arg5[%c0_80, %c0_81] : memref<1x16xf32, #tpu.memory_space<vmem>>, vector<1x16xf32>
    %74 = vector.broadcast %73 : vector<1x16xf32> to vector<256x16xf32>
    %75 = arith.addf %72, %74 : vector<256x16xf32>
    %76 = math.tanh %75 : vector<256x16xf32>
    %77 = vector.shape_cast %76 : vector<256x16xf32> to vector<16x16x16xf32>
    %cst_82 = arith.constant 0.000000e+00 : f32
    %78 = vector.broadcast %cst_82 : f32 to vector<1x18x16xf32>
    %c0_83 = arith.constant 0 : index
    %c0_84 = arith.constant 0 : index
    %c0_85 = arith.constant 0 : index
    %79 = vector.load %arg10[%c0_83, %c0_84, %c0_85] : memref<18x18x16xf32, #tpu.memory_space<vmem>>, vector<1x18x16xf32>
    tpu.vector_store %arg10[%c0_83, %c0_84, %c0_85], %78 {strides = array<i32>} : memref<18x18x16xf32, #tpu.memory_space<vmem>>, vector<1x18x16xf32>,
    %cst_86 = arith.constant 0.000000e+00 : f32
    %80 = vector.broadcast %cst_86 : f32 to vector<1x18x16xf32>
    %c17_87 = arith.constant 17 : index
    %c0_88 = arith.constant 0 : index
    %c0_89 = arith.constant 0 : index
    %81 = vector.load %arg10[%c17_87, %c0_88, %c0_89] : memref<18x18x16xf32, #tpu.memory_space<vmem>>, vector<1x18x16xf32>
    tpu.vector_store %arg10[%c17_87, %c0_88, %c0_89], %80 {strides = array<i32>} : memref<18x18x16xf32, #tpu.memory_space<vmem>>, vector<1x18x16xf32>,
    %cst_90 = arith.constant 0.000000e+00 : f32
    %82 = vector.broadcast %cst_90 : f32 to vector<18x1x16xf32>
    %c0_91 = arith.constant 0 : index
    %c0_92 = arith.constant 0 : index
    %c0_93 = arith.constant 0 : index
    %83 = vector.load %arg10[%c0_91, %c0_92, %c0_93] : memref<18x18x16xf32, #tpu.memory_space<vmem>>, vector<18x1x16xf32>
    tpu.vector_store %arg10[%c0_91, %c0_92, %c0_93], %82 {strides = array<i32>} : memref<18x18x16xf32, #tpu.memory_space<vmem>>, vector<18x1x16xf32>,
    %cst_94 = arith.constant 0.000000e+00 : f32
    %84 = vector.broadcast %cst_94 : f32 to vector<18x1x16xf32>
    %c0_95 = arith.constant 0 : index
    %c17_96 = arith.constant 17 : index
    %c0_97 = arith.constant 0 : index
    %85 = vector.load %arg10[%c0_95, %c17_96, %c0_97] : memref<18x18x16xf32, #tpu.memory_space<vmem>>, vector<18x1x16xf32>
    tpu.vector_store %arg10[%c0_95, %c17_96, %c0_97], %84 {strides = array<i32>} : memref<18x18x16xf32, #tpu.memory_space<vmem>>, vector<18x1x16xf32>,
    %c1_98 = arith.constant 1 : index
    %c1_99 = arith.constant 1 : index
    %c0_100 = arith.constant 0 : index
    %86 = vector.load %arg10[%c1_98, %c1_99, %c0_100] : memref<18x18x16xf32, #tpu.memory_space<vmem>>, vector<16x16x16xf32>
    tpu.vector_store %arg10[%c1_98, %c1_99, %c0_100], %77 {strides = array<i32>} : memref<18x18x16xf32, #tpu.memory_space<vmem>>, vector<16x16x16xf32>,
    %cst_101 = arith.constant 0.000000e+00 : f32
    %87 = vector.broadcast %cst_101 : f32 to vector<256x128xf32>
    %c0_102 = arith.constant 0 : index
    %c0_103 = arith.constant 0 : index
    %c0_104 = arith.constant 0 : index
    %88 = vector.load %arg10[%c0_102, %c0_103, %c0_104] : memref<18x18x16xf32, #tpu.memory_space<vmem>>, vector<16x16x16xf32>
    %89 = vector.shape_cast %88 : vector<16x16x16xf32> to vector<256x16xf32>
    %c0_105 = arith.constant 0 : index
    %c0_106 = arith.constant 0 : index
    %c0_107 = arith.constant 0 : index
    %90 = vector.load %arg6[%c0_105, %c0_106, %c0_107] : memref<9x16x128xf32, #tpu.memory_space<vmem>>, vector<1x16x128xf32>
    %91 = vector.shape_cast %90 : vector<1x16x128xf32> to vector<16x128xf32>
    %cst_108 = arith.constant dense<0.000000e+00> : vector<256x128xf32>
    %92 = tpu.matmul %89, %91, %cst_108 {dimension_numbers = #tpu.dot_dimension_numbers<[1], [0], [0], [1], [0, 0, 1, 1], [], []>} : vector<256x16xf32>, vector<16x128xf32>, vector<256x128xf32> -> vector<256x128xf32>
    %93 = arith.addf %87, %92 : vector<256x128xf32>
    %c0_109 = arith.constant 0 : index
    %c1_110 = arith.constant 1 : index
    %c0_111 = arith.constant 0 : index
    %94 = vector.load %arg10[%c0_109, %c1_110, %c0_111] : memref<18x18x16xf32, #tpu.memory_space<vmem>>, vector<16x16x16xf32>
    %95 = vector.shape_cast %94 : vector<16x16x16xf32> to vector<256x16xf32>
    %c1_112 = arith.constant 1 : index
    %c0_113 = arith.constant 0 : index
    %c0_114 = arith.constant 0 : index
    %96 = vector.load %arg6[%c1_112, %c0_113, %c0_114] : memref<9x16x128xf32, #tpu.memory_space<vmem>>, vector<1x16x128xf32>
    %97 = vector.shape_cast %96 : vector<1x16x128xf32> to vector<16x128xf32>
    %cst_115 = arith.constant dense<0.000000e+00> : vector<256x128xf32>
    %98 = tpu.matmul %95, %97, %cst_115 {dimension_numbers = #tpu.dot_dimension_numbers<[1], [0], [0], [1], [0, 0, 1, 1], [], []>} : vector<256x16xf32>, vector<16x128xf32>, vector<256x128xf32> -> vector<256x128xf32>
    %99 = arith.addf %93, %98 : vector<256x128xf32>
    %c0_116 = arith.constant 0 : index
    %c2_117 = arith.constant 2 : index
    %c0_118 = arith.constant 0 : index
    %100 = vector.load %arg10[%c0_116, %c2_117, %c0_118] : memref<18x18x16xf32, #tpu.memory_space<vmem>>, vector<16x16x16xf32>
    %101 = vector.shape_cast %100 : vector<16x16x16xf32> to vector<256x16xf32>
    %c2_119 = arith.constant 2 : index
    %c0_120 = arith.constant 0 : index
    %c0_121 = arith.constant 0 : index
    %102 = vector.load %arg6[%c2_119, %c0_120, %c0_121] : memref<9x16x128xf32, #tpu.memory_space<vmem>>, vector<1x16x128xf32>
    %103 = vector.shape_cast %102 : vector<1x16x128xf32> to vector<16x128xf32>
    %cst_122 = arith.constant dense<0.000000e+00> : vector<256x128xf32>
    %104 = tpu.matmul %101, %103, %cst_122 {dimension_numbers = #tpu.dot_dimension_numbers<[1], [0], [0], [1], [0, 0, 1, 1], [], []>} : vector<256x16xf32>, vector<16x128xf32>, vector<256x128xf32> -> vector<256x128xf32>
    %105 = arith.addf %99, %104 : vector<256x128xf32>
    %c1_123 = arith.constant 1 : index
    %c0_124 = arith.constant 0 : index
    %c0_125 = arith.constant 0 : index
    %106 = vector.load %arg10[%c1_123, %c0_124, %c0_125] : memref<18x18x16xf32, #tpu.memory_space<vmem>>, vector<16x16x16xf32>
    %107 = vector.shape_cast %106 : vector<16x16x16xf32> to vector<256x16xf32>
    %c3_126 = arith.constant 3 : index
    %c0_127 = arith.constant 0 : index
    %c0_128 = arith.constant 0 : index
    %108 = vector.load %arg6[%c3_126, %c0_127, %c0_128] : memref<9x16x128xf32, #tpu.memory_space<vmem>>, vector<1x16x128xf32>
    %109 = vector.shape_cast %108 : vector<1x16x128xf32> to vector<16x128xf32>
    %cst_129 = arith.constant dense<0.000000e+00> : vector<256x128xf32>
    %110 = tpu.matmul %107, %109, %cst_129 {dimension_numbers = #tpu.dot_dimension_numbers<[1], [0], [0], [1], [0, 0, 1, 1], [], []>} : vector<256x16xf32>, vector<16x128xf32>, vector<256x128xf32> -> vector<256x128xf32>
    %111 = arith.addf %105, %110 : vector<256x128xf32>
    %c1_130 = arith.constant 1 : index
    %c1_131 = arith.constant 1 : index
    %c0_132 = arith.constant 0 : index
    %112 = vector.load %arg10[%c1_130, %c1_131, %c0_132] : memref<18x18x16xf32, #tpu.memory_space<vmem>>, vector<16x16x16xf32>
    %113 = vector.shape_cast %112 : vector<16x16x16xf32> to vector<256x16xf32>
    %c4_133 = arith.constant 4 : index
    %c0_134 = arith.constant 0 : index
    %c0_135 = arith.constant 0 : index
    %114 = vector.load %arg6[%c4_133, %c0_134, %c0_135] : memref<9x16x128xf32, #tpu.memory_space<vmem>>, vector<1x16x128xf32>
    %115 = vector.shape_cast %114 : vector<1x16x128xf32> to vector<16x128xf32>
    %cst_136 = arith.constant dense<0.000000e+00> : vector<256x128xf32>
    %116 = tpu.matmul %113, %115, %cst_136 {dimension_numbers = #tpu.dot_dimension_numbers<[1], [0], [0], [1], [0, 0, 1, 1], [], []>} : vector<256x16xf32>, vector<16x128xf32>, vector<256x128xf32> -> vector<256x128xf32>
    %117 = arith.addf %111, %116 : vector<256x128xf32>
    %c1_137 = arith.constant 1 : index
    %c2_138 = arith.constant 2 : index
    %c0_139 = arith.constant 0 : index
    %118 = vector.load %arg10[%c1_137, %c2_138, %c0_139] : memref<18x18x16xf32, #tpu.memory_space<vmem>>, vector<16x16x16xf32>
    %119 = vector.shape_cast %118 : vector<16x16x16xf32> to vector<256x16xf32>
    %c5_140 = arith.constant 5 : index
    %c0_141 = arith.constant 0 : index
    %c0_142 = arith.constant 0 : index
    %120 = vector.load %arg6[%c5_140, %c0_141, %c0_142] : memref<9x16x128xf32, #tpu.memory_space<vmem>>, vector<1x16x128xf32>
    %121 = vector.shape_cast %120 : vector<1x16x128xf32> to vector<16x128xf32>
    %cst_143 = arith.constant dense<0.000000e+00> : vector<256x128xf32>
    %122 = tpu.matmul %119, %121, %cst_143 {dimension_numbers = #tpu.dot_dimension_numbers<[1], [0], [0], [1], [0, 0, 1, 1], [], []>} : vector<256x16xf32>, vector<16x128xf32>, vector<256x128xf32> -> vector<256x128xf32>
    %123 = arith.addf %117, %122 : vector<256x128xf32>
    %c2_144 = arith.constant 2 : index
    %c0_145 = arith.constant 0 : index
    %c0_146 = arith.constant 0 : index
    %124 = vector.load %arg10[%c2_144, %c0_145, %c0_146] : memref<18x18x16xf32, #tpu.memory_space<vmem>>, vector<16x16x16xf32>
    %125 = vector.shape_cast %124 : vector<16x16x16xf32> to vector<256x16xf32>
    %c6_147 = arith.constant 6 : index
    %c0_148 = arith.constant 0 : index
    %c0_149 = arith.constant 0 : index
    %126 = vector.load %arg6[%c6_147, %c0_148, %c0_149] : memref<9x16x128xf32, #tpu.memory_space<vmem>>, vector<1x16x128xf32>
    %127 = vector.shape_cast %126 : vector<1x16x128xf32> to vector<16x128xf32>
    %cst_150 = arith.constant dense<0.000000e+00> : vector<256x128xf32>
    %128 = tpu.matmul %125, %127, %cst_150 {dimension_numbers = #tpu.dot_dimension_numbers<[1], [0], [0], [1], [0, 0, 1, 1], [], []>} : vector<256x16xf32>, vector<16x128xf32>, vector<256x128xf32> -> vector<256x128xf32>
    %129 = arith.addf %123, %128 : vector<256x128xf32>
    %c2_151 = arith.constant 2 : index
    %c1_152 = arith.constant 1 : index
    %c0_153 = arith.constant 0 : index
    %130 = vector.load %arg10[%c2_151, %c1_152, %c0_153] : memref<18x18x16xf32, #tpu.memory_space<vmem>>, vector<16x16x16xf32>
    %131 = vector.shape_cast %130 : vector<16x16x16xf32> to vector<256x16xf32>
    %c7_154 = arith.constant 7 : index
    %c0_155 = arith.constant 0 : index
    %c0_156 = arith.constant 0 : index
    %132 = vector.load %arg6[%c7_154, %c0_155, %c0_156] : memref<9x16x128xf32, #tpu.memory_space<vmem>>, vector<1x16x128xf32>
    %133 = vector.shape_cast %132 : vector<1x16x128xf32> to vector<16x128xf32>
    %cst_157 = arith.constant dense<0.000000e+00> : vector<256x128xf32>
    %134 = tpu.matmul %131, %133, %cst_157 {dimension_numbers = #tpu.dot_dimension_numbers<[1], [0], [0], [1], [0, 0, 1, 1], [], []>} : vector<256x16xf32>, vector<16x128xf32>, vector<256x128xf32> -> vector<256x128xf32>
    %135 = arith.addf %129, %134 : vector<256x128xf32>
    %c2_158 = arith.constant 2 : index
    %c2_159 = arith.constant 2 : index
    %c0_160 = arith.constant 0 : index
    %136 = vector.load %arg10[%c2_158, %c2_159, %c0_160] : memref<18x18x16xf32, #tpu.memory_space<vmem>>, vector<16x16x16xf32>
    %137 = vector.shape_cast %136 : vector<16x16x16xf32> to vector<256x16xf32>
    %c8_161 = arith.constant 8 : index
    %c0_162 = arith.constant 0 : index
    %c0_163 = arith.constant 0 : index
    %138 = vector.load %arg6[%c8_161, %c0_162, %c0_163] : memref<9x16x128xf32, #tpu.memory_space<vmem>>, vector<1x16x128xf32>
    %139 = vector.shape_cast %138 : vector<1x16x128xf32> to vector<16x128xf32>
    %cst_164 = arith.constant dense<0.000000e+00> : vector<256x128xf32>
    %140 = tpu.matmul %137, %139, %cst_164 {dimension_numbers = #tpu.dot_dimension_numbers<[1], [0], [0], [1], [0, 0, 1, 1], [], []>} : vector<256x16xf32>, vector<16x128xf32>, vector<256x128xf32> -> vector<256x128xf32>
    %141 = arith.addf %135, %140 : vector<256x128xf32>
    %c0_165 = arith.constant 0 : index
    %c0_166 = arith.constant 0 : index
    %142 = vector.load %arg7[%c0_165, %c0_166] : memref<1x128xf32, #tpu.memory_space<vmem>>, vector<1x128xf32>
    %143 = vector.broadcast %142 : vector<1x128xf32> to vector<256x128xf32>
    %144 = arith.addf %141, %143 : vector<256x128xf32>
    %c0_167 = arith.constant 0 : index
    %c0_168 = arith.constant 0 : index
    %c0_169 = arith.constant 0 : index
    %145 = vector.load %arg8[%c0_167, %c0_168, %c0_169] : memref<1x256x128xf32, #tpu.memory_space<vmem>>, vector<1x256x128xf32>
    %146 = vector.shape_cast %145 : vector<1x256x128xf32> to vector<256x128xf32>
    %147 = vector.shape_cast %144 : vector<256x128xf32> to vector<1x256x128xf32>
    tpu.vector_store %arg8[%c0_167, %c0_168, %c0_169], %147 {strides = array<i32>} : memref<1x256x128xf32, #tpu.memory_space<vmem>>, vector<1x256x128xf32>,
    return
  }
  func.func @transform_0(%arg0: i32) -> (i32, i32, i32) {
    %c0_i32 = arith.constant 0 : i32
    %c0_i32_0 = arith.constant 0 : i32
    %c0_i32_1 = arith.constant 0 : i32
    return %arg0, %c0_i32, %c0_i32_0 : i32, i32, i32
  }
  func.func @transform_1(%arg0: i32) -> (i32, i32) {
    %c0_i32 = arith.constant 0 : i32
    %c0_i32_0 = arith.constant 0 : i32
    %c0_i32_1 = arith.constant 0 : i32
    return %c0_i32, %c0_i32_0 : i32, i32
  }
  func.func @transform_2(%arg0: i32) -> (i32, i32) {
    %c0_i32 = arith.constant 0 : i32
    %c0_i32_0 = arith.constant 0 : i32
    %c0_i32_1 = arith.constant 0 : i32
    return %c0_i32, %c0_i32_0 : i32, i32
  }
  func.func @transform_3(%arg0: i32) -> (i32, i32, i32) {
    %c0_i32 = arith.constant 0 : i32
    %c0_i32_0 = arith.constant 0 : i32
    %c0_i32_1 = arith.constant 0 : i32
    %c0_i32_2 = arith.constant 0 : i32
    return %c0_i32, %c0_i32_0, %c0_i32_1 : i32, i32, i32
  }
  func.func @transform_4(%arg0: i32) -> (i32, i32) {
    %c0_i32 = arith.constant 0 : i32
    %c0_i32_0 = arith.constant 0 : i32
    %c0_i32_1 = arith.constant 0 : i32
    return %c0_i32, %c0_i32_0 : i32, i32
  }
  func.func @transform_5(%arg0: i32) -> (i32, i32, i32) {
    %c0_i32 = arith.constant 0 : i32
    %c0_i32_0 = arith.constant 0 : i32
    %c0_i32_1 = arith.constant 0 : i32
    %c0_i32_2 = arith.constant 0 : i32
    return %c0_i32, %c0_i32_0, %c0_i32_1 : i32, i32, i32
  }
  func.func @transform_6(%arg0: i32) -> (i32, i32) {
    %c0_i32 = arith.constant 0 : i32
    %c0_i32_0 = arith.constant 0 : i32
    %c0_i32_1 = arith.constant 0 : i32
    return %c0_i32, %c0_i32_0 : i32, i32
  }
  func.func @transform_7(%arg0: i32) -> (i32, i32, i32) {
    %c0_i32 = arith.constant 0 : i32
    %c0_i32_0 = arith.constant 0 : i32
    %c0_i32_1 = arith.constant 0 : i32
    return %arg0, %c0_i32, %c0_i32_0 : i32, i32, i32
  }
}

</mosaic_0001>

<bundles_post_ra>
// kernel: espcn_forward.1
= control target key start
LH: loop header
LB: loop body
LE: loop exit
PB: predicated region body
PF: predicated region fallthrough
CT: control target
= control target key end

     0   :  { %s6534_s24 = smov 0   ;;  %s9184_s0 = inlined_call_operand.vmem [shape: f32[2,256,128], index: 0, kind: input, shape index: {}]   ;;  %s9185_s1 = inlined_call_operand.vmem [shape: f32[128,32], index: 1, kind: input, shape index: {}]   ;;  %s9186_s2 = inlined_call_operand.vmem [shape: f32[1,32], index: 2, kind: input, shape index: {}]   ;;  %s9187_s3 = inlined_call_operand.vmem [shape: f32[9,32,16], index: 3, kind: input, shape index: {}]   ;;  %s9188_s4 = inlined_call_operand.vmem [shape: f32[1,16], index: 4, kind: input, shape index: {}]   ;;  %s9189_s5 = inlined_call_operand.vmem [shape: f32[9,16,128], index: 5, kind: input, shape index: {}]   ;;  %s9190_s6 = inlined_call_operand.vmem [shape: f32[1,128], index: 6, kind: input, shape index: {}]   ;;  %s9191_s7 = inlined_call_operand.vmem [shape: f32[2,256,128], index: 7, kind: output, shape index: {}]  }
   0x1 LB: > { %s5683_s25 = sadd.s32 4294967295, %s6491_s24   ;;  %p5687_p0 = scmp.ge.s32.totalorder %s6491_s24, 1  ;;  %s6491_s24 = sphi %s6534_s24, %s17_s24  }
   0x2   : > { %p237_p1 = scmp.lt.s32.totalorder %s6491_s24, 3 }
   0x4   : > { %p238_p2 = pnand %p5687_p0, %p237_p1 }
   0x6   : > { %241 = sbr.rel (%p238_p2) target bundleno = 1719 (0x6b7), region = 48 }
   0xb   : > { %v326_v0 = vld [vmem:[%s9185_s1 + $0x78] sm:$0xff]  ;;  %v325_v1 = vld [vmem:[%s9185_s1 + $0x70] sm:$0xff]  ;;  %v324_v2 = vld [vmem:[%s9185_s1 + $0x68] sm:$0xff]  ;;  %p269_p3 = scmp.lt.s32.totalorder %s5683_s25, 1  ;;  %vm485_vm0 = vcmask 253952   ;;  %vm476_vm1 = vcmask 261120  }
   0xc   : > { %331 = vmatpush.msra.mxu0 %v326_v0  ;;  %v323_v3 = vld [vmem:[%s9185_s1 + $0x60] sm:$0xff]  ;;  %v322_v4 = vld [vmem:[%s9185_s1 + $0x58] sm:$0xff]  ;;  %v321_v5 = vld [vmem:[%s9185_s1 + $0x50] sm:$0xff]  ;;  %v9192_v30 = vmov 0.0   ;;  %vm479_vm2 = vcmask 254976   ;;  %vm3061_vm3 = vcmask 130048  }
   0xd   : > { %v320_v6 = vld [vmem:[%s9185_s1 + $0x48] sm:$0xff]  ;;  %v319_v7 = vld [vmem:[%s9185_s1 + $0x40] sm:$0xff]  ;;  %v318_v8 = vld [vmem:[%s9185_s1 + $0x38] sm:$0xff]  ;;  %s9407_s25 = smov (!%p269_p3, %s5683_s25), 1  ;;  %507 = vst.msk [vmem:[#allocation2 + $0x59] sm:$0x1] %vm485_vm0, %v9192_v30 }
   0xe   : > { %332 = vmatpush.msra.mxu0 %v325_v1  ;;  %v317_v9 = vld [vmem:[%s9185_s1 + $0x30] sm:$0xff]  ;;  %v316_v10 = vld [vmem:[%s9185_s1 + $0x28] sm:$0xff]  ;;  %v315_v11 = vld [vmem:[%s9185_s1 + $0x20] sm:$0xff]  ;;  %s6318_s8 = sshll.u32 %s9407_s25, 8  ;;  %477 = vst.msk [vmem:[#allocation2] sm:$0xff] %vm476_vm1, %v9192_v30  ;;  %vm3070_vm4 = vcmask 122880  }
   0xf   : > { %v314_v12 = vld [vmem:[%s9185_s1 + $0x18] sm:$0xff]  ;;  %v313_v13 = vld [vmem:[%s9185_s1 + $0x10] sm:$0xff]  ;;  %v312_v14 = vld [vmem:[%s9185_s1 + $0x8] sm:$0xff]  ;;  %s6595_s15 = scalar_lea.vmem %s9184_s0, %s6318_s8  ;;  %478 = vst.msk [vmem:[#allocation2 + $0x8] sm:$0xff] %vm476_vm1, %v9192_v30  ;;  %vm3064_vm5 = vcmask 123904   ;;  %s9067_s17 = scalar_lea.vmem %s9191_s7, %s6318_s8 }
  0x10   : > { %333 = vmatpush.msra.mxu0 %v324_v2  ;;  %v311_v15 = vld [vmem:[%s9185_s1] sm:$0xff]  ;;  %v280_v17 = vld [vmem:[%s6595_s15 + $0x8] sm:$0xff]  ;;  %v281_v18 = vld [vmem:[%s6595_s15 + $0x10] sm:$0xff]  ;;  %482 = vst.msk [vmem:[#allocation2 + $0x198] sm:$0xff] %vm476_vm1, %v9192_v30 }
  0x11   : > { %v279_v16 = vld [vmem:[%s6595_s15] sm:$0xff]  ;;  %v282_v19 = vld [vmem:[%s6595_s15 + $0x18] sm:$0xff]  ;;  %v284_v21 = vld [vmem:[%s6595_s15 + $0x28] sm:$0xff]  ;;  %483 = vst.msk [vmem:[#allocation2 + $0x1a0] sm:$0xff] %vm476_vm1, %v9192_v30 }
  0x12   : > { %334 = vmatpush.msra.mxu0 %v323_v3  ;;  %v283_v20 = vld [vmem:[%s6595_s15 + $0x20] sm:$0xff]  ;;  %v285_v22 = vld [vmem:[%s6595_s15 + $0x30] sm:$0xff]  ;;  %v286_v23 = vld [vmem:[%s6595_s15 + $0x38] sm:$0xff]  ;;  %487 = vst.msk [vmem:[#allocation2 + $0x18] sm:$0x1] %vm485_vm0, %v9192_v30 }
  0x13   : > { %v287_v24 = vld [vmem:[%s6595_s15 + $0x40] sm:$0xff]  ;;  %v288_v25 = vld [vmem:[%s6595_s15 + $0x48] sm:$0xff]  ;;  %v289_v26 = vld [vmem:[%s6595_s15 + $0x50] sm:$0xff]  ;;  %488 = vst.msk [vmem:[#allocation2 + $0x30] sm:$0x1] %vm485_vm0, %v9192_v30 }
  0x14   : > { %335 = vmatpush.msra.mxu0 %v322_v4  ;;  %v290_v27 = vld [vmem:[%s6595_s15 + $0x58] sm:$0xff]  ;;  %v291_v28 = vld [vmem:[%s6595_s15 + $0x60] sm:$0xff]  ;;  %v292_v29 = vld [vmem:[%s6595_s15 + $0x68] sm:$0xff]  ;;  %489 = vst.msk [vmem:[#allocation2 + $0x48] sm:$0x1] %vm485_vm0, %v9192_v30 }
  0x15   : > { %v293_v31 = vld [vmem:[%s6595_s15 + $0x70] sm:$0xff]  ;;  %490 = vst.msk [vmem:[#allocation2 + $0x60] sm:$0x1] %vm485_vm0, %v9192_v30  ;;  %v294_v32 = vld [vmem:[%s6595_s15 + $0x78] sm:$0xff]  ;;  %v6657_v33 = vld [vmem:[%s9186_s2] ss:$0 sm:$0xff] }
  0x16   : > { %336 = vmatpush.msra.mxu0 %v321_v5  ;;  %491 = vst.msk [vmem:[#allocation2 + $0x78] sm:$0x1] %vm485_vm0, %v9192_v30  ;;  %v295_v35 = vld [vmem:[%s6595_s15 + $0x80] sm:$0xff]  ;;  %v296_v38 = vld [vmem:[%s6595_s15 + $0x88] sm:$0xff]  ;;  %v297_v42 = vld [vmem:[%s6595_s15 + $0x90] sm:$0xff] }
  0x17   : > { %492 = vst.msk [vmem:[#allocation2 + $0x90] sm:$0x1] %vm485_vm0, %v9192_v30  ;;  %v5695_v45 = vld [vmem:[%s9187_s3 + $0x38] sm:$0xff]  ;;  %v5694_v48 = vld [vmem:[%s9187_s3 + $0x30] sm:$0xff]  ;;  %v5693_v51 = vld [vmem:[%s9187_s3 + $0x28] sm:$0xff] }
  0x18   : > { %337 = vmatpush.msra.mxu0 %v320_v6  ;;  %493 = vst.msk [vmem:[#allocation2 + $0xa8] sm:$0x1] %vm485_vm0, %v9192_v30  ;;  %v590_v46 = vld [vmem:[%s9187_s3 + $0x18] sm:$0xff]  ;;  %6320 = vmatpush.msra.mxu1 %v5695_v45  ;;  %v589_v49 = vld [vmem:[%s9187_s3 + $0x10] sm:$0xff]  ;;  %v588_v52 = vld [vmem:[%s9187_s3 + $0x8] sm:$0xff] }
  0x19   : > { %494 = vst.msk [vmem:[#allocation2 + $0xc0] sm:$0x1] %vm485_vm0, %v9192_v30  ;;  %v6714_v47 = vld [vmem:[%s9187_s3 + $0x58] sm:$0xff]  ;;  %6324 = vmatpush.msra.mxu2 %v590_v46  ;;  %v6726_v50 = vld [vmem:[%s9187_s3 + $0x50] sm:$0xff]  ;;  %v6738_v53 = vld [vmem:[%s9187_s3 + $0x48] sm:$0xff] }
  0x1a   : > { %338 = vmatpush.msra.mxu0 %v319_v7  ;;  %495 = vst.msk [vmem:[#allocation2 + $0xd8] sm:$0x1] %vm485_vm0, %v9192_v30  ;;  %6328 = vmatpush.msra.mxu3 %v6714_v47  ;;  %v298_v54 = vld [vmem:[%s6595_s15 + $0x98] sm:$0xff]  ;;  %v5692_v56 = vld [vmem:[%s9187_s3 + $0x20] sm:$0xff]  ;;  %v300_v4 = vld [vmem:[%s6595_s15 + $0xa8] sm:$0xff] }
  0x1b   : > { %496 = vst.msk [vmem:[#allocation2 + $0xf0] sm:$0x1] %vm485_vm0, %v9192_v30  ;;  %6321 = vmatpush.msra.mxu1 %v5694_v48  ;;  %6325 = vmatpush.msra.mxu2 %v589_v49  ;;  %v587_v57 = vld [vmem:[%s9187_s3] sm:$0xff]  ;;  %v5835_v1 = vld [vmem:[%s9187_s3 + $0x98] sm:$0xff] }
  0x1c   : > { %339 = vmatpush.msra.mxu0 %v318_v8  ;;  %497 = vst.msk [vmem:[#allocation2 + $0x108] sm:$0x1] %vm485_vm0, %v9192_v30  ;;  %6329 = vmatpush.msra.mxu3 %v6726_v50  ;;  %v6751_v58 = vld [vmem:[%s9187_s3 + $0x40] sm:$0xff]  ;;  %v5799_v2 = vld [vmem:[%s9187_s3 + $0x78] sm:$0xff]  ;;  %v301_v8 = vld [vmem:[%s6595_s15 + $0xb0] sm:$0xff] }
  0x1d   : > { %498 = vst.msk [vmem:[#allocation2 + $0x120] sm:$0x1] %vm485_vm0, %v9192_v30  ;;  %6322 = vmatpush.msra.mxu1 %v5693_v51  ;;  %6326 = vmatpush.msra.mxu2 %v588_v52  ;;  %v299_v62 = vld [vmem:[%s6595_s15 + $0xa0] sm:$0xff] }
  0x1e   : > { %340 = vmatpush.msra.mxu0 %v317_v9  ;;  %499 = vst.msk [vmem:[#allocation2 + $0x138] sm:$0x1] %vm485_vm0, %v9192_v30  ;;  %6330 = vmatpush.msra.mxu3 %v6738_v53 }
  0x1f   : > { %500 = vst.msk [vmem:[#allocation2 + $0x150] sm:$0x1] %vm485_vm0, %v9192_v30  ;;  %6323 = vmatpush.msra.mxu1 %v5692_v56  ;;  %6327 = vmatpush.msra.mxu2 %v587_v57 }
  0x20   : > { %341 = vmatpush.msra.mxu0 %v316_v10  ;;  %501 = vst.msk [vmem:[#allocation2 + $0x168] sm:$0x1] %vm485_vm0, %v9192_v30  ;;  %6331 = vmatpush.msra.mxu3 %v6751_v58 }
  0x21   : > { %502 = vst.msk [vmem:[#allocation2 + $0x180] sm:$0x1] %vm485_vm0, %v9192_v30  ;;  %1747 = vmatpush.msrb.mxu2 %v5835_v1  ;;  %1469 = vmatpush.msrb.mxu1 %v5799_v2 }
  0x22   : > { %342 = vmatpush.msra.mxu0 %v315_v11  ;;  %505 = vst.msk [vmem:[#allocation2 + $0x29] sm:$0x1] %vm485_vm0, %v9192_v30 }
  0x23   : > { %506 = vst.msk [vmem:[#allocation2 + $0x41] sm:$0x1] %vm485_vm0, %v9192_v30 }
  0x24   : > { %343 = vmatpush.msra.mxu0 %v314_v12  ;;  %508 = vst.msk [vmem:[#allocation2 + $0x71] sm:$0x1] %vm485_vm0, %v9192_v30  ;;  %v302_v12 = vld [vmem:[%s6595_s15 + $0xb8] sm:$0xff] }
  0x25   : > { %509 = vst.msk [vmem:[#allocation2 + $0x89] sm:$0x1] %vm485_vm0, %v9192_v30 }
  0x26   : > { %344 = vmatpush.msra.mxu0 %v313_v13  ;;  %510 = vst.msk [vmem:[#allocation2 + $0xa1] sm:$0x1] %vm485_vm0, %v9192_v30 }
  0x27   : > { %511 = vst.msk [vmem:[#allocation2 + $0xb9] sm:$0x1] %vm485_vm0, %v9192_v30 }
  0x28   : > { %345 = vmatpush.msra.mxu0 %v312_v14  ;;  %512 = vst.msk [vmem:[#allocation2 + $0xd1] sm:$0x1] %vm485_vm0, %v9192_v30 }
  0x29   : > { %513 = vst.msk [vmem:[#allocation2 + $0xe9] sm:$0x1] %vm485_vm0, %v9192_v30 }
  0x2a   : > { %346 = vmatpush.msra.mxu0 %v311_v15  ;;  %514 = vst.msk [vmem:[#allocation2 + $0x101] sm:$0x1] %vm485_vm0, %v9192_v30 }
  0x2b   : > { %347 = vmatmul.f32.vlgmr.msra.gmra.mxu0 %v279_v16  ;;  %515 = vst.msk [vmem:[#allocation2 + $0x119] sm:$0x1] %vm485_vm0, %v9192_v30 }
  0x2c   : > { %516 = vst.msk [vmem:[#allocation2 + $0x131] sm:$0x1] %vm485_vm0, %v9192_v30  ;;  %736 = vmatpush.msrb.mxu0 %v5695_v45 }
  0x2d   : > { %517 = vst.msk [vmem:[#allocation2 + $0x149] sm:$0x1] %vm485_vm0, %v9192_v30 }
  0x2e   : > { %518 = vst.msk [vmem:[#allocation2 + $0x161] sm:$0x1] %vm485_vm0, %v9192_v30  ;;  %737 = vmatpush.msrb.mxu0 %v5694_v48 }
  0x2f   : > { %519 = vst.msk [vmem:[#allocation2 + $0x179] sm:$0x1] %vm485_vm0, %v9192_v30 }
  0x30   : > { %520 = vst.msk [vmem:[#allocation2 + $0x191] sm:$0x1] %vm485_vm0, %v9192_v30  ;;  %738 = vmatpush.msrb.mxu0 %v5693_v51 }
  0x31   : > { %486 = vst.msk [vmem:[#allocation2] sm:$0x1] %vm485_vm0, %v9192_v30 }
  0x32   : > { %503 = vst.msk [vmem:[#allocation2 + $0x198] sm:$0x1] %vm485_vm0, %v9192_v30  ;;  %739 = vmatpush.msrb.mxu0 %v5692_v56 }
  0x33   : > { %350 = vmatmul.f32.gmra.mxu0 %v280_v17  ;;  %480 = vst.msk [vmem:[#allocation2 + $0x10] sm:$0x3] %vm479_vm2, %v9192_v30 }
  0x34   : > { %945 = vmatpush.msra.mxu0 %v590_v46  ;;  %484 = vst.msk [vmem:[#allocation2 + $0x1a8] sm:$0x3] %vm479_vm2, %v9192_v30 }
  0x35   : > { %504 = vst.msk [vmem:[#allocation2 + $0x11] sm:$0x1] %vm485_vm0, %v9192_v30 }
  0x36   : > { %946 = vmatpush.msra.mxu0 %v589_v49  ;;  %v5798_v49 = vld [vmem:[%s9187_s3 + $0x70] sm:$0xff]  ;;  %521 = vst.msk [vmem:[#allocation2 + $0x1a9] sm:$0x1] %vm485_vm0, %v9192_v30 }
  0x37   : > { %1470 = vmatpush.msrb.mxu1 %v5798_v49 }
  0x38   : > { %947 = vmatpush.msra.mxu0 %v588_v52  ;;  %v307_v52 = vld [vmem:[%s6595_s15 + $0xe0] sm:$0xff] }
  0x3a   : > { %948 = vmatpush.msra.mxu0 %v587_v57 }
  0x3b   : > { %353 = vmatmul.f32.gmra.mxu0 %v281_v18 }
  0x43   : > { %356 = vmatmul.f32.gmra.mxu0 %v282_v19  ;;  %v303_v19 = vld [vmem:[%s6595_s15 + $0xc0] sm:$0xff] }
  0x4b   : > { %359 = vmatmul.f32.gmra.mxu0 %v283_v20 }
  0x53   : > { %362 = vmatmul.f32.gmra.mxu0 %v284_v21 }
  0x5b   : > { %365 = vmatmul.f32.gmra.mxu0 %v285_v22 }
  0x63   : > { %368 = vmatmul.f32.gmra.mxu0 %v286_v23 }
  0x6b   : > { %371 = vmatmul.f32.gmra.mxu0 %v287_v24 }
  0x73   : > { %374 = vmatmul.f32.gmra.mxu0 %v288_v25  ;;  %v304_v25 = vld [vmem:[%s6595_s15 + $0xc8] sm:$0xff] }
  0x7b   : > { %377 = vmatmul.f32.gmra.mxu0 %v289_v26 }
  0x83   : > { %380 = vmatmul.f32.gmra.mxu0 %v290_v27 }
  0x8b   : > { %383 = vmatmul.f32.gmra.mxu0 %v291_v28 }
  0x93   : > { %386 = vmatmul.f32.gmra.mxu0 %v292_v29 }
  0x9b   : > { %389 = vmatmul.f32.gmra.mxu0 %v293_v31 }
  0xa3   : > { %392 = vmatmul.f32.gmra.mxu0 %v294_v32 }
  0xa8   : > { %v348_v34 = vpop.f32.mrf.mxu0 }
  0xa9   : > { %v349_v36 = vadd.f32 %v6657_v33, %v348_v34  ;;  %v305_v34 = vld [vmem:[%s6595_s15 + $0xd0] sm:$0xff] }
  0xab   : > { %6344 = vtanh.f32 %v349_v36  ;;  %395 = vmatmul.f32.gmra.mxu0 %v295_v35 }
  0xb0   : > { %v351_v37 = vpop.f32.mrf.mxu0 }
  0xb1   : > { %v6345_v39 = vpop.eup %6344  ;;  %v352_v40 = vadd.f32 %v6657_v33, %v351_v37 }
  0xb2   : > { %523 = vst.msk [vmem:[#allocation2 + $0x19] sm:$0xff] %vm476_vm1, %v6345_v39 }
  0xb3   : > { %6346 = vtanh.f32 %v352_v40  ;;  %398 = vmatmul.f32.gmra.mxu0 %v296_v38  ;;  %v5834_v40 = vld [vmem:[%s9187_s3 + $0x90] sm:$0xff] }
  0xb4   : > { %1748 = vmatpush.msrb.mxu2 %v5834_v40 }
  0xb8   : > { %v354_v41 = vpop.f32.mrf.mxu0 }
  0xb9   : > { %v6347_v43 = vpop.eup %6346  ;;  %v355_v44 = vadd.f32 %v6657_v33, %v354_v41 }
  0xba   : > { %524 = vst.msk [vmem:[#allocation2 + $0x21] sm:$0xff] %vm476_vm1, %v6347_v43 }
  0xbb   : > { %6348 = vtanh.f32 %v355_v44  ;;  %401 = vmatmul.f32.gmra.mxu0 %v297_v42  ;;  %v306_v42 = vld [vmem:[%s6595_s15 + $0xd8] sm:$0xff] }
  0xc0   : > { %v357_v55 = vpop.f32.mrf.mxu0 }
  0xc1   : > { %v6349_v59 = vpop.eup %6348  ;;  %v358_v60 = vadd.f32 %v6657_v33, %v357_v55 }
  0xc2   : > { %525 = vst.msk [vmem:[#allocation2 + $0x31] sm:$0xff] %vm476_vm1, %v6349_v59 }
  0xc3   : > { %6350 = vtanh.f32 %v358_v60  ;;  %404 = vmatmul.f32.gmra.mxu0 %v298_v54 }
  0xc8   : > { %v360_v61 = vpop.f32.mrf.mxu0 }
  0xc9   : > { %v6351_v63 = vpop.eup %6350  ;;  %v361_v0 = vadd.f32 %v6657_v33, %v360_v61  ;;  %v308_v61 = vld [vmem:[%s6595_s15 + $0xe8] sm:$0xff] }
  0xca   : > { %526 = vst.msk [vmem:[#allocation2 + $0x39] sm:$0xff] %vm476_vm1, %v6351_v63 }
  0xcb   : > { %6352 = vtanh.f32 %v361_v0  ;;  %407 = vmatmul.f32.gmra.mxu0 %v299_v62 }
  0xd0   : > { %v363_v3 = vpop.f32.mrf.mxu0 }
  0xd1   : > { %v6353_v5 = vpop.eup %6352  ;;  %v364_v6 = vadd.f32 %v6657_v33, %v363_v3 }
  0xd2   : > { %527 = vst.msk [vmem:[#allocation2 + $0x49] sm:$0xff] %vm476_vm1, %v6353_v5 }
  0xd3   : > { %6354 = vtanh.f32 %v364_v6  ;;  %410 = vmatmul.f32.gmra.mxu0 %v300_v4  ;;  %v309_v4 = vld [vmem:[%s6595_s15 + $0xf0] sm:$0xff] }
  0xd8   : > { %v366_v7 = vpop.f32.mrf.mxu0 }
  0xd9   : > { %v6355_v9 = vpop.eup %6354  ;;  %v367_v10 = vadd.f32 %v6657_v33, %v366_v7 }
  0xda   : > { %528 = vst.msk [vmem:[#allocation2 + $0x51] sm:$0xff] %vm476_vm1, %v6355_v9 }
  0xdb   : > { %6356 = vtanh.f32 %v367_v10  ;;  %413 = vmatmul.f32.gmra.mxu0 %v301_v8 }
  0xe0   : > { %v369_v11 = vpop.f32.mrf.mxu0 }
  0xe1   : > { %v6357_v13 = vpop.eup %6356  ;;  %v370_v14 = vadd.f32 %v6657_v33, %v369_v11  ;;  %v6773_v15 = vld [vmem:[#allocation2 + $0x51] sm:$0xff] }
  0xe2   : > { %v6775_v16 = vld [vmem:[#allocation2 + $0x50] sm:$0xff]  ;;  %529 = vst.msk [vmem:[#allocation2 + $0x61] sm:$0xff] %vm476_vm1, %v6357_v13  ;;  %5703 = vmatmul.msk.f32.vlgmr.msra.gmra.mxu1 %vm476_vm1, %v6773_v15  ;;  %v310_v11 = vld [vmem:[%s6595_s15 + $0xf8] sm:$0xff] }
  0xe3   : > { %v1053_v17 = vld [vmem:[#allocation2 + $0x52] sm:$0xff]  ;;  %5735 = vmatmul.msk.f32.vlgmr.msra.gmra.mxu2 %vm476_vm1, %v6775_v16  ;;  %6358 = vtanh.f32 %v370_v14  ;;  %416 = vmatmul.f32.gmra.mxu0 %v302_v12 }
  0xe4   : > { %5771 = vmatmul.msk.f32.vlgmr.msra.gmra.mxu3 %vm476_vm1, %v1053_v17 }
  0xe8   : > { %v372_v18 = vpop.f32.mrf.mxu0 }
  0xe9   : > { %v6359_v20 = vpop.eup %6358  ;;  %v373_v21 = vadd.f32 %v6657_v33, %v372_v18  ;;  %v6785_v22 = vld [vmem:[#allocation2 + $0x61] sm:$0xff] }
  0xea   : > { %v6787_v23 = vld [vmem:[#allocation2 + $0x60] sm:$0xff]  ;;  %530 = vst.msk [vmem:[#allocation2 + $0x69] sm:$0xff] %vm476_vm1, %v6359_v20  ;;  %5704 = vmatmul.msk.f32.gmra.mxu1 %vm476_vm1, %v6785_v22 }
  0xeb   : > { %5736 = vmatmul.msk.f32.gmra.mxu2 %vm476_vm1, %v6787_v23  ;;  %6360 = vtanh.f32 %v373_v21  ;;  %419 = vmatmul.f32.gmra.mxu0 %v303_v19  ;;  %v591_v20 = vld [vmem:[#allocation2 + $0x1] sm:$0xff] }
  0xf0   : > { %v375_v24 = vpop.f32.mrf.mxu0 }
  0xf1   : > { %v6361_v26 = vpop.eup %6360  ;;  %v376_v27 = vadd.f32 %v6657_v33, %v375_v24  ;;  %v6796_v28 = vld [vmem:[#allocation2 + $0x69] sm:$0xff] }
  0xf2   : > { %v6798_v29 = vld [vmem:[#allocation2 + $0x68] sm:$0xff]  ;;  %531 = vst.msk [vmem:[#allocation2 + $0x79] sm:$0xff] %vm476_vm1, %v6361_v26  ;;  %5705 = vmatmul.msk.f32.gmra.mxu1 %vm476_vm1, %v6796_v28 }
  0xf3   : > { %v6800_v31 = vld [vmem:[#allocation2 + $0x62] sm:$0xff]  ;;  %5737 = vmatmul.msk.f32.gmra.mxu2 %vm476_vm1, %v6798_v29  ;;  %6362 = vtanh.f32 %v376_v27  ;;  %422 = vmatmul.f32.gmra.mxu0 %v304_v25  ;;  %v6820_v39 = vld [vmem:[#allocation2 + $0x6a] sm:$0xff] }
  0xf4   : > { %5772 = vmatmul.msk.f32.gmra.mxu3 %vm476_vm1, %v6800_v31 }
  0xf8   : > { %v378_v32 = vpop.f32.mrf.mxu0 }
  0xf9   : > { %v6363_v35 = vpop.eup %6362  ;;  %v379_v36 = vadd.f32 %v6657_v33, %v378_v32  ;;  %v6811_v37 = vld [vmem:[#allocation2 + $0x79] sm:$0xff]  ;;  %v5833_v32 = vld [vmem:[%s9187_s3 + $0x88] sm:$0xff] }
  0xfa   : > { %v6813_v38 = vld [vmem:[#allocation2 + $0x78] sm:$0xff]  ;;  %532 = vst.msk [vmem:[#allocation2 + $0x81] sm:$0xff] %vm476_vm1, %v6363_v35  ;;  %5706 = vmatmul.msk.f32.gmra.mxu1 %vm476_vm1, %v6811_v37  ;;  %1749 = vmatpush.msrb.mxu2 %v5833_v32  ;;  %v592_v35 = vld [vmem:[#allocation2 + $0x9] sm:$0xff] }
  0xfb   : > { %5738 = vmatmul.msk.f32.gmra.mxu2 %vm476_vm1, %v6813_v38  ;;  %6364 = vtanh.f32 %v379_v36  ;;  %425 = vmatmul.f32.gmra.mxu0 %v305_v34 }
  0xfc   : > { %5773 = vmatmul.msk.f32.gmra.mxu3 %vm476_vm1, %v6820_v39 }
 0x100   : > { %v381_v41 = vpop.f32.mrf.mxu0 }
 0x101   : > { %v6365_v43 = vpop.eup %6364  ;;  %v382_v44 = vadd.f32 %v6657_v33, %v381_v41  ;;  %v6829_v45 = vld [vmem:[#allocation2 + $0x81] sm:$0xff] }
 0x102   : > { %v6831_v46 = vld [vmem:[#allocation2 + $0x80] sm:$0xff]  ;;  %533 = vst.msk [vmem:[#allocation2 + $0x91] sm:$0xff] %vm476_vm1, %v6365_v43  ;;  %5707 = vmatmul.msk.f32.gmra.mxu1 %vm476_vm1, %v6829_v45 }
 0x103   : > { %v6833_v48 = vld [vmem:[#allocation2 + $0x7a] sm:$0xff]  ;;  %5739 = vmatmul.msk.f32.gmra.mxu2 %vm476_vm1, %v6831_v46  ;;  %6366 = vtanh.f32 %v382_v44  ;;  %428 = vmatmul.f32.gmra.mxu0 %v306_v42  ;;  %v6856_v59 = vld [vmem:[#allocation2 + $0x82] sm:$0xff] }
 0x104   : > { %5774 = vmatmul.msk.f32.gmra.mxu3 %vm476_vm1, %v6833_v48 }
 0x108   : > { %v384_v51 = vpop.f32.mrf.mxu0 }
 0x109   : > { %v6367_v54 = vpop.eup %6366  ;;  %v385_v55 = vadd.f32 %v6657_v33, %v384_v51  ;;  %v6847_v56 = vld [vmem:[#allocation2 + $0x91] sm:$0xff] }
 0x10a   : > { %v6849_v57 = vld [vmem:[#allocation2 + $0x90] sm:$0xff]  ;;  %534 = vst.msk [vmem:[#allocation2 + $0x99] sm:$0xff] %vm476_vm1, %v6367_v54  ;;  %5708 = vmatmul.msk.f32.gmra.mxu1 %vm476_vm1, %v6847_v56  ;;  %v6963_v54 = vld [vmem:[#allocation2 + $0x19] sm:$0xff] }
 0x10b   : > { %5740 = vmatmul.msk.f32.gmra.mxu2 %vm476_vm1, %v6849_v57  ;;  %6368 = vtanh.f32 %v385_v55  ;;  %431 = vmatmul.f32.gmra.mxu0 %v307_v52 }
 0x10c   : > { %5775 = vmatmul.msk.f32.gmra.mxu3 %vm476_vm1, %v6856_v59 }
 0x110   : > { %v387_v60 = vpop.f32.mrf.mxu0 }
 0x111   : > { %v6369_v62 = vpop.eup %6368  ;;  %v388_v63 = vadd.f32 %v6657_v33, %v387_v60  ;;  %v6868_v0 = vld [vmem:[#allocation2 + $0x99] sm:$0xff] }
 0x112   : > { %v6870_v1 = vld [vmem:[#allocation2 + $0x98] sm:$0xff]  ;;  %535 = vst.msk [vmem:[#allocation2 + $0xa9] sm:$0xff] %vm476_vm1, %v6369_v62  ;;  %5709 = vmatmul.msk.f32.gmra.mxu1 %vm476_vm1, %v6868_v0 }
 0x113   : > { %v6872_v2 = vld [vmem:[#allocation2 + $0x92] sm:$0xff]  ;;  %5741 = vmatmul.msk.f32.gmra.mxu2 %vm476_vm1, %v6870_v1  ;;  %6370 = vtanh.f32 %v388_v63  ;;  %434 = vmatmul.f32.gmra.mxu0 %v308_v61  ;;  %v6892_v9 = vld [vmem:[#allocation2 + $0x9a] sm:$0xff] }
 0x114   : > { %5776 = vmatmul.msk.f32.gmra.mxu3 %vm476_vm1, %v6872_v2 }
 0x118   : > { %v390_v3 = vpop.f32.mrf.mxu0 }
 0x119   : > { %v6371_v5 = vpop.eup %6370  ;;  %v391_v6 = vadd.f32 %v6657_v33, %v390_v3  ;;  %v6883_v7 = vld [vmem:[#allocation2 + $0xa9] sm:$0xff]  ;;  %v6981_v3 = vld [vmem:[#allocation2 + $0x21] sm:$0xff] }
 0x11a   : > { %v6885_v8 = vld [vmem:[#allocation2 + $0xa8] sm:$0xff]  ;;  %536 = vst.msk [vmem:[#allocation2 + $0xb1] sm:$0xff] %vm476_vm1, %v6371_v5  ;;  %5710 = vmatmul.msk.f32.gmra.mxu1 %vm476_vm1, %v6883_v7 }
 0x11b   : > { %5742 = vmatmul.msk.f32.gmra.mxu2 %vm476_vm1, %v6885_v8  ;;  %6372 = vtanh.f32 %v391_v6  ;;  %437 = vmatmul.f32.gmra.mxu0 %v309_v4 }
 0x11c   : > { %5777 = vmatmul.msk.f32.gmra.mxu3 %vm476_vm1, %v6892_v9 }
 0x120   : > { %v393_v10 = vpop.f32.mrf.mxu0 }
 0x121   : > { %v6373_v12 = vpop.eup %6372  ;;  %v394_v13 = vadd.f32 %v6657_v33, %v393_v10  ;;  %v6898_v14 = vld [vmem:[#allocation2 + $0xb1] sm:$0xff] }
 0x122   : > { %v6900_v17 = vld [vmem:[#allocation2 + $0xb0] sm:$0xff]  ;;  %537 = vst.msk [vmem:[#allocation2 + $0xc1] sm:$0xff] %vm476_vm1, %v6373_v12  ;;  %5711 = vmatmul.msk.f32.gmra.mxu1 %vm476_vm1, %v6898_v14 }
 0x123   : > { %v6902_v18 = vld [vmem:[#allocation2 + $0xaa] sm:$0xff]  ;;  %5743 = vmatmul.msk.f32.gmra.mxu2 %vm476_vm1, %v6900_v17  ;;  %6374 = vtanh.f32 %v394_v13  ;;  %440 = vmatmul.f32.gmra.mxu0 %v310_v11  ;;  %v6921_v27 = vld [vmem:[#allocation2 + $0xb2] sm:$0xff] }
 0x124   : > { %5778 = vmatmul.msk.f32.gmra.mxu3 %vm476_vm1, %v6902_v18  ;;  %v6999_v13 = vld [vmem:[#allocation2 + $0x31] sm:$0xff] }
 0x128   : > { %v396_v19 = vpop.f32.mrf.mxu0 }
 0x129   : > { %v6375_v21 = vpop.eup %6374  ;;  %v397_v24 = vadd.f32 %v6657_v33, %v396_v19  ;;  %v6912_v25 = vld [vmem:[#allocation2 + $0xc1] sm:$0xff] }
 0x12a   : > { %v6914_v26 = vld [vmem:[#allocation2 + $0xc0] sm:$0xff]  ;;  %538 = vst.msk [vmem:[#allocation2 + $0xc9] sm:$0xff] %vm476_vm1, %v6375_v21  ;;  %5712 = vmatmul.msk.f32.gmra.mxu1 %vm476_vm1, %v6912_v25 }
 0x12b   : > { %5744 = vmatmul.msk.f32.gmra.mxu2 %vm476_vm1, %v6914_v26  ;;  %6376 = vtanh.f32 %v397_v24  ;;  %5696 = vmatmul.msk.f32.vlgmr.msrb.gmra.mxu0 %vm476_vm1, %v591_v20 }
 0x12c   : > { %5779 = vmatmul.msk.f32.gmra.mxu3 %vm476_vm1, %v6921_v27  ;;  %1191 = vmatpush.msrb.mxu0 %v6714_v47  ;;  %v5797_v47 = vld [vmem:[%s9187_s3 + $0x68] sm:$0xff] }
 0x12d   : > { %1471 = vmatpush.msrb.mxu1 %v5797_v47 }
 0x12e   : > { %1192 = vmatpush.msrb.mxu0 %v6726_v50 }
 0x130   : > { %v399_v34 = vpop.f32.mrf.mxu0  ;;  %1193 = vmatpush.msrb.mxu0 %v6738_v53 }
 0x131   : > { %v6377_v36 = vpop.eup %6376  ;;  %v400_v40 = vadd.f32 %v6657_v33, %v399_v34  ;;  %v6933_v41 = vld [vmem:[#allocation2 + $0xc9] sm:$0xff] }
 0x132   : > { %v6935_v42 = vld [vmem:[#allocation2 + $0xc8] sm:$0xff]  ;;  %539 = vst.msk [vmem:[#allocation2 + $0xd9] sm:$0xff] %vm476_vm1, %v6377_v36  ;;  %5713 = vmatmul.msk.f32.gmra.mxu1 %vm476_vm1, %v6933_v41  ;;  %1194 = vmatpush.msrb.mxu0 %v6751_v58  ;;  %v5871_v36 = vld [vmem:[%s9187_s3 + $0xb8] sm:$0xff] }
 0x133   : > { %v6937_v43 = vld [vmem:[#allocation2 + $0xc2] sm:$0xff]  ;;  %5745 = vmatmul.msk.f32.gmra.mxu2 %vm476_vm1, %v6935_v42  ;;  %6378 = vtanh.f32 %v400_v40  ;;  %5697 = vmatmul.msk.f32.gmra.mxu0 %vm476_vm1, %v592_v35  ;;  %v6961_v52 = vld [vmem:[#allocation2 + $0xca] sm:$0xff]  ;;  %v7017_v35 = vld [vmem:[#allocation2 + $0x39] sm:$0xff] }
 0x134   : > { %5780 = vmatmul.msk.f32.gmra.mxu3 %vm476_vm1, %v6937_v43 }
 0x135   : > { %2025 = vmatpush.msrb.mxu3 %v5871_v36 }
 0x138   : > { %v402_v50 = vpop.f32.mrf.mxu0 }
 0x139   : > { %v6379_v53 = vpop.eup %6378  ;;  %v403_v44 = vadd.f32 %v6657_v33, %v402_v50  ;;  %v6952_v49 = vld [vmem:[#allocation2 + $0xd9] sm:$0xff] }
 0x13a   : > { %v6954_v51 = vld [vmem:[#allocation2 + $0xd8] sm:$0xff]  ;;  %540 = vst.msk [vmem:[#allocation2 + $0xe1] sm:$0xff] %vm476_vm1, %v6379_v53  ;;  %5714 = vmatmul.msk.f32.gmra.mxu1 %vm476_vm1, %v6952_v49 }
 0x13b   : > { %5746 = vmatmul.msk.f32.gmra.mxu2 %vm476_vm1, %v6954_v51  ;;  %6380 = vtanh.f32 %v403_v44  ;;  %5698 = vmatmul.msk.f32.gmra.mxu0 %vm476_vm1, %v6963_v54 }
 0x13c   : > { %5781 = vmatmul.msk.f32.gmra.mxu3 %vm476_vm1, %v6961_v52 }
 0x140   : > { %v405_v58 = vpop.f32.mrf.mxu0 }
 0x141   : > { %v6381_v55 = vpop.eup %6380  ;;  %v406_v60 = vadd.f32 %v6657_v33, %v405_v58  ;;  %v6970_v61 = vld [vmem:[#allocation2 + $0xe1] sm:$0xff] }
 0x142   : > { %v6972_v62 = vld [vmem:[#allocation2 + $0xe0] sm:$0xff]  ;;  %541 = vst.msk [vmem:[#allocation2 + $0xf1] sm:$0xff] %vm476_vm1, %v6381_v55  ;;  %5715 = vmatmul.msk.f32.gmra.mxu1 %vm476_vm1, %v6970_v61  ;;  %v7038_v55 = vld [vmem:[#allocation2 + $0x49] sm:$0xff] }
 0x143   : > { %v6974_v63 = vld [vmem:[#allocation2 + $0xda] sm:$0xff]  ;;  %5747 = vmatmul.msk.f32.gmra.mxu2 %vm476_vm1, %v6972_v62  ;;  %6382 = vtanh.f32 %v406_v60  ;;  %5699 = vmatmul.msk.f32.gmra.mxu0 %vm476_vm1, %v6981_v3  ;;  %v6997_v12 = vld [vmem:[#allocation2 + $0xe2] sm:$0xff] }
 0x144   : > { %5782 = vmatmul.msk.f32.gmra.mxu3 %vm476_vm1, %v6974_v63  ;;  %9243 = vst [vmem:[#allocation6_spill] sm:$0xff] %v6997_v12 }
 0x148   : > { %v408_v4 = vpop.f32.mrf.mxu0 }
 0x149   : > { %v6383_v5 = vpop.eup %6382  ;;  %v409_v6 = vadd.f32 %v6657_v33, %v408_v4  ;;  %v6988_v10 = vld [vmem:[#allocation2 + $0xf1] sm:$0xff] }
 0x14a   : > { %9241 = vst [vmem:[#allocation4_spill] sm:$0xff] %v6988_v10  ;;  %v6990_v11 = vld [vmem:[#allocation2 + $0xf0] sm:$0xff]  ;;  %5716 = vmatmul.msk.f32.gmra.mxu1 %vm476_vm1, %v6988_v10 }
 0x14b   : > { %9242 = vst [vmem:[#allocation5_spill] sm:$0xff] %v6990_v11  ;;  %5748 = vmatmul.msk.f32.gmra.mxu2 %vm476_vm1, %v6990_v11  ;;  %6384 = vtanh.f32 %v409_v6  ;;  %5700 = vmatmul.msk.f32.gmra.mxu0 %vm476_vm1, %v6999_v13 }
 0x14c   : > { %542 = vst.msk [vmem:[#allocation2 + $0xf9] sm:$0xff] %vm476_vm1, %v6383_v5  ;;  %5783 = vmatmul.msk.f32.gmra.mxu3 %vm476_vm1, %v6997_v12  ;;  %v555_v5 = vld [vmem:[#allocation2] sm:$0xff] }
 0x150   : > { %v411_v19 = vpop.f32.mrf.mxu0 }
 0x151   : > { %v6385_v20 = vpop.eup %6384  ;;  %v412_v21 = vadd.f32 %v6657_v33, %v411_v19 }
 0x152   : > { %543 = vst.msk [vmem:[#allocation2 + $0x109] sm:$0xff] %vm476_vm1, %v6385_v20 }
 0x153   : > { %v7006_v24 = vld [vmem:[#allocation2 + $0xf9] sm:$0xff]  ;;  %6386 = vtanh.f32 %v412_v21  ;;  %5701 = vmatmul.msk.f32.gmra.mxu0 %vm476_vm1, %v7017_v35 }
 0x154   : > { %9244 = vst [vmem:[#allocation7_spill] sm:$0xff] %v7006_v24  ;;  %v7008_v32 = vld [vmem:[#allocation2 + $0xf8] sm:$0xff]  ;;  %5717 = vmatmul.msk.f32.gmra.mxu1 %vm476_vm1, %v7006_v24 }
 0x155   : > { %9245 = vst [vmem:[#allocation8_spill] sm:$0xff] %v7008_v32  ;;  %v7010_v34 = vld [vmem:[#allocation2 + $0xf2] sm:$0xff]  ;;  %5749 = vmatmul.msk.f32.gmra.mxu2 %vm476_vm1, %v7008_v32  ;;  %v7036_v58 = vld [vmem:[#allocation2 + $0xfa] sm:$0xff]  ;;  %v1046_v32 = vld [vmem:[#allocation2 + $0x2] sm:$0xff] }
 0x156   : > { %9246 = vst [vmem:[#allocation9_spill] sm:$0xff] %v7010_v34  ;;  %5784 = vmatmul.msk.f32.gmra.mxu3 %vm476_vm1, %v7010_v34 }
 0x157   : > { %9249 = vst [vmem:[#allocation12_spill] sm:$0xff] %v7036_v58 }
 0x158   : > { %v414_v40 = vpop.f32.mrf.mxu0 }
 0x159   : > { %v6387_v47 = vpop.eup %6386  ;;  %v415_v50 = vadd.f32 %v6657_v33, %v414_v40  ;;  %v7027_v53 = vld [vmem:[#allocation2 + $0x109] sm:$0xff]  ;;  %v5832_v40 = vld [vmem:[%s9187_s3 + $0x80] sm:$0xff] }
 0x15a   : > { %9247 = vst [vmem:[#allocation10_spill] sm:$0xff] %v7027_v53  ;;  %v7029_v44 = vld [vmem:[#allocation2 + $0x108] sm:$0xff]  ;;  %1750 = vmatpush.msrb.mxu2 %v5832_v40 }
 0x15b   : > { %9248 = vst [vmem:[#allocation11_spill] sm:$0xff] %v7029_v44  ;;  %6388 = vtanh.f32 %v415_v50  ;;  %5702 = vmatmul.msk.f32.gmra.mxu0 %vm476_vm1, %v7038_v55 }
 0x15c   : > { %544 = vst.msk [vmem:[#allocation2 + $0x111] sm:$0xff] %vm476_vm1, %v6387_v47  ;;  %5718 = vmatmul.msk.f32.gmra.mxu1 %vm476_vm1, %v7027_v53  ;;  %v5796_v47 = vld [vmem:[%s9187_s3 + $0x60] sm:$0xff] }
 0x15d   : > { %5750 = vmatmul.msk.f32.gmra.mxu2 %vm476_vm1, %v7029_v44  ;;  %1472 = vmatpush.msrb.mxu1 %v5796_v47 }
 0x15e   : > { %5785 = vmatmul.msk.f32.gmra.mxu3 %vm476_vm1, %v7036_v58 }
 0x15f   : > { %v762_v60 = vpop.f32.mrf.mxu1 }
 0x160   : > { %v417_v4 = vpop.f32.mrf.mxu0 }
 0x161   : > { %v6389_v6 = vpop.eup %6388  ;;  %v418_v19 = vadd.f32 %v6657_v33, %v417_v4 }
 0x162   : > { %545 = vst.msk [vmem:[#allocation2 + $0x121] sm:$0xff] %vm476_vm1, %v6389_v6 }
 0x163   : > { %v7045_v20 = vld [vmem:[#allocation2 + $0x111] sm:$0xff]  ;;  %6390 = vtanh.f32 %v418_v19  ;;  %5728 = vmatmul.msk.f32.vlgmr.msra.gmra.mxu0 %vm476_vm1, %v555_v5 }
 0x164   : > { %9250 = vst [vmem:[#allocation13_spill] sm:$0xff] %v7045_v20  ;;  %v7047_v21 = vld [vmem:[#allocation2 + $0x110] sm:$0xff]  ;;  %5719 = vmatmul.msk.f32.gmra.mxu1 %vm476_vm1, %v7045_v20  ;;  %v556_v20 = vld [vmem:[#allocation2 + $0x8] sm:$0xff] }
 0x165   : > { %9251 = vst [vmem:[#allocation14_spill] sm:$0xff] %v7047_v21  ;;  %v7049_v36 = vld [vmem:[#allocation2 + $0x10a] sm:$0xff]  ;;  %5751 = vmatmul.msk.f32.gmra.mxu2 %vm476_vm1, %v7047_v21 }
 0x166   : > { %9252 = vst [vmem:[#allocation15_spill] sm:$0xff] %v7049_v36  ;;  %5786 = vmatmul.msk.f32.gmra.mxu3 %vm476_vm1, %v7049_v36  ;;  %v971_v50 = vpop.f32.mrf.mxu2 }
 0x167   : > { %v7065_v4 = vadd.f32 %v971_v50, %v762_v60  ;;  %v765_v6 = vpop.f32.mrf.mxu1  ;;  %v7077_v60 = vld [vmem:[#allocation2 + $0x112] sm:$0xff]  ;;  %v7082_v5 = vpop.f32.mrf.mxu3 }
 0x168   : > { %v420_v30 = vpop.f32.mrf.mxu0  ;;  %9256 = vst [vmem:[#allocation19_spill] sm:$0xff] %v7077_v60 }
 0x169   : > { %9253 = vst [vmem:[#allocation16_spill] sm:$0xff] %v7065_v4  ;;  %v6391_v21 = vpop.eup %6390  ;;  %v421_v58 = vadd.f32 %v6657_v33, %v420_v30  ;;  %v7068_v53 = vld [vmem:[#allocation2 + $0x121] sm:$0xff] }
 0x16a   : > { %9254 = vst [vmem:[#allocation17_spill] sm:$0xff] %v7068_v53  ;;  %v7070_v44 = vld [vmem:[#allocation2 + $0x120] sm:$0xff] }
 0x16b   : > { %9255 = vst [vmem:[#allocation18_spill] sm:$0xff] %v7070_v44  ;;  %6392 = vtanh.f32 %v421_v58  ;;  %5729 = vmatmul.msk.f32.gmra.mxu0 %vm476_vm1, %v556_v20  ;;  %v7096_v58 = vld [vmem:[#allocation2 + $0x18] sm:$0xff] }
 0x16c   : > { %546 = vst.msk [vmem:[#allocation2 + $0x129] sm:$0xff] %vm476_vm1, %v6391_v21  ;;  %5720 = vmatmul.msk.f32.gmra.mxu1 %vm476_vm1, %v7068_v53 }
 0x16d   : > { %5752 = vmatmul.msk.f32.gmra.mxu2 %vm476_vm1, %v7070_v44  ;;  %9257 = vst [vmem:[#allocation20_spill] sm:$0xff] %v7082_v5 }
 0x16e   : > { %5787 = vmatmul.msk.f32.gmra.mxu3 %vm476_vm1, %v7077_v60  ;;  %v974_v30 = vpop.f32.mrf.mxu2 }
 0x16f   : > { %v975_v19 = vadd.f32 %v974_v30, %v765_v6  ;;  %v768_v40 = vpop.f32.mrf.mxu1 }
 0x170   : > { %v423_v21 = vpop.f32.mrf.mxu0 }
 0x171   : > { %v6393_v47 = vpop.eup %6392  ;;  %v424_v50 = vadd.f32 %v6657_v33, %v423_v21 }
 0x172   : > { %547 = vst.msk [vmem:[#allocation2 + $0x139] sm:$0xff] %vm476_vm1, %v6393_v47 }
 0x173   : > { %v7085_v4 = vld [vmem:[#allocation2 + $0x129] sm:$0xff]  ;;  %6394 = vtanh.f32 %v424_v50  ;;  %5730 = vmatmul.msk.f32.gmra.mxu0 %vm476_vm1, %v7096_v58 }
 0x174   : > { %9258 = vst [vmem:[#allocation21_spill] sm:$0xff] %v7085_v4  ;;  %v7087_v53 = vld [vmem:[#allocation2 + $0x128] sm:$0xff]  ;;  %5721 = vmatmul.msk.f32.gmra.mxu1 %vm476_vm1, %v7085_v4 }
 0x175   : > { %9259 = vst [vmem:[#allocation22_spill] sm:$0xff] %v7087_v53  ;;  %v7089_v44 = vld [vmem:[#allocation2 + $0x122] sm:$0xff]  ;;  %5753 = vmatmul.msk.f32.gmra.mxu2 %vm476_vm1, %v7087_v53 }
 0x176   : > { %9260 = vst [vmem:[#allocation23_spill] sm:$0xff] %v7089_v44  ;;  %5788 = vmatmul.msk.f32.gmra.mxu3 %vm476_vm1, %v7089_v44  ;;  %v977_v20 = vpop.f32.mrf.mxu2 }
 0x177   : > { %v978_v6 = vadd.f32 %v977_v20, %v768_v40  ;;  %v1220_v30 = vpop.f32.mrf.mxu3  ;;  %v771_v47 = vpop.f32.mrf.mxu1  ;;  %v7114_v40 = vld [vmem:[#allocation2 + $0x12a] sm:$0xff] }
 0x178   : > { %v7102_v21 = vadd.f32 %v1220_v30, %v975_v19  ;;  %v426_v5 = vpop.f32.mrf.mxu0  ;;  %9264 = vst [vmem:[#allocation27_spill] sm:$0xff] %v7114_v40  ;;  %v7116_v19 = vld [vmem:[#allocation2 + $0x20] sm:$0xff] }
 0x179   : > { %v6395_v4 = vpop.eup %6394  ;;  %v427_v60 = vadd.f32 %v6657_v33, %v426_v5  ;;  %v7105_v53 = vld [vmem:[#allocation2 + $0x139] sm:$0xff] }
 0x17a   : > { %9261 = vst [vmem:[#allocation24_spill] sm:$0xff] %v7102_v21  ;;  %v7107_v36 = vld [vmem:[#allocation2 + $0x138] sm:$0xff] }
 0x17b   : > { %9262 = vst [vmem:[#allocation25_spill] sm:$0xff] %v7105_v53  ;;  %6396 = vtanh.f32 %v427_v60  ;;  %5731 = vmatmul.msk.f32.gmra.mxu0 %vm476_vm1, %v7116_v19 }
 0x17c   : > { %9263 = vst [vmem:[#allocation26_spill] sm:$0xff] %v7107_v36  ;;  %5722 = vmatmul.msk.f32.gmra.mxu1 %vm476_vm1, %v7105_v53 }
 0x17d   : > { %548 = vst.msk [vmem:[#allocation2 + $0x141] sm:$0xff] %vm476_vm1, %v6395_v4  ;;  %5754 = vmatmul.msk.f32.gmra.mxu2 %vm476_vm1, %v7107_v36 }
 0x17e   : > { %5789 = vmatmul.msk.f32.gmra.mxu3 %vm476_vm1, %v7114_v40  ;;  %v980_v5 = vpop.f32.mrf.mxu2 }
 0x17f   : > { %v981_v50 = vadd.f32 %v980_v5, %v771_v47  ;;  %v1223_v4 = vpop.f32.mrf.mxu3  ;;  %v774_v30 = vpop.f32.mrf.mxu1 }
 0x180   : > { %v7122_v20 = vadd.f32 %v1223_v4, %v978_v6  ;;  %v429_v21 = vpop.f32.mrf.mxu0  ;;  %v7136_v6 = vld [vmem:[#allocation2 + $0x30] sm:$0xff] }
 0x181   : > { %v6397_v53 = vpop.eup %6396  ;;  %v430_v36 = vadd.f32 %v6657_v33, %v429_v21  ;;  %v5870_v21 = vld [vmem:[%s9187_s3 + $0xb0] sm:$0xff] }
 0x182   : > { %9265 = vst [vmem:[#allocation28_spill] sm:$0xff] %v7122_v20  ;;  %2026 = vmatpush.msrb.mxu3 %v5870_v21 }
 0x183   : > { %549 = vst.msk [vmem:[#allocation2 + $0x151] sm:$0xff] %vm476_vm1, %v6397_v53  ;;  %6398 = vtanh.f32 %v430_v36  ;;  %5732 = vmatmul.msk.f32.gmra.mxu0 %vm476_vm1, %v7136_v6 }
 0x184   : > { %v7125_v44 = vld [vmem:[#allocation2 + $0x141] sm:$0xff] }
 0x185   : > { %9266 = vst [vmem:[#allocation29_spill] sm:$0xff] %v7125_v44  ;;  %v7127_v34 = vld [vmem:[#allocation2 + $0x140] sm:$0xff]  ;;  %5723 = vmatmul.msk.f32.gmra.mxu1 %vm476_vm1, %v7125_v44 }
 0x186   : > { %9267 = vst [vmem:[#allocation30_spill] sm:$0xff] %v7127_v34  ;;  %v7129_v60 = vld [vmem:[#allocation2 + $0x13a] sm:$0xff]  ;;  %5755 = vmatmul.msk.f32.gmra.mxu2 %vm476_vm1, %v7127_v34  ;;  %v983_v53 = vpop.f32.mrf.mxu2 }
 0x187   : > { %9268 = vst [vmem:[#allocation31_spill] sm:$0xff] %v7129_v60  ;;  %5790 = vmatmul.msk.f32.gmra.mxu3 %vm476_vm1, %v7129_v60  ;;  %v984_v47 = vadd.f32 %v983_v53, %v774_v30  ;;  %v1226_v5 = vpop.f32.mrf.mxu3  ;;  %v777_v20 = vpop.f32.mrf.mxu1  ;;  %v7157_v30 = vld [vmem:[#allocation2 + $0x142] sm:$0xff] }
 0x188   : > { %v7145_v4 = vadd.f32 %v1226_v5, %v981_v50  ;;  %v432_v44 = vpop.f32.mrf.mxu0  ;;  %9272 = vst [vmem:[#allocation35_spill] sm:$0xff] %v7157_v30  ;;  %v7159_v50 = vld [vmem:[#allocation2 + $0x38] sm:$0xff] }
 0x189   : > { %v6399_v34 = vpop.eup %6398  ;;  %v433_v40 = vadd.f32 %v6657_v33, %v432_v44 }
 0x18a   : > { %9269 = vst [vmem:[#allocation32_spill] sm:$0xff] %v7145_v4  ;;  %v7148_v24 = vld [vmem:[#allocation2 + $0x151] sm:$0xff] }
 0x18b   : > { %9270 = vst [vmem:[#allocation33_spill] sm:$0xff] %v7148_v24  ;;  %v7150_v36 = vld [vmem:[#allocation2 + $0x150] sm:$0xff]  ;;  %6400 = vtanh.f32 %v433_v40  ;;  %5733 = vmatmul.msk.f32.gmra.mxu0 %vm476_vm1, %v7159_v50  ;;  %v5943_v40 = vld [vmem:[%s9187_s3 + $0xf8] sm:$0xff] }
 0x18c   : > { %9271 = vst [vmem:[#allocation34_spill] sm:$0xff] %v7150_v36  ;;  %2582 = vmatpush.msra.mxu1 %v5943_v40 }
 0x18d   : > { %550 = vst.msk [vmem:[#allocation2 + $0x159] sm:$0xff] %vm476_vm1, %v6399_v34  ;;  %5724 = vmatmul.msk.f32.gmra.mxu1 %vm476_vm1, %v7148_v24  ;;  %v5979_v34 = vld [vmem:[%s9187_s3 + $0x118] sm:$0xff] }
 0x18e   : > { %5756 = vmatmul.msk.f32.gmra.mxu2 %vm476_vm1, %v7150_v36  ;;  %v986_v44 = vpop.f32.mrf.mxu2 }
 0x18f   : > { %5791 = vmatmul.msk.f32.gmra.mxu3 %vm476_vm1, %v7157_v30  ;;  %2860 = vmatpush.msra.mxu2 %v5979_v34  ;;  %v987_v21 = vadd.f32 %v986_v44, %v777_v20  ;;  %v1229_v53 = vpop.f32.mrf.mxu3  ;;  %v780_v4 = vpop.f32.mrf.mxu1  ;;  %v5869_v30 = vld [vmem:[%s9187_s3 + $0xa8] sm:$0xff]  ;;  %v5868_v34 = vld [vmem:[%s9187_s3 + $0xa0] sm:$0xff] }
 0x190   : > { %v7168_v5 = vadd.f32 %v1229_v53, %v984_v47  ;;  %v435_v24 = vpop.f32.mrf.mxu0  ;;  %2027 = vmatpush.msrb.mxu3 %v5869_v30  ;;  %v7191_v30 = vld [vmem:[#allocation2 + $0x48] sm:$0xff] }
 0x191   : > { %v6401_v20 = vpop.eup %6400  ;;  %v436_v47 = vadd.f32 %v6657_v33, %v435_v24 }
 0x192   : > { %9273 = vst [vmem:[#allocation36_spill] sm:$0xff] %v7168_v5  ;;  %2028 = vmatpush.msrb.mxu3 %v5868_v34 }
 0x193   : > { %551 = vst.msk [vmem:[#allocation2 + $0x169] sm:$0xff] %vm476_vm1, %v6401_v20  ;;  %6402 = vtanh.f32 %v436_v47  ;;  %5734 = vmatmul.msk.f32.gmra.mxu0 %vm476_vm1, %v7191_v30 }
 0x194   : > { %v7180_v44 = vld [vmem:[#allocation2 + $0x159] sm:$0xff] }
 0x195   : > { %9274 = vst [vmem:[#allocation37_spill] sm:$0xff] %v7180_v44  ;;  %v7182_v53 = vld [vmem:[#allocation2 + $0x158] sm:$0xff]  ;;  %5725 = vmatmul.msk.f32.gmra.mxu1 %vm476_vm1, %v7180_v44 }
 0x196   : > { %9275 = vst [vmem:[#allocation38_spill] sm:$0xff] %v7182_v53  ;;  %v7184_v5 = vld [vmem:[#allocation2 + $0x152] sm:$0xff]  ;;  %5757 = vmatmul.msk.f32.gmra.mxu2 %vm476_vm1, %v7182_v53  ;;  %v989_v24 = vpop.f32.mrf.mxu2 }
 0x197   : > { %9276 = vst [vmem:[#allocation39_spill] sm:$0xff] %v7184_v5  ;;  %5792 = vmatmul.msk.f32.gmra.mxu3 %vm476_vm1, %v7184_v5  ;;  %v990_v40 = vadd.f32 %v989_v24, %v780_v4  ;;  %v1232_v36 = vpop.f32.mrf.mxu3  ;;  %v783_v60 = vpop.f32.mrf.mxu1  ;;  %v7209_v4 = vld [vmem:[#allocation2 + $0x15a] sm:$0xff] }
 0x198   : > { %v7197_v20 = vadd.f32 %v1232_v36, %v987_v21  ;;  %v438_v44 = vpop.f32.mrf.mxu0 }
 0x199   : > { %v6403_v12 = vpop.eup %6402  ;;  %v439_v53 = vadd.f32 %v6657_v33, %v438_v44 }
 0x19a   : > { %9277 = vst [vmem:[#allocation40_spill] sm:$0xff] %v7197_v20  ;;  %v7200_v10 = vld [vmem:[#allocation2 + $0x169] sm:$0xff] }
 0x19b   : > { %9278 = vst [vmem:[#allocation41_spill] sm:$0xff] %v7200_v10  ;;  %v7202_v47 = vld [vmem:[#allocation2 + $0x168] sm:$0xff]  ;;  %6404 = vtanh.f32 %v439_v53  ;;  %5764 = vmatmul.msk.f32.vlgmr.msrb.gmra.mxu0 %vm476_vm1, %v1046_v32 }
 0x19c   : > { %9279 = vst [vmem:[#allocation42_spill] sm:$0xff] %v7202_v47  ;;  %v1047_v20 = vld [vmem:[#allocation2 + $0xa] sm:$0xff] }
 0x19d   : > { %552 = vst.msk [vmem:[#allocation2 + $0x171] sm:$0xff] %vm476_vm1, %v6403_v12  ;;  %5726 = vmatmul.msk.f32.gmra.mxu1 %vm476_vm1, %v7200_v10 }
 0x19e   : > { %5758 = vmatmul.msk.f32.gmra.mxu2 %vm476_vm1, %v7202_v47  ;;  %v992_v36 = vpop.f32.mrf.mxu2 }
 0x19f   : > { %5793 = vmatmul.msk.f32.gmra.mxu3 %vm476_vm1, %v7209_v4  ;;  %v993_v21 = vadd.f32 %v992_v36, %v783_v60  ;;  %v1235_v34 = vpop.f32.mrf.mxu3  ;;  %v786_v12 = vpop.f32.mrf.mxu1 }
 0x1a0   : > { %v7214_v44 = vadd.f32 %v1235_v34, %v990_v40  ;;  %v441_v24 = vpop.f32.mrf.mxu0 }
 0x1a1   : > { %v6405_v10 = vpop.eup %6404  ;;  %v442_v5 = vadd.f32 %v6657_v33, %v441_v24 }
 0x1a2   : > { %553 = vst.msk [vmem:[#allocation2 + $0x181] sm:$0xff] %vm476_vm1, %v6405_v10 }
 0x1a3   : > { %6406 = vtanh.f32 %v442_v5  ;;  %5765 = vmatmul.msk.f32.gmra.mxu0 %vm476_vm1, %v1047_v20  ;;  %v1048_v5 = vld [vmem:[#allocation2 + $0x1a] sm:$0xff] }
 0x1a4   : > { %v7217_v47 = vld [vmem:[#allocation2 + $0x171] sm:$0xff] }
 0x1a5   : > { %v7219_v11 = vld [vmem:[#allocation2 + $0x170] sm:$0xff]  ;;  %5727 = vmatmul.msk.f32.gmra.mxu1 %vm476_vm1, %v7217_v47  ;;  %v5907_v20 = vld [vmem:[%s9187_s3 + $0xd8] sm:$0xff] }
 0x1a6   : > { %v7221_v53 = vld [vmem:[#allocation2 + $0x16a] sm:$0xff]  ;;  %5759 = vmatmul.msk.f32.gmra.mxu2 %vm476_vm1, %v7219_v11  ;;  %v995_v33 = vpop.f32.mrf.mxu2  ;;  %v7236_v24 = vld [vmem:[#allocation2 + $0x172] sm:$0xff]  ;;  %2304 = vmatpush.msra.mxu0 %v5907_v20 }
 0x1a7   : > { %5794 = vmatmul.msk.f32.gmra.mxu3 %vm476_vm1, %v7221_v53  ;;  %v996_v32 = vadd.f32 %v995_v33, %v786_v12  ;;  %v1238_v60 = vpop.f32.mrf.mxu3  ;;  %v789_v36 = vpop.f32.mrf.mxu1 }
 0x1a8   : > { %v7231_v40 = vadd.f32 %v1238_v60, %v993_v21  ;;  %v7233_v34 = vpop.f32.mrf.mxu0 }
 0x1a9   : > { %v6407_v10 = vpop.eup %6406 }
 0x1aa   : > { %9280 = vst [vmem:[#allocation43_spill] sm:$0xff] %v7231_v40  ;;  %v5905_v40 = vld [vmem:[%s9187_s3 + $0xc8] sm:$0xff] }
 0x1ab   : > { %554 = vst.msk [vmem:[#allocation2 + $0x189] sm:$0xff] %vm476_vm1, %v6407_v10  ;;  %5766 = vmatmul.msk.f32.gmra.mxu0 %vm476_vm1, %v1048_v5 }
 0x1ad   : > { %5800 = vmatmul.msk.f32.vlgmr.msrb.gmra.mxu1 %vm476_vm1, %v7096_v58  ;;  %v5906_v58 = vld [vmem:[%s9187_s3 + $0xd0] sm:$0xff] }
 0x1ae   : > { %5836 = vmatmul.msk.f32.vlgmr.msrb.gmra.mxu2 %vm476_vm1, %v6963_v54  ;;  %v998_v21 = vpop.f32.mrf.mxu2  ;;  %2305 = vmatpush.msra.mxu0 %v5906_v58 }
 0x1af   : > { %5795 = vmatmul.msk.f32.gmra.mxu3 %vm476_vm1, %v7236_v24  ;;  %v999_v12 = vadd.f32 %v998_v21, %v789_v36  ;;  %v1241_v33 = vpop.f32.mrf.mxu3  ;;  %v792_v54 = vpop.f32.mrf.mxu1  ;;  %v1049_v36 = vld [vmem:[#allocation2 + $0x22] sm:$0xff] }
 0x1b0   : > { %v7251_v60 = vadd.f32 %v1241_v33, %v996_v32  ;;  %v7253_v10 = vpop.f32.mrf.mxu0  ;;  %2306 = vmatpush.msra.mxu0 %v5905_v40  ;;  %v5904_v32 = vld [vmem:[%s9187_s3 + $0xc0] sm:$0xff] }
 0x1b2   : > { %2307 = vmatpush.msra.mxu0 %v5904_v32 }
 0x1b3   : > { %5767 = vmatmul.msk.f32.gmra.mxu0 %vm476_vm1, %v1049_v36 }
 0x1b5   : > { %5801 = vmatmul.msk.f32.gmra.mxu1 %vm476_vm1, %v7116_v19 }
 0x1b6   : > { %5837 = vmatmul.msk.f32.gmra.mxu2 %vm476_vm1, %v6981_v3  ;;  %v1001_v20 = vpop.f32.mrf.mxu2  ;;  %v7275_v3 = vld [vmem:[#allocation2 + $0x32] sm:$0xff] }
 0x1b7   : > { %5872 = vmatmul.msk.f32.vlgmr.msrb.gmra.mxu3 %vm476_vm1, %v1048_v5  ;;  %v1002_v21 = vadd.f32 %v1001_v20, %v792_v54  ;;  %v1244_v33 = vpop.f32.mrf.mxu3  ;;  %v795_v58 = vpop.f32.mrf.mxu1  ;;  %9282 = vst [vmem:[#allocation45_spill] sm:$0xff] %v7275_v3 }
 0x1b8   : > { %v7267_v40 = vadd.f32 %v1244_v33, %v999_v12  ;;  %v7269_v19 = vpop.f32.mrf.mxu0 }
 0x1ba   : > { %9281 = vst [vmem:[#allocation44_spill] sm:$0xff] %v7267_v40 }
 0x1bb   : > { %5768 = vmatmul.msk.f32.gmra.mxu0 %vm476_vm1, %v7275_v3 }
 0x1bd   : > { %5802 = vmatmul.msk.f32.gmra.mxu1 %vm476_vm1, %v7136_v6 }
 0x1be   : > { %5838 = vmatmul.msk.f32.gmra.mxu2 %vm476_vm1, %v6999_v13  ;;  %v1004_v5 = vpop.f32.mrf.mxu2  ;;  %v7288_v13 = vld [vmem:[#allocation2 + $0x3a] sm:$0xff] }
 0x1bf   : > { %5873 = vmatmul.msk.f32.gmra.mxu3 %vm476_vm1, %v1049_v36  ;;  %v1005_v54 = vadd.f32 %v1004_v5, %v795_v58  ;;  %v1247_v12 = vpop.f32.mrf.mxu3  ;;  %v798_v20 = vpop.f32.mrf.mxu1 }
 0x1c0   : > { %v7280_v32 = vadd.f32 %v1247_v12, %v1002_v21  ;;  %v7282_v33 = vpop.f32.mrf.mxu0 }
 0x1c2   : > { %9283 = vst [vmem:[#allocation46_spill] sm:$0xff] %v7280_v32 }
 0x1c3   : > { %5769 = vmatmul.msk.f32.gmra.mxu0 %vm476_vm1, %v7288_v13 }
 0x1c5   : > { %5803 = vmatmul.msk.f32.gmra.mxu1 %vm476_vm1, %v7159_v50 }
 0x1c6   : > { %5839 = vmatmul.msk.f32.gmra.mxu2 %vm476_vm1, %v7017_v35  ;;  %v1007_v36 = vpop.f32.mrf.mxu2  ;;  %v7302_v35 = vld [vmem:[#allocation2 + $0x4a] sm:$0xff] }
 0x1c7   : > { %5874 = vmatmul.msk.f32.gmra.mxu3 %vm476_vm1, %v7275_v3  ;;  %v1008_v21 = vadd.f32 %v1007_v36, %v798_v20  ;;  %v1250_v58 = vpop.f32.mrf.mxu3  ;;  %v801_v12 = vpop.f32.mrf.mxu1 }
 0x1c8   : > { %v7294_v5 = vadd.f32 %v1250_v58, %v1005_v54  ;;  %v7296_v32 = vpop.f32.mrf.mxu0  ;;  %v5978_v54 = vld [vmem:[%s9187_s3 + $0x110] sm:$0xff] }
 0x1c9   : > { %2861 = vmatpush.msra.mxu2 %v5978_v54 }
 0x1ca   : > { %9284 = vst [vmem:[#allocation47_spill] sm:$0xff] %v7294_v5 }
 0x1cb   : > { %5770 = vmatmul.msk.f32.gmra.mxu0 %vm476_vm1, %v7302_v35 }
 0x1cd   : > { %5804 = vmatmul.msk.f32.gmra.mxu1 %vm476_vm1, %v7191_v30 }
 0x1ce   : > { %5840 = vmatmul.msk.f32.gmra.mxu2 %vm476_vm1, %v7038_v55  ;;  %v1010_v20 = vpop.f32.mrf.mxu2  ;;  %v5942_v55 = vld [vmem:[%s9187_s3 + $0xf0] sm:$0xff] }
 0x1cf   : > { %5875 = vmatmul.msk.f32.gmra.mxu3 %vm476_vm1, %v7288_v13  ;;  %v1011_v36 = vadd.f32 %v1010_v20, %v801_v12  ;;  %v1253_v58 = vpop.f32.mrf.mxu3  ;;  %2583 = vmatpush.msra.mxu1 %v5942_v55 }
 0x1d0   : > { %v7311_v5 = vadd.f32 %v1253_v58, %v1008_v21  ;;  %v7316_v3 = vpop.f32.mrf.mxu0 }
 0x1d1   : > { %v804_v40 = vpop.f32.mrf.mxu1 }
 0x1d2   : > { %9285 = vst [vmem:[#allocation48_spill] sm:$0xff] %v7311_v5 }
 0x1d3   : > { %5908 = vmatmul.msk.f32.vlgmr.msra.gmra.mxu0 %vm476_vm1, %v7136_v6 }
 0x1d5   : > { %5805 = vmatmul.msk.f32.gmra.mxu1 %vm476_vm1, %v6775_v16 }
 0x1d6   : > { %5841 = vmatmul.msk.f32.gmra.mxu2 %vm476_vm1, %v6773_v15  ;;  %v7334_v15 = vld [vmem:[#allocation2 + $0x52] sm:$0xff] }
 0x1d7   : > { %5876 = vmatmul.msk.f32.gmra.mxu3 %vm476_vm1, %v7302_v35 }
 0x1d8   : > { %v1013_v21 = vpop.f32.mrf.mxu2  ;;  %v7328_v5 = vpop.f32.mrf.mxu0 }
 0x1d9   : > { %v1014_v12 = vadd.f32 %v1013_v21, %v804_v40  ;;  %v1256_v54 = vpop.f32.mrf.mxu3  ;;  %v807_v58 = vpop.f32.mrf.mxu1 }
 0x1da   : > { %v7326_v20 = vadd.f32 %v1256_v54, %v1011_v36 }
 0x1db   : > { %5909 = vmatmul.msk.f32.gmra.mxu0 %vm476_vm1, %v7159_v50 }
 0x1dd   : > { %5806 = vmatmul.msk.f32.gmra.mxu1 %vm476_vm1, %v6787_v23 }
 0x1de   : > { %5842 = vmatmul.msk.f32.gmra.mxu2 %vm476_vm1, %v6785_v22 }
 0x1df   : > { %5877 = vmatmul.msk.f32.gmra.mxu3 %vm476_vm1, %v7334_v15 }
 0x1e0   : > { %v1016_v16 = vpop.f32.mrf.mxu2  ;;  %v7342_v21 = vpop.f32.mrf.mxu0 }
 0x1e1   : > { %v1017_v6 = vadd.f32 %v1016_v16, %v807_v58  ;;  %v1259_v40 = vpop.f32.mrf.mxu3  ;;  %v810_v55 = vpop.f32.mrf.mxu1 }
 0x1e2   : > { %v7340_v36 = vadd.f32 %v1259_v40, %v1014_v12 }
 0x1e3   : > { %5910 = vmatmul.msk.f32.gmra.mxu0 %vm476_vm1, %v7191_v30 }
 0x1e5   : > { %5807 = vmatmul.msk.f32.gmra.mxu1 %vm476_vm1, %v6798_v29 }
 0x1e6   : > { %5843 = vmatmul.msk.f32.gmra.mxu2 %vm476_vm1, %v6796_v28  ;;  %v2162_v28 = vld [vmem:[#allocation2 + $0x50] sm:$0xff] }
 0x1e7   : > { %5878 = vmatmul.msk.f32.gmra.mxu3 %vm476_vm1, %v6800_v31 }
 0x1e8   : > { %v1019_v22 = vpop.f32.mrf.mxu2  ;;  %v7354_v58 = vpop.f32.mrf.mxu0 }
 0x1e9   : > { %v1020_v23 = vadd.f32 %v1019_v22, %v810_v55  ;;  %v1262_v50 = vpop.f32.mrf.mxu3  ;;  %v813_v54 = vpop.f32.mrf.mxu1 }
 0x1ea   : > { %v7352_v12 = vadd.f32 %v1262_v50, %v1017_v6 }
 0x1eb   : > { %5911 = vmatmul.msk.f32.gmra.mxu0 %vm476_vm1, %v2162_v28 }
 0x1ed   : > { %5808 = vmatmul.msk.f32.gmra.mxu1 %vm476_vm1, %v6813_v38 }
 0x1ee   : > { %5844 = vmatmul.msk.f32.gmra.mxu2 %vm476_vm1, %v6811_v37  ;;  %v2163_v37 = vld [vmem:[#allocation2 + $0x60] sm:$0xff] }
 0x1ef   : > { %5879 = vmatmul.msk.f32.gmra.mxu3 %vm476_vm1, %v6820_v39 }
 0x1f0   : > { %v1022_v29 = vpop.f32.mrf.mxu2  ;;  %v7365_v40 = vpop.f32.mrf.mxu0 }
 0x1f1   : > { %v1023_v31 = vadd.f32 %v1022_v29, %v813_v54  ;;  %v1265_v30 = vpop.f32.mrf.mxu3  ;;  %v816_v6 = vpop.f32.mrf.mxu1 }
 0x1f2   : > { %v7363_v16 = vadd.f32 %v1265_v30, %v1020_v23 }
 0x1f3   : > { %5912 = vmatmul.msk.f32.gmra.mxu0 %vm476_vm1, %v2163_v37 }
 0x1f5   : > { %5809 = vmatmul.msk.f32.gmra.mxu1 %vm476_vm1, %v6831_v46 }
 0x1f6   : > { %5845 = vmatmul.msk.f32.gmra.mxu2 %vm476_vm1, %v6829_v45  ;;  %v2164_v45 = vld [vmem:[#allocation2 + $0x68] sm:$0xff] }
 0x1f7   : > { %5880 = vmatmul.msk.f32.gmra.mxu3 %vm476_vm1, %v6833_v48 }
 0x1f8   : > { %v1025_v38 = vpop.f32.mrf.mxu2  ;;  %v7376_v50 = vpop.f32.mrf.mxu0 }
 0x1f9   : > { %v1026_v39 = vadd.f32 %v1025_v38, %v816_v6  ;;  %v1268_v55 = vpop.f32.mrf.mxu3  ;;  %v819_v23 = vpop.f32.mrf.mxu1 }
 0x1fa   : > { %v7374_v22 = vadd.f32 %v1268_v55, %v1023_v31 }
 0x1fb   : > { %5913 = vmatmul.msk.f32.gmra.mxu0 %vm476_vm1, %v2164_v45 }
 0x1fd   : > { %5810 = vmatmul.msk.f32.gmra.mxu1 %vm476_vm1, %v6849_v57 }
 0x1fe   : > { %5846 = vmatmul.msk.f32.gmra.mxu2 %vm476_vm1, %v6847_v56  ;;  %v2165_v56 = vld [vmem:[#allocation2 + $0x78] sm:$0xff] }
 0x1ff   : > { %5881 = vmatmul.msk.f32.gmra.mxu3 %vm476_vm1, %v6856_v59 }
 0x200   : > { %v1028_v46 = vpop.f32.mrf.mxu2  ;;  %v7387_v31 = vpop.f32.mrf.mxu0 }
 0x201   : > { %v1029_v48 = vadd.f32 %v1028_v46, %v819_v23  ;;  %v1271_v54 = vpop.f32.mrf.mxu3  ;;  %v2167_v46 = vld [vmem:[#allocation2 + $0x90] sm:$0xff] }
 0x202   : > { %v7385_v28 = vadd.f32 %v1271_v54, %v1026_v39  ;;  %v822_v29 = vpop.f32.mrf.mxu1 }
 0x203   : > { %5914 = vmatmul.msk.f32.gmra.mxu0 %vm476_vm1, %v2165_v56 }
 0x205   : > { %5811 = vmatmul.msk.f32.gmra.mxu1 %vm476_vm1, %v6870_v1  ;;  %v5977_v1 = vld [vmem:[%s9187_s3 + $0x108] sm:$0xff] }
 0x206   : > { %5847 = vmatmul.msk.f32.gmra.mxu2 %vm476_vm1, %v6868_v0  ;;  %v2166_v0 = vld [vmem:[#allocation2 + $0x80] sm:$0xff] }
 0x207   : > { %5882 = vmatmul.msk.f32.gmra.mxu3 %vm476_vm1, %v6872_v2  ;;  %2862 = vmatpush.msra.mxu2 %v5977_v1 }
 0x208   : > { %v7398_v38 = vpop.f32.mrf.mxu0 }
 0x209   : > { %v1031_v57 = vpop.f32.mrf.mxu2 }
 0x20a   : > { %v1032_v59 = vadd.f32 %v1031_v57, %v822_v29  ;;  %v1274_v30 = vpop.f32.mrf.mxu3  ;;  %v825_v37 = vpop.f32.mrf.mxu1 }
 0x20b   : > { %v7396_v6 = vadd.f32 %v1274_v30, %v1029_v48  ;;  %5915 = vmatmul.msk.f32.gmra.mxu0 %vm476_vm1, %v2166_v0 }
 0x20d   : > { %5812 = vmatmul.msk.f32.gmra.mxu1 %vm476_vm1, %v6885_v8 }
 0x20e   : > { %5848 = vmatmul.msk.f32.gmra.mxu2 %vm476_vm1, %v6883_v7  ;;  %v5941_v7 = vld [vmem:[%s9187_s3 + $0xe8] sm:$0xff] }
 0x20f   : > { %5883 = vmatmul.msk.f32.gmra.mxu3 %vm476_vm1, %v6892_v9  ;;  %2584 = vmatpush.msra.mxu1 %v5941_v7  ;;  %v6013_v9 = vld [vmem:[%s9189_s5 + $0x18] sm:$0xff] }
 0x210   : > { %v7415_v45 = vpop.f32.mrf.mxu0  ;;  %3319 = vmatpush.msra.mxu3 %v6013_v9 }
 0x211   : > { %v1034_v2 = vpop.f32.mrf.mxu2 }
 0x212   : > { %v1035_v39 = vadd.f32 %v1034_v2, %v825_v37  ;;  %v1277_v55 = vpop.f32.mrf.mxu3  ;;  %v828_v8 = vpop.f32.mrf.mxu1 }
 0x213   : > { %v7410_v23 = vadd.f32 %v1277_v55, %v1032_v59  ;;  %5916 = vmatmul.msk.f32.gmra.mxu0 %vm476_vm1, %v2167_v46 }
 0x215   : > { %5813 = vmatmul.msk.f32.gmra.mxu1 %vm476_vm1, %v6900_v17 }
 0x216   : > { %5849 = vmatmul.msk.f32.gmra.mxu2 %vm476_vm1, %v6898_v14  ;;  %v2168_v14 = vld [vmem:[#allocation2 + $0x98] sm:$0xff] }
 0x217   : > { %5884 = vmatmul.msk.f32.gmra.mxu3 %vm476_vm1, %v6902_v18 }
 0x218   : > { %v1196_v17 = vpop.f32.mrf.mxu0 }
 0x219   : > { %v1037_v48 = vpop.f32.mrf.mxu2 }
 0x21a   : > { %v1038_v54 = vadd.f32 %v1037_v48, %v828_v8  ;;  %v1280_v29 = vpop.f32.mrf.mxu3  ;;  %v831_v57 = vpop.f32.mrf.mxu1 }
 0x21b   : > { %v7427_v56 = vadd.f32 %v1280_v29, %v1035_v39  ;;  %5917 = vmatmul.msk.f32.gmra.mxu0 %vm476_vm1, %v2168_v14 }
 0x21d   : > { %5814 = vmatmul.msk.f32.gmra.mxu1 %vm476_vm1, %v6914_v26  ;;  %v951_v26 = vadd.f32 %v7342_v21, %v7233_v34 }
 0x21e   : > { %5850 = vmatmul.msk.f32.gmra.mxu2 %vm476_vm1, %v6912_v25  ;;  %v2169_v25 = vld [vmem:[#allocation2 + $0xa8] sm:$0xff] }
 0x21f   : > { %5885 = vmatmul.msk.f32.gmra.mxu3 %vm476_vm1, %v6921_v27 }
 0x220   : > { %v1199_v27 = vpop.f32.mrf.mxu0 }
 0x221   : > { %v1040_v18 = vpop.f32.mrf.mxu2 }
 0x222   : > { %v1041_v59 = vadd.f32 %v1040_v18, %v831_v57  ;;  %v1283_v30 = vpop.f32.mrf.mxu3  ;;  %v834_v0 = vpop.f32.mrf.mxu1 }
 0x223   : > { %v7436_v37 = vadd.f32 %v1283_v30, %v1038_v54  ;;  %5918 = vmatmul.msk.f32.gmra.mxu0 %vm476_vm1, %v2169_v25  ;;  %v9288_v30 = vld [vmem:[#allocation6_spill] sm:$0xff] }
 0x225   : > { %5815 = vmatmul.msk.f32.gmra.mxu1 %vm476_vm1, %v6935_v42  ;;  %v1292_v42 = vadd.f32 %v1196_v17, %v951_v26  ;;  %v957_v17 = vadd.f32 %v7365_v40, %v7269_v19  ;;  %v960_v40 = vadd.f32 %v7376_v50, %v7282_v33  ;;  %v963_v50 = vadd.f32 %v7387_v31, %v7296_v32 }
 0x226   : > { %5851 = vmatmul.msk.f32.gmra.mxu2 %vm476_vm1, %v6933_v41  ;;  %v2170_v41 = vld [vmem:[#allocation2 + $0xb0] sm:$0xff] }
 0x227   : > { %5886 = vmatmul.msk.f32.gmra.mxu3 %vm476_vm1, %v6937_v43  ;;  %v954_v43 = vadd.f32 %v7354_v58, %v7253_v10 }
 0x228   : > { %v1202_v46 = vpop.f32.mrf.mxu0 }
 0x229   : > { %v1043_v1 = vpop.f32.mrf.mxu2  ;;  %v1293_v54 = vadd.f32 %v1199_v27, %v954_v43  ;;  %v1294_v18 = vadd.f32 %v1202_v46, %v957_v17  ;;  %v9291_v43 = vld [vmem:[#allocation9_spill] sm:$0xff] }
 0x22a   : > { %v1044_v2 = vadd.f32 %v1043_v1, %v834_v0  ;;  %v1286_v39 = vpop.f32.mrf.mxu3  ;;  %v1474_v8 = vpop.f32.mrf.mxu1 }
 0x22b   : > { %v7447_v55 = vadd.f32 %v1286_v39, %v1041_v59  ;;  %5919 = vmatmul.msk.f32.gmra.mxu0 %vm476_vm1, %v2170_v41  ;;  %v1570_v34 = vadd.f32 %v1474_v8, %v1292_v42  ;;  %v9286_v59 = vld [vmem:[#allocation5_spill] sm:$0xff]  ;;  %v9289_v39 = vld [vmem:[#allocation8_spill] sm:$0xff]  ;;  %v9290_v8 = vld [vmem:[#allocation7_spill] sm:$0xff] }
 0x22c   : > { %v2173_v42 = vld [vmem:[#allocation2 + $0xd8] sm:$0xff] }
 0x22d   : > { %5816 = vmatmul.msk.f32.gmra.mxu1 %vm476_vm1, %v6954_v51 }
 0x22e   : > { %5852 = vmatmul.msk.f32.gmra.mxu2 %vm476_vm1, %v6952_v49  ;;  %v2171_v49 = vld [vmem:[#allocation2 + $0xc0] sm:$0xff] }
 0x22f   : > { %5887 = vmatmul.msk.f32.gmra.mxu3 %vm476_vm1, %v6961_v52 }
 0x231   : > { %v1752_v21 = vpop.f32.mrf.mxu2 }
 0x232   : > { %v1289_v7 = vpop.f32.mrf.mxu3  ;;  %v1848_v9 = vadd.f32 %v1752_v21, %v1570_v34  ;;  %v1477_v51 = vpop.f32.mrf.mxu1 }
 0x233   : > { %v7458_v48 = vadd.f32 %v1289_v7, %v1044_v2  ;;  %5920 = vmatmul.msk.f32.gmra.mxu0 %vm476_vm1, %v2171_v49  ;;  %v1571_v52 = vadd.f32 %v1477_v51, %v1293_v54  ;;  %v9292_v54 = vld [vmem:[#allocation11_spill] sm:$0xff]  ;;  %v9293_v49 = vld [vmem:[#allocation10_spill] sm:$0xff] }
 0x235   : > { %5817 = vmatmul.msk.f32.gmra.mxu1 %vm476_vm1, %v6972_v62  ;;  %v1205_v62 = vpop.f32.mrf.mxu0 }
 0x236   : > { %5853 = vmatmul.msk.f32.gmra.mxu2 %vm476_vm1, %v6970_v61  ;;  %v9287_v61 = vld [vmem:[#allocation4_spill] sm:$0xff]  ;;  %v1295_v2 = vadd.f32 %v1205_v62, %v960_v40 }
 0x237   : > { %5888 = vmatmul.msk.f32.gmra.mxu3 %vm476_vm1, %v6974_v63  ;;  %v2172_v63 = vld [vmem:[#allocation2 + $0xc8] sm:$0xff] }
 0x239   : > { %v1755_v10 = vpop.f32.mrf.mxu2 }
 0x23a   : > { %v1849_v58 = vadd.f32 %v1755_v10, %v1571_v52  ;;  %v2030_v29 = vpop.f32.mrf.mxu3  ;;  %v1480_v14 = vpop.f32.mrf.mxu1  ;;  %v2174_v52 = vld [vmem:[#allocation2 + $0xe0] sm:$0xff] }
 0x23b   : > { %v7467_v57 = vadd.f32 %v2030_v29, %v1848_v9  ;;  %5921 = vmatmul.msk.f32.gmra.mxu0 %vm476_vm1, %v2172_v63  ;;  %v1572_v0 = vadd.f32 %v1480_v14, %v1294_v18  ;;  %v9294_v10 = vld [vmem:[#allocation12_spill] sm:$0xff] }
 0x23d   : > { %5818 = vmatmul.msk.f32.gmra.mxu1 %vm476_vm1, %v9286_v59  ;;  %v1208_v41 = vpop.f32.mrf.mxu0  ;;  %v5940_v59 = vld [vmem:[%s9187_s3 + $0xe0] sm:$0xff] }
 0x23e   : > { %5854 = vmatmul.msk.f32.gmra.mxu2 %vm476_vm1, %v9287_v61  ;;  %v1296_v51 = vadd.f32 %v1208_v41, %v963_v50  ;;  %v966_v61 = vadd.f32 %v7398_v38, %v7316_v3  ;;  %2585 = vmatpush.msra.mxu1 %v5940_v59  ;;  %v9298_v41 = vld [vmem:[#allocation18_spill] sm:$0xff] }
 0x23f   : > { %5889 = vmatmul.msk.f32.gmra.mxu3 %vm476_vm1, %v9288_v30  ;;  %v9295_v30 = vld [vmem:[#allocation14_spill] sm:$0xff] }
 0x241   : > { %v1758_v25 = vpop.f32.mrf.mxu2 }
 0x242   : > { %v1850_v26 = vadd.f32 %v1758_v25, %v1572_v0  ;;  %v2033_v27 = vpop.f32.mrf.mxu3  ;;  %v1483_v19 = vpop.f32.mrf.mxu1  ;;  %v9296_v0 = vld [vmem:[#allocation13_spill] sm:$0xff]  ;;  %v2175_v25 = vld [vmem:[#allocation2 + $0xf0] sm:$0xff] }
 0x243   : > { %v7478_v1 = vadd.f32 %v2033_v27, %v1849_v58  ;;  %5922 = vmatmul.msk.f32.gmra.mxu0 %vm476_vm1, %v2173_v42  ;;  %v1573_v34 = vadd.f32 %v1483_v19, %v1295_v2  ;;  %v5976_v58 = vld [vmem:[%s9187_s3 + $0x100] sm:$0xff] }
 0x244   : > { %2863 = vmatpush.msra.mxu2 %v5976_v58  ;;  %v2177_v58 = vld [vmem:[#allocation2 + $0x108] sm:$0xff] }
 0x245   : > { %5819 = vmatmul.msk.f32.gmra.mxu1 %vm476_vm1, %v9289_v39  ;;  %v1211_v32 = vpop.f32.mrf.mxu0 }
 0x246   : > { %5855 = vmatmul.msk.f32.gmra.mxu2 %vm476_vm1, %v9290_v8  ;;  %v1297_v63 = vadd.f32 %v1211_v32, %v966_v61  ;;  %v969_v8 = vadd.f32 %v7415_v45, %v7328_v5  ;;  %v9301_v45 = vld [vmem:[#allocation16_spill] sm:$0xff]  ;;  %v9306_v61 = vld [vmem:[#allocation26_spill] sm:$0xff] }
 0x247   : > { %5890 = vmatmul.msk.f32.gmra.mxu3 %vm476_vm1, %v9291_v43  ;;  %v9299_v43 = vld [vmem:[#allocation17_spill] sm:$0xff] }
 0x249   : > { %v1761_v21 = vpop.f32.mrf.mxu2 }
 0x24a   : > { %v1851_v7 = vadd.f32 %v1761_v21, %v1573_v34  ;;  %v2036_v9 = vpop.f32.mrf.mxu3  ;;  %v1486_v33 = vpop.f32.mrf.mxu1  ;;  %v2176_v34 = vld [vmem:[#allocation2 + $0xf8] sm:$0xff] }
 0x24b   : > { %v7489_v46 = vadd.f32 %v2036_v9, %v1850_v26  ;;  %5923 = vmatmul.msk.f32.gmra.mxu0 %vm476_vm1, %v2174_v52  ;;  %v1574_v29 = vadd.f32 %v1486_v33, %v1296_v51  ;;  %v9297_v26 = vld [vmem:[#allocation15_spill] sm:$0xff]  ;;  %v9303_v52 = vld [vmem:[#allocation22_spill] sm:$0xff] }
 0x24c   : > { %v9300_v21 = vld [vmem:[#allocation19_spill] sm:$0xff] }
 0x24d   : > { %5820 = vmatmul.msk.f32.gmra.mxu1 %vm476_vm1, %v9292_v54  ;;  %v1214_v39 = vpop.f32.mrf.mxu0  ;;  %v9302_v54 = vld [vmem:[#allocation20_spill] sm:$0xff] }
 0x24e   : > { %5856 = vmatmul.msk.f32.gmra.mxu2 %vm476_vm1, %v9293_v49  ;;  %v1298_v42 = vadd.f32 %v1214_v39, %v969_v8  ;;  %v1299_v49 = vadd.f32 %v9302_v54, %v9301_v45  ;;  %v9310_v8 = vld [vmem:[#allocation30_spill] sm:$0xff]  ;;  %v9315_v45 = vld [vmem:[#allocation33_spill] sm:$0xff] }
 0x24f   : > { %5891 = vmatmul.msk.f32.gmra.mxu3 %vm476_vm1, %v9294_v10  ;;  %v9304_v10 = vld [vmem:[#allocation21_spill] sm:$0xff] }
 0x250   : > { %v2180_v54 = vld [vmem:[#allocation2 + $0x128] sm:$0xff] }
 0x251   : > { %v1764_v31 = vpop.f32.mrf.mxu2 }
 0x252   : > { %v1852_v14 = vadd.f32 %v1764_v31, %v1574_v29  ;;  %v2039_v17 = vpop.f32.mrf.mxu3  ;;  %v1489_v18 = vpop.f32.mrf.mxu1  ;;  %v9305_v29 = vld [vmem:[#allocation23_spill] sm:$0xff] }
 0x253   : > { %v7503_v62 = vadd.f32 %v2039_v17, %v1851_v7  ;;  %5924 = vmatmul.msk.f32.gmra.mxu0 %vm476_vm1, %v2175_v25  ;;  %v1575_v27 = vadd.f32 %v1489_v18, %v1297_v63  ;;  %v9307_v63 = vld [vmem:[#allocation25_spill] sm:$0xff] }
 0x255   : > { %5821 = vmatmul.msk.f32.gmra.mxu1 %vm476_vm1, %v9295_v30  ;;  %v2178_v30 = vld [vmem:[#allocation2 + $0x110] sm:$0xff]  ;;  %v7548_v25 = vpop.f32.mrf.mxu0 }
 0x256   : > { %5857 = vmatmul.msk.f32.gmra.mxu2 %vm476_vm1, %v9296_v0  ;;  %v9308_v0 = vld [vmem:[#allocation27_spill] sm:$0xff] }
 0x257   : > { %5892 = vmatmul.msk.f32.gmra.mxu3 %vm476_vm1, %v9297_v26  ;;  %v9309_v26 = vld [vmem:[#allocation24_spill] sm:$0xff] }
 0x259   : > { %v1767_v19 = vpop.f32.mrf.mxu2 }
 0x25a   : > { %v1853_v40 = vadd.f32 %v1767_v19, %v1575_v27  ;;  %v2042_v2 = vpop.f32.mrf.mxu3  ;;  %v1492_v38 = vpop.f32.mrf.mxu1 }
 0x25b   : > { %v7517_v3 = vadd.f32 %v2042_v2, %v1852_v14  ;;  %5925 = vmatmul.msk.f32.gmra.mxu0 %vm476_vm1, %v2176_v34  ;;  %v1576_v7 = vadd.f32 %v1492_v38, %v1298_v42  ;;  %v9311_v42 = vld [vmem:[#allocation29_spill] sm:$0xff]  ;;  %v9313_v34 = vld [vmem:[#allocation28_spill] sm:$0xff] }
 0x25d   : > { %5822 = vmatmul.msk.f32.gmra.mxu1 %vm476_vm1, %v9298_v41  ;;  %v2179_v41 = vld [vmem:[#allocation2 + $0x120] sm:$0xff] }
 0x25e   : > { %5858 = vmatmul.msk.f32.gmra.mxu2 %vm476_vm1, %v9299_v43  ;;  %v9312_v43 = vld [vmem:[#allocation31_spill] sm:$0xff] }
 0x25f   : > { %5893 = vmatmul.msk.f32.gmra.mxu3 %vm476_vm1, %v9300_v21 }
 0x261   : > { %v1770_v9 = vpop.f32.mrf.mxu2 }
 0x262   : > { %v1854_v33 = vadd.f32 %v1770_v9, %v1576_v7  ;;  %v2045_v50 = vpop.f32.mrf.mxu3  ;;  %v1495_v5 = vpop.f32.mrf.mxu1 }
 0x263   : > { %v7528_v51 = vadd.f32 %v2045_v50, %v1853_v40  ;;  %5926 = vmatmul.msk.f32.gmra.mxu0 %vm476_vm1, %v2177_v58  ;;  %v1577_v32 = vadd.f32 %v1495_v5, %v1299_v49  ;;  %v7563_v9 = vpop.f32.mrf.mxu0  ;;  %v9314_v5 = vld [vmem:[#allocation34_spill] sm:$0xff]  ;;  %v9316_v49 = vld [vmem:[#allocation35_spill] sm:$0xff] }
 0x265   : > { %5823 = vmatmul.msk.f32.gmra.mxu1 %vm476_vm1, %v9303_v52  ;;  %v9317_v52 = vld [vmem:[#allocation32_spill] sm:$0xff] }
 0x266   : > { %5859 = vmatmul.msk.f32.gmra.mxu2 %vm476_vm1, %v9304_v10 }
 0x267   : > { %5894 = vmatmul.msk.f32.gmra.mxu3 %vm476_vm1, %v9305_v29 }
 0x269   : > { %v1773_v31 = vpop.f32.mrf.mxu2 }
 0x26a   : > { %v1855_v14 = vadd.f32 %v1773_v31, %v1577_v32  ;;  %v2048_v17 = vpop.f32.mrf.mxu3  ;;  %v1498_v59 = vpop.f32.mrf.mxu1 }
 0x26b   : > { %v7539_v18 = vadd.f32 %v2048_v17, %v1854_v33  ;;  %5927 = vmatmul.msk.f32.gmra.mxu0 %vm476_vm1, %v2178_v30  ;;  %v1578_v27 = vadd.f32 %v1498_v59, %v9309_v26  ;;  %v7577_v31 = vpop.f32.mrf.mxu0  ;;  %v9319_v17 = vld [vmem:[#allocation37_spill] sm:$0xff]  ;;  %v2181_v59 = vld [vmem:[#allocation2 + $0x138] sm:$0xff] }
 0x26d   : > { %5824 = vmatmul.msk.f32.gmra.mxu1 %vm476_vm1, %v9306_v61  ;;  %v9320_v61 = vld [vmem:[#allocation39_spill] sm:$0xff] }
 0x26e   : > { %5860 = vmatmul.msk.f32.gmra.mxu2 %vm476_vm1, %v9307_v63  ;;  %v9321_v63 = vld [vmem:[#allocation36_spill] sm:$0xff] }
 0x26f   : > { %5895 = vmatmul.msk.f32.gmra.mxu3 %vm476_vm1, %v9308_v0 }
 0x271   : > { %v1776_v19 = vpop.f32.mrf.mxu2 }
 0x272   : > { %v7551_v40 = vadd.f32 %v1776_v19, %v1578_v27  ;;  %v2051_v2 = vpop.f32.mrf.mxu3  ;;  %v1501_v38 = vpop.f32.mrf.mxu1 }
 0x273   : > { %v7553_v39 = vadd.f32 %v2051_v2, %v1855_v14  ;;  %5928 = vmatmul.msk.f32.gmra.mxu0 %vm476_vm1, %v2179_v41  ;;  %v1579_v21 = vadd.f32 %v1501_v38, %v9313_v34  ;;  %v9318_v14 = vld [vmem:[#allocation38_spill] sm:$0xff]  ;;  %v7589_v19 = vpop.f32.mrf.mxu0  ;;  %v9323_v38 = vld [vmem:[#allocation41_spill] sm:$0xff] }
 0x274   : > { %v9322_v2 = vld [vmem:[#allocation42_spill] sm:$0xff] }
 0x275   : > { %5825 = vmatmul.msk.f32.gmra.mxu1 %vm476_vm1, %v9310_v8  ;;  %v2182_v8 = vld [vmem:[#allocation2 + $0x140] sm:$0xff] }
 0x276   : > { %5861 = vmatmul.msk.f32.gmra.mxu2 %vm476_vm1, %v9311_v42  ;;  %v9324_v42 = vld [vmem:[#allocation40_spill] sm:$0xff] }
 0x277   : > { %5896 = vmatmul.msk.f32.gmra.mxu3 %vm476_vm1, %v9312_v43 }
 0x279   : > { %v1779_v7 = vpop.f32.mrf.mxu2 }
 0x27a   : > { %v7565_v33 = vadd.f32 %v1779_v7, %v1579_v21  ;;  %v1504_v50 = vpop.f32.mrf.mxu1  ;;  %v6012_v7 = vld [vmem:[%s9189_s5 + $0x10] sm:$0xff] }
 0x27b   : > { %5929 = vmatmul.msk.f32.gmra.mxu0 %vm476_vm1, %v2180_v54  ;;  %v1580_v10 = vadd.f32 %v1504_v50, %v9317_v52  ;;  %v2183_v50 = vld [vmem:[#allocation2 + $0x150] sm:$0xff]  ;;  %3320 = vmatpush.msra.mxu3 %v6012_v7  ;;  %v1354_v52 = vld [vmem:[#allocation2 + $0x180] sm:$0xff] }
 0x27d   : > { %5826 = vmatmul.msk.f32.gmra.mxu1 %vm476_vm1, %v9314_v5 }
 0x27e   : > { %5862 = vmatmul.msk.f32.gmra.mxu2 %vm476_vm1, %v9315_v45 }
 0x27f   : > { %5897 = vmatmul.msk.f32.gmra.mxu3 %vm476_vm1, %v9316_v49 }
 0x281   : > { %v1782_v58 = vpop.f32.mrf.mxu2 }
 0x282   : > { %v7575_v29 = vadd.f32 %v1782_v58, %v1580_v10  ;;  %v1507_v32 = vpop.f32.mrf.mxu1 }
 0x283   : > { %5930 = vmatmul.msk.f32.gmra.mxu0 %vm476_vm1, %v2181_v59  ;;  %v1581_v30 = vadd.f32 %v1507_v32, %v9321_v63  ;;  %v7629_v59 = vld [vmem:[#allocation2 + $0x189] sm:$0xff] }
 0x285   : > { %5827 = vmatmul.msk.f32.gmra.mxu1 %vm476_vm1, %v9318_v14 }
 0x286   : > { %5863 = vmatmul.msk.f32.gmra.mxu2 %vm476_vm1, %v9319_v17  ;;  %v1355_v17 = vld [vmem:[#allocation2 + $0x188] sm:$0xff] }
 0x287   : > { %5898 = vmatmul.msk.f32.gmra.mxu3 %vm476_vm1, %v9320_v61  ;;  %v7634_v61 = vld [vmem:[#allocation2 + $0x182] sm:$0xff] }
 0x289   : > { %v1785_v0 = vpop.f32.mrf.mxu2 }
 0x28a   : > { %v7587_v26 = vadd.f32 %v1785_v0, %v1581_v30  ;;  %v1510_v27 = vpop.f32.mrf.mxu1 }
 0x28b   : > { %5931 = vmatmul.msk.f32.gmra.mxu0 %vm476_vm1, %v2182_v8  ;;  %v1582_v41 = vadd.f32 %v1510_v27, %v9324_v42  ;;  %v7644_v8 = vld [vmem:[#allocation2 + $0x18a] sm:$0xff] }
 0x28c   : > { %v9326_v42 = vld [vmem:[#allocation45_spill] sm:$0xff] }
 0x28d   : > { %5828 = vmatmul.msk.f32.gmra.mxu1 %vm476_vm1, %v9322_v2 }
 0x28e   : > { %5864 = vmatmul.msk.f32.gmra.mxu2 %vm476_vm1, %v9323_v38  ;;  %v2437_v38 = vld [vmem:[#allocation2 + $0x31] sm:$0xff] }
 0x28f   : > { %5899 = vmatmul.msk.f32.gmra.mxu3 %vm476_vm1, %v7209_v4  ;;  %v7611_v4 = vpop.f32.mrf.mxu0 }
 0x291   : > { %v1788_v43 = vpop.f32.mrf.mxu2 }
 0x292   : > { %v7599_v34 = vadd.f32 %v1788_v43, %v1582_v41  ;;  %v1513_v21 = vpop.f32.mrf.mxu1  ;;  %v2186_v41 = vld [vmem:[#allocation2 + $0x170] sm:$0xff] }
 0x293   : > { %5932 = vmatmul.msk.f32.gmra.mxu0 %vm476_vm1, %v2183_v50  ;;  %v1583_v5 = vadd.f32 %v1513_v21, %v7214_v44  ;;  %v9325_v44 = vld [vmem:[#allocation43_spill] sm:$0xff] }
 0x295   : > { %5829 = vmatmul.msk.f32.gmra.mxu1 %vm476_vm1, %v7219_v11  ;;  %v7616_v11 = vld [vmem:[#allocation2 + $0x181] sm:$0xff] }
 0x296   : > { %5865 = vmatmul.msk.f32.gmra.mxu2 %vm476_vm1, %v7217_v47  ;;  %v2184_v47 = vld [vmem:[#allocation2 + $0x158] sm:$0xff] }
 0x297   : > { %5900 = vmatmul.msk.f32.gmra.mxu3 %vm476_vm1, %v7221_v53  ;;  %v7625_v58 = vpop.f32.mrf.mxu0 }
 0x299   : > { %v1791_v45 = vpop.f32.mrf.mxu2 }
 0x29a   : > { %v7614_v54 = vadd.f32 %v1791_v45, %v1583_v5  ;;  %v1516_v49 = vpop.f32.mrf.mxu1  ;;  %v2438_v5 = vld [vmem:[#allocation2 + $0x39] sm:$0xff] }
 0x29b   : > { %5933 = vmatmul.msk.f32.gmra.mxu0 %vm476_vm1, %v2184_v47  ;;  %v1584_v53 = vadd.f32 %v1516_v49, %v9325_v44  ;;  %v9328_v49 = vld [vmem:[#allocation46_spill] sm:$0xff] }
 0x29d   : > { %5830 = vmatmul.msk.f32.gmra.mxu1 %vm476_vm1, %v1354_v52 }
 0x29e   : > { %5866 = vmatmul.msk.f32.gmra.mxu2 %vm476_vm1, %v7616_v11 }
 0x29f   : > { %5901 = vmatmul.msk.f32.gmra.mxu3 %vm476_vm1, %v7236_v24  ;;  %v2185_v24 = vld [vmem:[#allocation2 + $0x168] sm:$0xff]  ;;  %v7642_v2 = vpop.f32.mrf.mxu0 }
 0x2a1   : > { %v1794_v10 = vpop.f32.mrf.mxu2 }
 0x2a2   : > { %v7627_v32 = vadd.f32 %v1794_v10, %v1584_v53  ;;  %v1519_v14 = vpop.f32.mrf.mxu1 }
 0x2a3   : > { %5934 = vmatmul.msk.f32.gmra.mxu0 %vm476_vm1, %v2185_v24  ;;  %v1585_v63 = vadd.f32 %v1519_v14, %v7251_v60  ;;  %v9327_v60 = vld [vmem:[#allocation44_spill] sm:$0xff]  ;;  %v2439_v14 = vld [vmem:[#allocation2 + $0x49] sm:$0xff] }
 0x2a5   : > { %5831 = vmatmul.msk.f32.gmra.mxu1 %vm476_vm1, %v1355_v17 }
 0x2a6   : > { %5867 = vmatmul.msk.f32.gmra.mxu2 %vm476_vm1, %v7629_v59 }
 0x2a7   : > { %5902 = vmatmul.msk.f32.gmra.mxu3 %vm476_vm1, %v7634_v61  ;;  %v7655_v45 = vpop.f32.mrf.mxu0 }
 0x2a9   : > { %v1797_v30 = vpop.f32.mrf.mxu2 }
 0x2aa   : > { %v7640_v0 = vadd.f32 %v1797_v30, %v1585_v63  ;;  %v1522_v27 = vpop.f32.mrf.mxu1  ;;  %v9329_v63 = vld [vmem:[#allocation47_spill] sm:$0xff] }
 0x2ab   : > { %5935 = vmatmul.msk.f32.gmra.mxu0 %vm476_vm1, %v2186_v41  ;;  %v1586_v43 = vadd.f32 %v1522_v27, %v9327_v60 }
 0x2ad   : > { %5944 = vmatmul.msk.f32.vlgmr.msra.gmra.mxu1 %vm476_vm1, %v2437_v38  ;;  %v2189_v38 = vld [vmem:[#allocation2 + $0x198] sm:$0xff] }
 0x2ae   : > { %5980 = vmatmul.msk.f32.vlgmr.msra.gmra.mxu2 %vm476_vm1, %v9326_v42  ;;  %v2440_v42 = vld [vmem:[#allocation2 + $0x51] sm:$0xff] }
 0x2af   : > { %5903 = vmatmul.msk.f32.gmra.mxu3 %vm476_vm1, %v7644_v8  ;;  %v7668_v24 = vpop.f32.mrf.mxu0 }
 0x2b1   : > { %v1800_v21 = vpop.f32.mrf.mxu2 }
 0x2b2   : > { %v7653_v7 = vadd.f32 %v1800_v21, %v1586_v43  ;;  %v1525_v50 = vpop.f32.mrf.mxu1 }
 0x2b3   : > { %5936 = vmatmul.msk.f32.gmra.mxu0 %vm476_vm1, %v1354_v52  ;;  %v1587_v47 = vadd.f32 %v1525_v50, %v9328_v49  ;;  %v2441_v49 = vld [vmem:[#allocation2 + $0x61] sm:$0xff] }
 0x2b5   : > { %5945 = vmatmul.msk.f32.gmra.mxu1 %vm476_vm1, %v2438_v5  ;;  %v2190_v5 = vld [vmem:[#allocation2 + $0x1a0] sm:$0xff] }
 0x2b6   : > { %5981 = vmatmul.msk.f32.gmra.mxu2 %vm476_vm1, %v7288_v13 }
 0x2b7   : > { %v7680_v43 = vpop.f32.mrf.mxu0 }
 0x2b9   : > { %v1803_v44 = vpop.f32.mrf.mxu2 }
 0x2ba   : > { %v7662_v53 = vadd.f32 %v1803_v44, %v1587_v47  ;;  %v1528_v10 = vpop.f32.mrf.mxu1  ;;  %v2719_v47 = vld [vmem:[#allocation2 + $0x62] sm:$0xff] }
 0x2bb   : > { %5937 = vmatmul.msk.f32.gmra.mxu0 %vm476_vm1, %v1355_v17  ;;  %v1588_v13 = vadd.f32 %v1528_v10, %v9329_v63  ;;  %v9330_v17 = vld [vmem:[#allocation48_spill] sm:$0xff] }
 0x2bd   : > { %5946 = vmatmul.msk.f32.gmra.mxu1 %vm476_vm1, %v2439_v14 }
 0x2be   : > { %5982 = vmatmul.msk.f32.gmra.mxu2 %vm476_vm1, %v7302_v35  ;;  %v7677_v35 = vpop.f32.mrf.mxu3 }
 0x2c1   : > { %v1806_v30 = vpop.f32.mrf.mxu2 }
 0x2c2   : > { %v7671_v52 = vadd.f32 %v1806_v30, %v1588_v13  ;;  %v1531_v27 = vpop.f32.mrf.mxu1  ;;  %v7692_v13 = vpop.f32.mrf.mxu0  ;;  %v2442_v30 = vld [vmem:[#allocation2 + $0x69] sm:$0xff] }
 0x2c3   : > { %5938 = vmatmul.msk.f32.gmra.mxu0 %vm476_vm1, %v2189_v38  ;;  %v1589_v41 = vadd.f32 %v1531_v27, %v9330_v17  ;;  %v2720_v27 = vld [vmem:[#allocation2 + $0x6a] sm:$0xff] }
 0x2c5   : > { %5947 = vmatmul.msk.f32.gmra.mxu1 %vm476_vm1, %v2440_v42 }
 0x2c6   : > { %5983 = vmatmul.msk.f32.gmra.mxu2 %vm476_vm1, %v7334_v15  ;;  %v7688_v10 = vpop.f32.mrf.mxu3 }
 0x2c9   : > { %v1809_v60 = vpop.f32.mrf.mxu2 }
 0x2ca   : > { %v7682_v21 = vadd.f32 %v1809_v60, %v1589_v41  ;;  %v1534_v50 = vpop.f32.mrf.mxu1  ;;  %v2443_v60 = vld [vmem:[#allocation2 + $0x79] sm:$0xff] }
 0x2cb   : > { %5939 = vmatmul.msk.f32.gmra.mxu0 %vm476_vm1, %v2190_v5  ;;  %v1590_v15 = vadd.f32 %v1534_v50, %v7326_v20  ;;  %v2721_v50 = vld [vmem:[#allocation2 + $0x7a] sm:$0xff]  ;;  %v7701_v5 = vpop.f32.mrf.mxu0 }
 0x2cc   : > { %9331 = vst [vmem:[#allocation5_spill] sm:$0xff] %v7682_v21 }
 0x2cd   : > { %5948 = vmatmul.msk.f32.gmra.mxu1 %vm476_vm1, %v2441_v49 }
 0x2ce   : > { %5984 = vmatmul.msk.f32.gmra.mxu2 %vm476_vm1, %v2719_v47  ;;  %v7699_v41 = vpop.f32.mrf.mxu3 }
 0x2d1   : > { %v1812_v44 = vpop.f32.mrf.mxu2 }
 0x2d2   : > { %v7690_v14 = vadd.f32 %v1812_v44, %v1590_v15  ;;  %v1537_v63 = vpop.f32.mrf.mxu1  ;;  %v2444_v44 = vld [vmem:[#allocation2 + $0x81] sm:$0xff] }
 0x2d3   : > { %v1591_v38 = vadd.f32 %v1537_v63, %v7340_v36  ;;  %v2722_v63 = vld [vmem:[#allocation2 + $0x82] sm:$0xff] }
 0x2d4   : > { %9332 = vst [vmem:[#allocation4_spill] sm:$0xff] %v7690_v14 }
 0x2d5   : > { %5949 = vmatmul.msk.f32.gmra.mxu1 %vm476_vm1, %v2442_v30 }
 0x2d6   : > { %5985 = vmatmul.msk.f32.gmra.mxu2 %vm476_vm1, %v2720_v27  ;;  %v7708_v30 = vpop.f32.mrf.mxu3  ;;  %v7712_v27 = vpop.f32.mrf.mxu0 }
 0x2d9   : > { %v1815_v42 = vpop.f32.mrf.mxu2 }
 0x2da   : > { %v7697_v17 = vadd.f32 %v1815_v42, %v1591_v38  ;;  %v1540_v20 = vpop.f32.mrf.mxu1 }
 0x2db   : > { %v1592_v49 = vadd.f32 %v1540_v20, %v7352_v12  ;;  %v2445_v20 = vld [vmem:[#allocation2 + $0x91] sm:$0xff] }
 0x2dc   : > { %9333 = vst [vmem:[#allocation6_spill] sm:$0xff] %v7697_v17  ;;  %v2447_v17 = vld [vmem:[#allocation2 + $0xa9] sm:$0xff] }
 0x2dd   : > { %5950 = vmatmul.msk.f32.gmra.mxu1 %vm476_vm1, %v2443_v60 }
 0x2de   : > { %5986 = vmatmul.msk.f32.gmra.mxu2 %vm476_vm1, %v2721_v50  ;;  %v2723_v50 = vld [vmem:[#allocation2 + $0x92] sm:$0xff] }
 0x2e1   : > { %v1818_v47 = vpop.f32.mrf.mxu2 }
 0x2e2   : > { %v7706_v15 = vadd.f32 %v1818_v47, %v1592_v49  ;;  %v1543_v36 = vpop.f32.mrf.mxu1  ;;  %v7719_v49 = vpop.f32.mrf.mxu3 }
 0x2e3   : > { %v1593_v38 = vadd.f32 %v1543_v36, %v7363_v16  ;;  %v2446_v36 = vld [vmem:[#allocation2 + $0x99] sm:$0xff] }
 0x2e4   : > { %9334 = vst [vmem:[#allocation8_spill] sm:$0xff] %v7706_v15 }
 0x2e5   : > { %5951 = vmatmul.msk.f32.gmra.mxu1 %vm476_vm1, %v2444_v44 }
 0x2e6   : > { %5987 = vmatmul.msk.f32.gmra.mxu2 %vm476_vm1, %v2722_v63  ;;  %v7722_v63 = vpop.f32.mrf.mxu0 }
 0x2e9   : > { %v1821_v42 = vpop.f32.mrf.mxu2 }
 0x2ea   : > { %v7715_v60 = vadd.f32 %v1821_v42, %v1593_v38  ;;  %v1546_v12 = vpop.f32.mrf.mxu1  ;;  %v2724_v38 = vld [vmem:[#allocation2 + $0x9a] sm:$0xff] }
 0x2eb   : > { %v1594_v47 = vadd.f32 %v1546_v12, %v7374_v22 }
 0x2ec   : > { %9335 = vst [vmem:[#allocation7_spill] sm:$0xff] %v7715_v60 }
 0x2ed   : > { %5952 = vmatmul.msk.f32.gmra.mxu1 %vm476_vm1, %v2445_v20 }
 0x2ee   : > { %5988 = vmatmul.msk.f32.gmra.mxu2 %vm476_vm1, %v2723_v50  ;;  %v7729_v50 = vpop.f32.mrf.mxu3  ;;  %v7733_v12 = vpop.f32.mrf.mxu0 }
 0x2f1   : > { %v1824_v44 = vpop.f32.mrf.mxu2 }
 0x2f2   : > { %v7724_v15 = vadd.f32 %v1824_v44, %v1594_v47  ;;  %v1549_v16 = vpop.f32.mrf.mxu1  ;;  %v2725_v47 = vld [vmem:[#allocation2 + $0xaa] sm:$0xff] }
 0x2f3   : > { %v1595_v42 = vadd.f32 %v1549_v16, %v7385_v28 }
 0x2f4   : > { %9336 = vst [vmem:[#allocation9_spill] sm:$0xff] %v7724_v15  ;;  %v2448_v15 = vld [vmem:[#allocation2 + $0xb1] sm:$0xff] }
 0x2f5   : > { %5953 = vmatmul.msk.f32.gmra.mxu1 %vm476_vm1, %v2446_v36 }
 0x2f6   : > { %5989 = vmatmul.msk.f32.gmra.mxu2 %vm476_vm1, %v2724_v38  ;;  %v7740_v16 = vpop.f32.mrf.mxu3 }
 0x2f9   : > { %v1827_v20 = vpop.f32.mrf.mxu2 }
 0x2fa   : > { %v7731_v60 = vadd.f32 %v1827_v20, %v1595_v42  ;;  %v1552_v22 = vpop.f32.mrf.mxu1  ;;  %v2726_v42 = vld [vmem:[#allocation2 + $0xb2] sm:$0xff]  ;;  %v7742_v20 = vpop.f32.mrf.mxu0 }
 0x2fb   : > { %v1596_v44 = vadd.f32 %v1552_v22, %v7396_v6  ;;  %v2449_v22 = vld [vmem:[#allocation2 + $0xc1] sm:$0xff] }
 0x2fc   : > { %9337 = vst [vmem:[#allocation11_spill] sm:$0xff] %v7731_v60 }
 0x2fd   : > { %5954 = vmatmul.msk.f32.gmra.mxu1 %vm476_vm1, %v2447_v17 }
 0x2fe   : > { %5990 = vmatmul.msk.f32.gmra.mxu2 %vm476_vm1, %v2725_v47 }
 0x301   : > { %v1830_v36 = vpop.f32.mrf.mxu2 }
 0x302   : > { %v7738_v38 = vadd.f32 %v1830_v36, %v1596_v44  ;;  %v1555_v28 = vpop.f32.mrf.mxu1  ;;  %v2727_v44 = vld [vmem:[#allocation2 + $0xc2] sm:$0xff]  ;;  %v7749_v36 = vpop.f32.mrf.mxu3 }
 0x303   : > { %v1597_v17 = vadd.f32 %v1555_v28, %v7410_v23 }
 0x304   : > { %9338 = vst [vmem:[#allocation10_spill] sm:$0xff] %v7738_v38  ;;  %v9340_v38 = vmov 0.0  }
 0x305   : > { %5955 = vmatmul.msk.f32.gmra.mxu1 %vm476_vm1, %v2448_v15  ;;  %3062 = vst.msk [vmem:[#allocation3] sm:$0xff] %vm3061_vm3, %v9340_v38  ;;  %v7755_v15 = vpop.f32.mrf.mxu0 }
 0x306   : > { %5991 = vmatmul.msk.f32.gmra.mxu2 %vm476_vm1, %v2726_v42  ;;  %3063 = vst.msk [vmem:[#allocation3 + $0x8] sm:$0xff] %vm3061_vm3, %v9340_v38 }
 0x307   : > { %3067 = vst.msk [vmem:[#allocation3 + $0x198] sm:$0xff] %vm3061_vm3, %v9340_v38 }
 0x308   : > { %3068 = vst.msk [vmem:[#allocation3 + $0x1a0] sm:$0xff] %vm3061_vm3, %v9340_v38 }
 0x309   : > { %v1833_v60 = vpop.f32.mrf.mxu2  ;;  %3071 = vst.msk [vmem:[#allocation3] sm:$0x1] %vm3070_vm4, %v9340_v38 }
 0x30a   : > { %v7747_v47 = vadd.f32 %v1833_v60, %v1597_v17  ;;  %v1558_v6 = vpop.f32.mrf.mxu1  ;;  %3072 = vst.msk [vmem:[#allocation3 + $0x18] sm:$0x1] %vm3070_vm4, %v9340_v38  ;;  %v2450_v17 = vld [vmem:[#allocation2 + $0xc9] sm:$0xff] }
 0x30b   : > { %v1598_v23 = vadd.f32 %v1558_v6, %v7427_v56  ;;  %v3173_v56 = vld [vmem:[%s9189_s5 + $0x8] sm:$0xff]  ;;  %3073 = vst.msk [vmem:[#allocation3 + $0x30] sm:$0x1] %vm3070_vm4, %v9340_v38 }
 0x30c   : > { %9339 = vst [vmem:[#allocation12_spill] sm:$0xff] %v7747_v47  ;;  %v2728_v6 = vld [vmem:[#allocation2 + $0xca] sm:$0xff]  ;;  %3528 = vmatpush.msrb.mxu0 %v3173_v56 }
 0x30d   : > { %5956 = vmatmul.msk.f32.gmra.mxu1 %vm476_vm1, %v2449_v22  ;;  %v3172_v22 = vld [vmem:[%s9189_s5] sm:$0xff]  ;;  %3074 = vst.msk [vmem:[#allocation3 + $0x48] sm:$0x1] %vm3070_vm4, %v9340_v38 }
 0x30e   : > { %5992 = vmatmul.msk.f32.gmra.mxu2 %vm476_vm1, %v2727_v44  ;;  %3529 = vmatpush.msrb.mxu0 %v3172_v22  ;;  %v3174_v44 = vld [vmem:[#allocation3 + $0x1] sm:$0xff]  ;;  %3075 = vst.msk [vmem:[#allocation3 + $0x60] sm:$0x1] %vm3070_vm4, %v9340_v38 }
 0x30f   : > { %6014 = vmatmul.msk.f32.vlgmr.msra.gmra.mxu3 %vm3061_vm3, %v3174_v44  ;;  %3076 = vst.msk [vmem:[#allocation3 + $0x78] sm:$0x1] %vm3070_vm4, %v9340_v38  ;;  %v6113_v44 = vld [vmem:[%s9189_s5 + $0x38] sm:$0xff] }
 0x310   : > { %3077 = vst.msk [vmem:[#allocation3 + $0x90] sm:$0x1] %vm3070_vm4, %v9340_v38  ;;  %v3140_v22 = vld [vmem:[#allocation3] sm:$0xff]  ;;  %4048 = vmatpush.msrb.mxu2 %v6113_v44 }
 0x311   : > { %v1836_v60 = vpop.f32.mrf.mxu2  ;;  %3078 = vst.msk [vmem:[#allocation3 + $0xa8] sm:$0x1] %vm3070_vm4, %v9340_v38  ;;  %6046 = vmatmul.msk.f32.vlgmr.msrb.gmra.mxu0 %vm3061_vm3, %v3140_v22 }
 0x312   : > { %v7762_v28 = vadd.f32 %v1836_v60, %v1598_v23  ;;  %v1561_v42 = vpop.f32.mrf.mxu1  ;;  %v7784_v23 = vpop.f32.mrf.mxu3  ;;  %3079 = vst.msk [vmem:[#allocation3 + $0xc0] sm:$0x1] %vm3070_vm4, %v9340_v38 }
 0x313   : > { %v1599_v60 = vadd.f32 %v1561_v42, %v7436_v37  ;;  %v2451_v37 = vld [vmem:[#allocation2 + $0xd9] sm:$0xff]  ;;  %3080 = vst.msk [vmem:[#allocation3 + $0xd8] sm:$0x1] %vm3070_vm4, %v9340_v38 }
 0x314   : > { %9341 = vst [vmem:[#allocation14_spill] sm:$0xff] %v7762_v28  ;;  %v2729_v42 = vld [vmem:[#allocation2 + $0xda] sm:$0xff] }
 0x315   : > { %5957 = vmatmul.msk.f32.gmra.mxu1 %vm476_vm1, %v2450_v17  ;;  %v7792_v17 = vpop.f32.mrf.mxu0  ;;  %3081 = vst.msk [vmem:[#allocation3 + $0xf0] sm:$0x1] %vm3070_vm4, %v9340_v38 }
 0x316   : > { %5993 = vmatmul.msk.f32.gmra.mxu2 %vm476_vm1, %v2728_v6  ;;  %3082 = vst.msk [vmem:[#allocation3 + $0x108] sm:$0x1] %vm3070_vm4, %v9340_v38 }
 0x317   : > { %3083 = vst.msk [vmem:[#allocation3 + $0x120] sm:$0x1] %vm3070_vm4, %v9340_v38 }
 0x318   : > { %3084 = vst.msk [vmem:[#allocation3 + $0x138] sm:$0x1] %vm3070_vm4, %v9340_v38 }
 0x319   : > { %v1839_v56 = vpop.f32.mrf.mxu2  ;;  %3085 = vst.msk [vmem:[#allocation3 + $0x150] sm:$0x1] %vm3070_vm4, %v9340_v38 }
 0x31a   : > { %v7794_v6 = vadd.f32 %v1839_v56, %v1599_v60  ;;  %v1564_v28 = vpop.f32.mrf.mxu1  ;;  %v6147_v60 = vld [vmem:[%s9189_s5 + $0x48] sm:$0xff]  ;;  %3086 = vst.msk [vmem:[#allocation3 + $0x168] sm:$0x1] %vm3070_vm4, %v9340_v38 }
 0x31b   : > { %v6079_v56 = vld [vmem:[%s9189_s5 + $0x28] sm:$0xff]  ;;  %4324 = vmatpush.msrb.mxu3 %v6147_v60  ;;  %v1600_v22 = vadd.f32 %v1564_v28, %v7447_v55  ;;  %3087 = vst.msk [vmem:[#allocation3 + $0x180] sm:$0x1] %vm3070_vm4, %v9340_v38 }
 0x31c   : > { %9342 = vst [vmem:[#allocation13_spill] sm:$0xff] %v7794_v6  ;;  %3772 = vmatpush.msrb.mxu1 %v6079_v56  ;;  %v3141_v6 = vld [vmem:[#allocation3 + $0x8] sm:$0xff]  ;;  %v2452_v28 = vld [vmem:[#allocation2 + $0xe1] sm:$0xff] }
 0x31d   : > { %5958 = vmatmul.msk.f32.gmra.mxu1 %vm476_vm1, %v2451_v37  ;;  %v7825_v37 = vpop.f32.mrf.mxu3  ;;  %6047 = vmatmul.msk.f32.gmra.mxu0 %vm3061_vm3, %v3141_v6  ;;  %v7834_v55 = vpop.f32.mrf.mxu0  ;;  %3088 = vst.msk [vmem:[#allocation3 + $0x198] sm:$0x1] %vm3070_vm4, %v9340_v38  ;;  %v2730_v60 = vld [vmem:[#allocation2 + $0xe2] sm:$0xff] }
 0x31e   : > { %5994 = vmatmul.msk.f32.gmra.mxu2 %vm476_vm1, %v2729_v42  ;;  %9344 = vst [vmem:[#allocation18_spill] sm:$0xff] %v7834_v55 }
 0x31f   : > { %3090 = vst.msk [vmem:[#allocation3 + $0x29] sm:$0x1] %vm3070_vm4, %v9340_v38 }
 0x320   : > { %3091 = vst.msk [vmem:[#allocation3 + $0x41] sm:$0x1] %vm3070_vm4, %v9340_v38 }
 0x321   : > { %v1842_v47 = vpop.f32.mrf.mxu2  ;;  %3092 = vst.msk [vmem:[#allocation3 + $0x59] sm:$0x1] %vm3070_vm4, %v9340_v38 }
 0x322   : > { %v7827_v42 = vadd.f32 %v1842_v47, %v1600_v22  ;;  %v1567_v44 = vpop.f32.mrf.mxu1  ;;  %3093 = vst.msk [vmem:[#allocation3 + $0x71] sm:$0x1] %vm3070_vm4, %v9340_v38 }
 0x323   : > { %v1601_v47 = vadd.f32 %v1567_v44, %v7458_v48  ;;  %3094 = vst.msk [vmem:[#allocation3 + $0x89] sm:$0x1] %vm3070_vm4, %v9340_v38  ;;  %v2453_v48 = vld [vmem:[#allocation2 + $0xf1] sm:$0xff] }
 0x324   : > { %9343 = vst [vmem:[#allocation15_spill] sm:$0xff] %v7827_v42  ;;  %v2731_v44 = vld [vmem:[#allocation2 + $0xf2] sm:$0xff] }
 0x325   : > { %5959 = vmatmul.msk.f32.gmra.mxu1 %vm476_vm1, %v2452_v28  ;;  %3095 = vst.msk [vmem:[#allocation3 + $0xa1] sm:$0x1] %vm3070_vm4, %v9340_v38  ;;  %v7857_v28 = vpop.f32.mrf.mxu3 }
 0x326   : > { %5995 = vmatmul.msk.f32.gmra.mxu2 %vm476_vm1, %v2730_v60  ;;  %3096 = vst.msk [vmem:[#allocation3 + $0xb9] sm:$0x1] %vm3070_vm4, %v9340_v38  ;;  %v2405_v60 = vadd.f32 %v7548_v25, %v7467_v57 }
 0x327   : > { %3097 = vst.msk [vmem:[#allocation3 + $0xd1] sm:$0x1] %vm3070_vm4, %v9340_v38 }
 0x328   : > { %3098 = vst.msk [vmem:[#allocation3 + $0xe9] sm:$0x1] %vm3070_vm4, %v9340_v38 }
 0x329   : > { %v1845_v6 = vpop.f32.mrf.mxu2  ;;  %3099 = vst.msk [vmem:[#allocation3 + $0x101] sm:$0x1] %vm3070_vm4, %v9340_v38 }
 0x32a   : > { %v7851_v56 = vadd.f32 %v1845_v6, %v1601_v47  ;;  %v2587_v22 = vpop.f32.mrf.mxu1  ;;  %v7865_v47 = vpop.f32.mrf.mxu0  ;;  %3100 = vst.msk [vmem:[#allocation3 + $0x119] sm:$0x1] %vm3070_vm4, %v9340_v38 }
 0x32b   : > { %9346 = vst [vmem:[#allocation19_spill] sm:$0xff] %v7865_v47  ;;  %v2683_v6 = vadd.f32 %v2587_v22, %v2405_v60  ;;  %v2732_v60 = vld [vmem:[#allocation2 + $0xfa] sm:$0xff] }
 0x32c   : > { %9345 = vst [vmem:[#allocation17_spill] sm:$0xff] %v7851_v56  ;;  %v7876_v56 = vld [vmem:[%s9188_s4] ss:$0 sm:$0xff] }
 0x32d   : > { %5960 = vmatmul.msk.f32.gmra.mxu1 %vm476_vm1, %v2453_v48  ;;  %3101 = vst.msk [vmem:[#allocation3 + $0x131] sm:$0x1] %vm3070_vm4, %v9340_v38 }
 0x32e   : > { %5996 = vmatmul.msk.f32.gmra.mxu2 %vm476_vm1, %v2731_v44  ;;  %3102 = vst.msk [vmem:[#allocation3 + $0x149] sm:$0x1] %vm3070_vm4, %v9340_v38  ;;  %v2454_v44 = vld [vmem:[#allocation2 + $0xf9] sm:$0xff] }
 0x32f   : > { %3103 = vst.msk [vmem:[#allocation3 + $0x161] sm:$0x1] %vm3070_vm4, %v9340_v38 }
 0x330   : > { %3104 = vst.msk [vmem:[#allocation3 + $0x179] sm:$0x1] %vm3070_vm4, %v9340_v38 }
 0x331   : > { %v2865_v57 = vpop.f32.mrf.mxu2  ;;  %3105 = vst.msk [vmem:[#allocation3 + $0x191] sm:$0x1] %vm3070_vm4, %v9340_v38 }
 0x332   : > { %v2961_v25 = vadd.f32 %v2865_v57, %v2683_v6  ;;  %v2590_v48 = vpop.f32.mrf.mxu1  ;;  %3065 = vst.msk [vmem:[#allocation3 + $0x10] sm:$0x3] %vm3064_vm5, %v9340_v38  ;;  %v2406_v6 = vadd.f32 %v7563_v9, %v7478_v1  ;;  %v7892_v57 = vpop.f32.mrf.mxu3 }
 0x333   : > { %9347 = vst [vmem:[#allocation16_spill] sm:$0xff] %v7892_v57  ;;  %v2733_v57 = vld [vmem:[#allocation2 + $0x10a] sm:$0xff] }
 0x334   : > { %v2997_v22 = vadd.f32 %v7876_v56, %v2961_v25  ;;  %3069 = vst.msk [vmem:[#allocation3 + $0x1a8] sm:$0x3] %vm3064_vm5, %v9340_v38  ;;  %v7899_v25 = vpop.f32.mrf.mxu0  ;;  %v2684_v42 = vadd.f32 %v2590_v48, %v2406_v6 }
 0x335   : > { %5961 = vmatmul.msk.f32.gmra.mxu1 %vm476_vm1, %v2454_v44  ;;  %3089 = vst.msk [vmem:[#allocation3 + $0x11] sm:$0x1] %vm3070_vm4, %v9340_v38 }
 0x336   : > { %6408 = vtanh.f32 %v2997_v22  ;;  %5997 = vmatmul.msk.f32.gmra.mxu2 %vm476_vm1, %v2732_v60  ;;  %9348 = vst [vmem:[#allocation20_spill] sm:$0xff] %v7899_v25  ;;  %v2455_v60 = vld [vmem:[#allocation2 + $0x109] sm:$0xff]  ;;  %v2407_v25 = vadd.f32 %v7577_v31, %v7489_v46  ;;  %v2456_v46 = vld [vmem:[#allocation2 + $0x111] sm:$0xff] }
 0x337   : > { %3106 = vst.msk [vmem:[#allocation3 + $0x1a9] sm:$0x1] %vm3070_vm4, %v9340_v38  ;;  %v2734_v31 = vld [vmem:[#allocation2 + $0x112] sm:$0xff] }
 0x339   : > { %v2868_v14 = vpop.f32.mrf.mxu2  ;;  %v3175_v44 = vld [vmem:[#allocation3 + $0x9] sm:$0xff] }
 0x33a   : > { %v2962_v1 = vadd.f32 %v2868_v14, %v2684_v42  ;;  %v2593_v9 = vpop.f32.mrf.mxu1  ;;  %6015 = vmatmul.msk.f32.gmra.mxu3 %vm3061_vm3, %v3175_v44  ;;  %v7910_v14 = vpop.f32.mrf.mxu3 }
 0x33b   : > { %v2685_v38 = vadd.f32 %v2593_v9, %v2407_v25 }
 0x33c   : > { %v6409_v47 = vpop.eup %6408  ;;  %v2998_v22 = vadd.f32 %v7876_v56, %v2962_v1  ;;  %v7912_v48 = vpop.f32.mrf.mxu0 }
 0x33d   : > { %3108 = vst.msk [vmem:[#allocation3 + $0x19] sm:$0xff] %vm3061_vm3, %v6409_v47  ;;  %5962 = vmatmul.msk.f32.gmra.mxu1 %vm476_vm1, %v2455_v60 }
 0x33e   : > { %6410 = vtanh.f32 %v2998_v22  ;;  %5998 = vmatmul.msk.f32.gmra.mxu2 %vm476_vm1, %v2733_v57  ;;  %9349 = vst [vmem:[#allocation22_spill] sm:$0xff] %v7912_v48  ;;  %v2408_v57 = vadd.f32 %v7589_v19, %v7503_v62  ;;  %v2457_v62 = vld [vmem:[#allocation2 + $0x121] sm:$0xff] }
 0x33f   : > { %v2735_v19 = vld [vmem:[#allocation2 + $0x122] sm:$0xff] }
 0x341   : > { %v2871_v42 = vpop.f32.mrf.mxu2 }
 0x342   : > { %v2963_v6 = vadd.f32 %v2871_v42, %v2685_v38  ;;  %v2596_v47 = vpop.f32.mrf.mxu1  ;;  %v7925_v22 = vpop.f32.mrf.mxu3 }
 0x343   : > { %v2686_v25 = vadd.f32 %v2596_v47, %v2408_v57  ;;  %v2409_v47 = vadd.f32 %v7611_v4, %v7517_v3  ;;  %v2458_v3 = vld [vmem:[#allocation2 + $0x129] sm:$0xff] }
 0x344   : > { %v6411_v1 = vpop.eup %6410  ;;  %v2999_v44 = vadd.f32 %v7876_v56, %v2963_v6  ;;  %v3176_v21 = vld [vmem:[#allocation3 + $0x19] sm:$0xff]  ;;  %v7927_v42 = vpop.f32.mrf.mxu0 }
 0x345   : > { %v7915_v55 = vld [vmem:[#allocation3 + $0x18] sm:$0xff]  ;;  %3109 = vst.msk [vmem:[#allocation3 + $0x21] sm:$0xff] %vm3061_vm3, %v6411_v1  ;;  %6016 = vmatmul.msk.f32.gmra.mxu3 %vm3061_vm3, %v3176_v21  ;;  %5963 = vmatmul.msk.f32.gmra.mxu1 %vm476_vm1, %v2456_v46 }
 0x346   : > { %6048 = vmatmul.msk.f32.gmra.mxu0 %vm3061_vm3, %v7915_v55  ;;  %6412 = vtanh.f32 %v2999_v44  ;;  %5999 = vmatmul.msk.f32.gmra.mxu2 %vm476_vm1, %v2734_v31  ;;  %v2736_v4 = vld [vmem:[#allocation2 + $0x12a] sm:$0xff] }
 0x349   : > { %v2874_v9 = vpop.f32.mrf.mxu2 }
 0x34a   : > { %v2964_v60 = vadd.f32 %v2874_v9, %v2686_v25  ;;  %v2599_v38 = vpop.f32.mrf.mxu1  ;;  %v7940_v9 = vpop.f32.mrf.mxu3 }
 0x34b   : > { %v2687_v44 = vadd.f32 %v2599_v38, %v2409_v47  ;;  %v2410_v38 = vadd.f32 %v7625_v58, %v7528_v51  ;;  %v2459_v51 = vld [vmem:[#allocation2 + $0x139] sm:$0xff] }
 0x34c   : > { %v6413_v21 = vpop.eup %6412  ;;  %v3000_v6 = vadd.f32 %v7876_v56, %v2964_v60  ;;  %v3177_v1 = vld [vmem:[#allocation3 + $0x21] sm:$0xff]  ;;  %v2737_v58 = vld [vmem:[#allocation2 + $0x13a] sm:$0xff] }
 0x34d   : > { %v7930_v48 = vld [vmem:[#allocation3 + $0x20] sm:$0xff]  ;;  %3110 = vst.msk [vmem:[#allocation3 + $0x31] sm:$0xff] %vm3061_vm3, %v6413_v21  ;;  %6017 = vmatmul.msk.f32.gmra.mxu3 %vm3061_vm3, %v3177_v1  ;;  %5964 = vmatmul.msk.f32.gmra.mxu1 %vm476_vm1, %v2457_v62 }
 0x34e   : > { %6049 = vmatmul.msk.f32.gmra.mxu0 %vm3061_vm3, %v7930_v48  ;;  %6414 = vtanh.f32 %v3000_v6  ;;  %6000 = vmatmul.msk.f32.gmra.mxu2 %vm476_vm1, %v2735_v19  ;;  %v7951_v6 = vpop.f32.mrf.mxu0 }
 0x34f   : > { %9350 = vst [vmem:[#allocation21_spill] sm:$0xff] %v7951_v6 }
 0x351   : > { %v2877_v46 = vpop.f32.mrf.mxu2 }
 0x352   : > { %v2965_v31 = vadd.f32 %v2877_v46, %v2687_v44  ;;  %v2602_v57 = vpop.f32.mrf.mxu1 }
 0x353   : > { %v2688_v62 = vadd.f32 %v2602_v57, %v2410_v38  ;;  %v2411_v57 = vadd.f32 %v7642_v2, %v7539_v18  ;;  %v2460_v18 = vld [vmem:[#allocation2 + $0x141] sm:$0xff] }
 0x354   : > { %v6415_v25 = vpop.eup %6414  ;;  %v3001_v60 = vadd.f32 %v7876_v56, %v2965_v31  ;;  %v3178_v21 = vld [vmem:[#allocation3 + $0x31] sm:$0xff] }
 0x355   : > { %v7943_v1 = vld [vmem:[#allocation3 + $0x30] sm:$0xff]  ;;  %3111 = vst.msk [vmem:[#allocation3 + $0x39] sm:$0xff] %vm3061_vm3, %v6415_v25  ;;  %6018 = vmatmul.msk.f32.gmra.mxu3 %vm3061_vm3, %v3178_v21  ;;  %5965 = vmatmul.msk.f32.gmra.mxu1 %vm476_vm1, %v2458_v3 }
 0x356   : > { %6050 = vmatmul.msk.f32.gmra.mxu0 %vm3061_vm3, %v7943_v1  ;;  %6416 = vtanh.f32 %v3001_v60  ;;  %6001 = vmatmul.msk.f32.gmra.mxu2 %vm476_vm1, %v2736_v4  ;;  %v7964_v60 = vpop.f32.mrf.mxu3  ;;  %v7968_v3 = vpop.f32.mrf.mxu0  ;;  %v2738_v2 = vld [vmem:[#allocation2 + $0x142] sm:$0xff] }
 0x359   : > { %v2880_v19 = vpop.f32.mrf.mxu2 }
 0x35a   : > { %v2966_v47 = vadd.f32 %v2880_v19, %v2688_v62  ;;  %v2605_v44 = vpop.f32.mrf.mxu1 }
 0x35b   : > { %v2689_v4 = vadd.f32 %v2605_v44, %v2411_v57  ;;  %v2412_v44 = vadd.f32 %v7655_v45, %v7553_v39 }
 0x35c   : > { %v6417_v46 = vpop.eup %6416  ;;  %v3002_v31 = vadd.f32 %v7876_v56, %v2966_v47  ;;  %v3179_v25 = vld [vmem:[#allocation3 + $0x39] sm:$0xff] }
 0x35d   : > { %v7956_v21 = vld [vmem:[#allocation3 + $0x38] sm:$0xff]  ;;  %3112 = vst.msk [vmem:[#allocation3 + $0x49] sm:$0xff] %vm3061_vm3, %v6417_v46  ;;  %6019 = vmatmul.msk.f32.gmra.mxu3 %vm3061_vm3, %v3179_v25  ;;  %5966 = vmatmul.msk.f32.gmra.mxu1 %vm476_vm1, %v2459_v51 }
 0x35e   : > { %6051 = vmatmul.msk.f32.gmra.mxu0 %vm3061_vm3, %v7956_v21  ;;  %6418 = vtanh.f32 %v3002_v31  ;;  %6002 = vmatmul.msk.f32.gmra.mxu2 %vm476_vm1, %v2737_v58  ;;  %v7981_v31 = vpop.f32.mrf.mxu3  ;;  %v7983_v57 = vpop.f32.mrf.mxu0 }
 0x361   : > { %v2883_v38 = vpop.f32.mrf.mxu2 }
 0x362   : > { %v2967_v62 = vadd.f32 %v2883_v38, %v2689_v4  ;;  %v2608_v19 = vpop.f32.mrf.mxu1 }
 0x363   : > { %v2690_v51 = vadd.f32 %v2608_v19, %v2412_v44  ;;  %v2461_v19 = vld [vmem:[#allocation2 + $0x151] sm:$0xff] }
 0x364   : > { %v6419_v47 = vpop.eup %6418  ;;  %v3003_v46 = vadd.f32 %v7876_v56, %v2967_v62  ;;  %v3180_v25 = vld [vmem:[#allocation3 + $0x49] sm:$0xff] }
 0x365   : > { %v7971_v6 = vld [vmem:[#allocation3 + $0x48] sm:$0xff]  ;;  %3113 = vst.msk [vmem:[#allocation3 + $0x51] sm:$0xff] %vm3061_vm3, %v6419_v47  ;;  %6020 = vmatmul.msk.f32.gmra.mxu3 %vm3061_vm3, %v3180_v25  ;;  %5967 = vmatmul.msk.f32.gmra.mxu1 %vm476_vm1, %v2460_v18  ;;  %v2134_v47 = vadd.f32 %v7677_v35, %v7551_v40 }
 0x366   : > { %6052 = vmatmul.msk.f32.gmra.mxu0 %vm3061_vm3, %v7971_v6  ;;  %6420 = vtanh.f32 %v3003_v46  ;;  %6003 = vmatmul.msk.f32.gmra.mxu2 %vm476_vm1, %v2738_v2  ;;  %v2739_v46 = vld [vmem:[#allocation2 + $0x152] sm:$0xff]  ;;  %v7997_v2 = vpop.f32.mrf.mxu3 }
 0x367   : > { %v2413_v18 = vadd.f32 %v7668_v24, %v2134_v47 }
 0x369   : > { %v2886_v58 = vpop.f32.mrf.mxu2 }
 0x36a   : > { %v2968_v4 = vadd.f32 %v2886_v58, %v2690_v51  ;;  %v2611_v38 = vpop.f32.mrf.mxu1 }
 0x36b   : > { %v2691_v40 = vadd.f32 %v2611_v38, %v2413_v18  ;;  %v2462_v38 = vld [vmem:[#allocation2 + $0x159] sm:$0xff] }
 0x36c   : > { %v6421_v62 = vpop.eup %6420  ;;  %v3004_v25 = vadd.f32 %v7876_v56, %v2968_v4  ;;  %v3181_v39 = vld [vmem:[#allocation3 + $0x51] sm:$0xff]  ;;  %v2135_v4 = vadd.f32 %v7688_v10, %v7565_v33 }
 0x36d   : > { %v7988_v45 = vld [vmem:[#allocation3 + $0x50] sm:$0xff]  ;;  %3114 = vst.msk [vmem:[#allocation3 + $0x61] sm:$0xff] %vm3061_vm3, %v6421_v62  ;;  %6021 = vmatmul.msk.f32.gmra.mxu3 %vm3061_vm3, %v3181_v39  ;;  %5968 = vmatmul.msk.f32.gmra.mxu1 %vm476_vm1, %v2461_v19  ;;  %v8001_v62 = vpop.f32.mrf.mxu0 }
 0x36e   : > { %6053 = vmatmul.msk.f32.gmra.mxu0 %vm3061_vm3, %v7988_v45  ;;  %6422 = vtanh.f32 %v3004_v25  ;;  %6004 = vmatmul.msk.f32.gmra.mxu2 %vm476_vm1, %v2739_v46  ;;  %9351 = vst [vmem:[#allocation23_spill] sm:$0xff] %v8001_v62  ;;  %v2740_v25 = vld [vmem:[#allocation2 + $0x15a] sm:$0xff]  ;;  %v2414_v19 = vadd.f32 %v7680_v43, %v2135_v4  ;;  %v2463_v43 = vld [vmem:[#allocation2 + $0x169] sm:$0xff] }
 0x371   : > { %v2889_v35 = vpop.f32.mrf.mxu2 }
 0x372   : > { %v2969_v44 = vadd.f32 %v2889_v35, %v2691_v40  ;;  %v2614_v51 = vpop.f32.mrf.mxu1  ;;  %v2136_v35 = vadd.f32 %v7699_v41, %v7575_v29 }
 0x373   : > { %v2692_v33 = vadd.f32 %v2614_v51, %v2414_v19  ;;  %v2741_v51 = vld [vmem:[#allocation2 + $0x16a] sm:$0xff] }
 0x374   : > { %v6423_v58 = vpop.eup %6422  ;;  %v3005_v39 = vadd.f32 %v7876_v56, %v2969_v44  ;;  %v3182_v24 = vld [vmem:[#allocation3 + $0x61] sm:$0xff]  ;;  %v8015_v44 = vpop.f32.mrf.mxu3  ;;  %v2415_v4 = vadd.f32 %v7692_v13, %v2136_v35 }
 0x375   : > { %v8004_v47 = vld [vmem:[#allocation3 + $0x60] sm:$0xff]  ;;  %3115 = vst.msk [vmem:[#allocation3 + $0x69] sm:$0xff] %vm3061_vm3, %v6423_v58  ;;  %6022 = vmatmul.msk.f32.gmra.mxu3 %vm3061_vm3, %v3182_v24  ;;  %5969 = vmatmul.msk.f32.gmra.mxu1 %vm476_vm1, %v2462_v38 }
 0x376   : > { %6054 = vmatmul.msk.f32.gmra.mxu0 %vm3061_vm3, %v8004_v47  ;;  %6424 = vtanh.f32 %v3005_v39  ;;  %6005 = vmatmul.msk.f32.gmra.mxu2 %vm476_vm1, %v2740_v25  ;;  %v8025_v39 = vpop.f32.mrf.mxu0  ;;  %v2464_v13 = vld [vmem:[#allocation2 + $0x171] sm:$0xff] }
 0x379   : > { %v2892_v10 = vpop.f32.mrf.mxu2 }
 0x37a   : > { %v2970_v46 = vadd.f32 %v2892_v10, %v2692_v33  ;;  %v2617_v18 = vpop.f32.mrf.mxu1  ;;  %v2137_v33 = vadd.f32 %v7708_v30, %v7587_v26 }
 0x37b   : > { %v2693_v29 = vadd.f32 %v2617_v18, %v2415_v4  ;;  %v2742_v18 = vld [vmem:[#allocation2 + $0x172] sm:$0xff] }
 0x37c   : > { %v6425_v40 = vpop.eup %6424  ;;  %v3006_v58 = vadd.f32 %v7876_v56, %v2970_v46  ;;  %v3183_v24 = vld [vmem:[#allocation3 + $0x69] sm:$0xff]  ;;  %v2416_v35 = vadd.f32 %v7701_v5, %v2137_v33 }
 0x37d   : > { %v8018_v62 = vld [vmem:[#allocation3 + $0x68] sm:$0xff]  ;;  %3116 = vst.msk [vmem:[#allocation3 + $0x79] sm:$0xff] %vm3061_vm3, %v6425_v40  ;;  %6023 = vmatmul.msk.f32.gmra.mxu3 %vm3061_vm3, %v3183_v24  ;;  %5970 = vmatmul.msk.f32.gmra.mxu1 %vm476_vm1, %v2463_v43 }
 0x37e   : > { %6055 = vmatmul.msk.f32.gmra.mxu0 %vm3061_vm3, %v8018_v62  ;;  %6426 = vtanh.f32 %v3006_v58  ;;  %6006 = vmatmul.msk.f32.gmra.mxu2 %vm476_vm1, %v2741_v51  ;;  %v8039_v58 = vpop.f32.mrf.mxu3  ;;  %v8043_v26 = vpop.f32.mrf.mxu0 }
 0x381   : > { %v2895_v41 = vpop.f32.mrf.mxu2 }
 0x382   : > { %v2971_v38 = vadd.f32 %v2895_v41, %v2693_v29  ;;  %v2620_v25 = vpop.f32.mrf.mxu1  ;;  %v2138_v29 = vadd.f32 %v7719_v49, %v7599_v34  ;;  %v6078_v34 = vld [vmem:[%s9189_s5 + $0x20] sm:$0xff]  ;;  %v6112_v49 = vld [vmem:[%s9189_s5 + $0x30] sm:$0xff] }
 0x383   : > { %v2694_v30 = vadd.f32 %v2620_v25, %v2416_v35  ;;  %3773 = vmatpush.msrb.mxu1 %v6078_v34  ;;  %4049 = vmatpush.msrb.mxu2 %v6112_v49 }
 0x384   : > { %v6427_v19 = vpop.eup %6426  ;;  %v3007_v10 = vadd.f32 %v7876_v56, %v2971_v38  ;;  %v3184_v46 = vld [vmem:[#allocation3 + $0x79] sm:$0xff]  ;;  %v2417_v25 = vadd.f32 %v7712_v27, %v2138_v29  ;;  %v2467_v29 = vld [vmem:[#allocation2 + $0x199] sm:$0xff] }
 0x385   : > { %v8032_v40 = vld [vmem:[#allocation3 + $0x78] sm:$0xff]  ;;  %3117 = vst.msk [vmem:[#allocation3 + $0x81] sm:$0xff] %vm3061_vm3, %v6427_v19  ;;  %6024 = vmatmul.msk.f32.gmra.mxu3 %vm3061_vm3, %v3184_v46  ;;  %5971 = vmatmul.msk.f32.gmra.mxu1 %vm476_vm1, %v2464_v13 }
 0x386   : > { %6056 = vmatmul.msk.f32.gmra.mxu0 %vm3061_vm3, %v8032_v40  ;;  %6428 = vtanh.f32 %v3007_v10  ;;  %6007 = vmatmul.msk.f32.gmra.mxu2 %vm476_vm1, %v2742_v18  ;;  %v8065_v19 = vpop.f32.mrf.mxu3  ;;  %v8067_v10 = vpop.f32.mrf.mxu0 }
 0x389   : > { %v2898_v24 = vpop.f32.mrf.mxu2 }
 0x38a   : > { %v2972_v43 = vadd.f32 %v2898_v24, %v2694_v30  ;;  %v2623_v51 = vpop.f32.mrf.mxu1 }
 0x38b   : > { %v2695_v33 = vadd.f32 %v2623_v51, %v2417_v25  ;;  %v2140_v25 = vadd.f32 %v7740_v16, %v7627_v32 }
 0x38c   : > { %v6429_v4 = vpop.eup %6428  ;;  %v3008_v41 = vadd.f32 %v7876_v56, %v2972_v43  ;;  %v3185_v5 = vld [vmem:[#allocation3 + $0x81] sm:$0xff] }
 0x38d   : > { %v8048_v38 = vld [vmem:[#allocation3 + $0x80] sm:$0xff]  ;;  %3118 = vst.msk [vmem:[#allocation3 + $0x91] sm:$0xff] %vm3061_vm3, %v6429_v4  ;;  %6025 = vmatmul.msk.f32.gmra.mxu3 %vm3061_vm3, %v3185_v5  ;;  %5972 = vmatmul.msk.f32.gmra.mxu1 %vm476_vm1, %v7616_v11  ;;  %v2419_v32 = vadd.f32 %v7733_v12, %v2140_v25  ;;  %v2142_v25 = vadd.f32 %v7784_v23, %v7653_v7 }
 0x38e   : > { %6057 = vmatmul.msk.f32.gmra.mxu0 %vm3061_vm3, %v8048_v38  ;;  %6430 = vtanh.f32 %v3008_v41  ;;  %6008 = vmatmul.msk.f32.gmra.mxu2 %vm476_vm1, %v7634_v61  ;;  %v2139_v61 = vadd.f32 %v7729_v50, %v7614_v54  ;;  %v8083_v43 = vpop.f32.mrf.mxu3  ;;  %v2745_v41 = vld [vmem:[#allocation2 + $0x19a] sm:$0xff] }
 0x390   : > { %v2418_v24 = vadd.f32 %v7722_v63, %v2139_v61  ;;  %v8087_v63 = vpop.f32.mrf.mxu0 }
 0x391   : > { %v2901_v27 = vpop.f32.mrf.mxu2 }
 0x392   : > { %v2973_v11 = vadd.f32 %v2901_v27, %v2695_v33  ;;  %v2626_v46 = vpop.f32.mrf.mxu1 }
 0x393   : > { %v2696_v54 = vadd.f32 %v2626_v46, %v2418_v24  ;;  %v2468_v46 = vld [vmem:[#allocation2 + $0x1a1] sm:$0xff] }
 0x394   : > { %v6431_v13 = vpop.eup %6430  ;;  %v3009_v18 = vadd.f32 %v7876_v56, %v2973_v11  ;;  %v3186_v35 = vld [vmem:[#allocation3 + $0x91] sm:$0xff] }
 0x395   : > { %v8072_v30 = vld [vmem:[#allocation3 + $0x90] sm:$0xff]  ;;  %3119 = vst.msk [vmem:[#allocation3 + $0x99] sm:$0xff] %vm3061_vm3, %v6431_v13  ;;  %6026 = vmatmul.msk.f32.gmra.mxu3 %vm3061_vm3, %v3186_v35  ;;  %5973 = vmatmul.msk.f32.gmra.mxu1 %vm476_vm1, %v7629_v59 }
 0x396   : > { %6058 = vmatmul.msk.f32.gmra.mxu0 %vm3061_vm3, %v8072_v30  ;;  %6432 = vtanh.f32 %v3009_v18  ;;  %6009 = vmatmul.msk.f32.gmra.mxu2 %vm476_vm1, %v7644_v8  ;;  %v6146_v8 = vld [vmem:[%s9189_s5 + $0x40] sm:$0xff]  ;;  %v2141_v18 = vadd.f32 %v7749_v36, %v7640_v0  ;;  %v8104_v35 = vpop.f32.mrf.mxu3 }
 0x397   : > { %4325 = vmatpush.msrb.mxu3 %v6146_v8  ;;  %v2746_v13 = vld [vmem:[#allocation2 + $0x1a2] sm:$0xff]  ;;  %v2421_v8 = vadd.f32 %v7755_v15, %v2142_v25  ;;  %v9355_v25 = vld [vmem:[#allocation18_spill] sm:$0xff] }
 0x399   : > { %v2904_v50 = vpop.f32.mrf.mxu2 }
 0x39a   : > { %v2974_v51 = vadd.f32 %v2904_v50, %v2696_v54  ;;  %v2629_v4 = vpop.f32.mrf.mxu1  ;;  %v2420_v50 = vadd.f32 %v7742_v20, %v2141_v18 }
 0x39b   : > { %v2697_v16 = vadd.f32 %v2629_v4, %v2419_v32 }
 0x39c   : > { %v6433_v5 = vpop.eup %6432  ;;  %v3010_v34 = vadd.f32 %v7876_v56, %v2974_v51  ;;  %v3187_v59 = vld [vmem:[#allocation3 + $0x99] sm:$0xff]  ;;  %v8117_v51 = vpop.f32.mrf.mxu0 }
 0x39d   : > { %v8090_v49 = vld [vmem:[#allocation3 + $0x98] sm:$0xff]  ;;  %3120 = vst.msk [vmem:[#allocation3 + $0xa9] sm:$0xff] %vm3061_vm3, %v6433_v5  ;;  %6027 = vmatmul.msk.f32.gmra.mxu3 %vm3061_vm3, %v3187_v59  ;;  %5974 = vmatmul.msk.f32.gmra.mxu1 %vm476_vm1, %v2467_v29 }
 0x39e   : > { %6059 = vmatmul.msk.f32.gmra.mxu0 %vm3061_vm3, %v8090_v49  ;;  %6434 = vtanh.f32 %v3010_v34  ;;  %6010 = vmatmul.msk.f32.gmra.mxu2 %vm476_vm1, %v2745_v41  ;;  %v3627_v41 = vld [vmem:[#allocation3 + $0x2] sm:$0xff]  ;;  %v8134_v32 = vpop.f32.mrf.mxu3 }
 0x3a1   : > { %v2907_v33 = vpop.f32.mrf.mxu2 }
 0x3a2   : > { %v2975_v27 = vadd.f32 %v2907_v33, %v2697_v16  ;;  %v2632_v11 = vpop.f32.mrf.mxu1 }
 0x3a3   : > { %v2698_v0 = vadd.f32 %v2632_v11, %v2420_v50  ;;  %v3628_v11 = vld [vmem:[#allocation3 + $0xa] sm:$0xff] }
 0x3a4   : > { %v6435_v61 = vpop.eup %6434  ;;  %v3011_v12 = vadd.f32 %v7876_v56, %v2975_v27  ;;  %v8107_v24 = vld [vmem:[#allocation3 + $0xa9] sm:$0xff]  ;;  %v8139_v7 = vpop.f32.mrf.mxu0 }
 0x3a5   : > { %v8109_v54 = vld [vmem:[#allocation3 + $0xa8] sm:$0xff]  ;;  %3121 = vst.msk [vmem:[#allocation3 + $0xb1] sm:$0xff] %vm3061_vm3, %v6435_v61  ;;  %6028 = vmatmul.msk.f32.gmra.mxu3 %vm3061_vm3, %v8107_v24  ;;  %5975 = vmatmul.msk.f32.gmra.mxu1 %vm476_vm1, %v2468_v46 }
 0x3a6   : > { %6060 = vmatmul.msk.f32.gmra.mxu0 %vm3061_vm3, %v8109_v54  ;;  %6436 = vtanh.f32 %v3011_v12  ;;  %6011 = vmatmul.msk.f32.gmra.mxu2 %vm476_vm1, %v2746_v13  ;;  %9352 = vst [vmem:[#allocation26_spill] sm:$0xff] %v8139_v7  ;;  %v2143_v13 = vadd.f32 %v7825_v37, %v7662_v53  ;;  %v8157_v53 = vpop.f32.mrf.mxu3 }
 0x3a7   : > { %9353 = vst [vmem:[#allocation25_spill] sm:$0xff] %v8157_v53 }
 0x3a9   : > { %v2910_v36 = vpop.f32.mrf.mxu2 }
 0x3aa   : > { %v2976_v4 = vadd.f32 %v2910_v36, %v2698_v0  ;;  %v2635_v29 = vpop.f32.mrf.mxu1 }
 0x3ab   : > { %v2699_v23 = vadd.f32 %v2635_v29, %v2421_v8  ;;  %v2144_v29 = vadd.f32 %v7857_v28, %v7671_v52 }
 0x3ac   : > { %v6437_v5 = vpop.eup %6436  ;;  %v3012_v34 = vadd.f32 %v7876_v56, %v2976_v4  ;;  %v8124_v59 = vld [vmem:[#allocation3 + $0xb1] sm:$0xff]  ;;  %v3534_v12 = vpop.f32.mrf.mxu0 }
 0x3ad   : > { %v8126_v20 = vld [vmem:[#allocation3 + $0xb0] sm:$0xff]  ;;  %3122 = vst.msk [vmem:[#allocation3 + $0xc1] sm:$0xff] %vm3061_vm3, %v6437_v5  ;;  %6029 = vmatmul.msk.f32.gmra.mxu3 %vm3061_vm3, %v8124_v59  ;;  %6080 = vmatmul.msk.f32.vlgmr.msrb.gmra.mxu1 %vm3061_vm3, %v3627_v41 }
 0x3ae   : > { %6061 = vmatmul.msk.f32.gmra.mxu0 %vm3061_vm3, %v8126_v20  ;;  %6438 = vtanh.f32 %v3012_v34  ;;  %6114 = vmatmul.msk.f32.vlgmr.msrb.gmra.mxu2 %vm3061_vm3, %v7915_v55  ;;  %v2422_v55 = vadd.f32 %v7792_v17, %v2143_v13  ;;  %v2423_v34 = vadd.f32 %v9355_v25, %v2144_v29  ;;  %v9357_v13 = vld [vmem:[#allocation16_spill] sm:$0xff] }
 0x3b1   : > { %v2913_v16 = vpop.f32.mrf.mxu2 }
 0x3b2   : > { %v2977_v33 = vadd.f32 %v2913_v16, %v2699_v23  ;;  %v2638_v27 = vpop.f32.mrf.mxu1 }
 0x3b3   : > { %v2700_v37 = vadd.f32 %v2638_v27, %v2422_v55 }
 0x3b4   : > { %v6439_v46 = vpop.eup %6438  ;;  %v3013_v15 = vadd.f32 %v7876_v56, %v2977_v33  ;;  %v8144_v61 = vld [vmem:[#allocation3 + $0xc1] sm:$0xff] }
 0x3b5   : > { %v8146_v18 = vld [vmem:[#allocation3 + $0xc0] sm:$0xff]  ;;  %3123 = vst.msk [vmem:[#allocation3 + $0xc9] sm:$0xff] %vm3061_vm3, %v6439_v46  ;;  %6030 = vmatmul.msk.f32.gmra.mxu3 %vm3061_vm3, %v8144_v61  ;;  %6081 = vmatmul.msk.f32.gmra.mxu1 %vm3061_vm3, %v3628_v11  ;;  %v9356_v46 = vld [vmem:[#allocation5_spill] sm:$0xff] }
 0x3b6   : > { %6062 = vmatmul.msk.f32.gmra.mxu0 %vm3061_vm3, %v8146_v18  ;;  %6440 = vtanh.f32 %v3013_v15  ;;  %6115 = vmatmul.msk.f32.gmra.mxu2 %vm3061_vm3, %v7930_v48  ;;  %v8171_v48 = vld [vmem:[#allocation3 + $0x1a] sm:$0xff]  ;;  %v2145_v15 = vadd.f32 %v9357_v13, %v9356_v46 }
 0x3b9   : > { %v2916_v50 = vpop.f32.mrf.mxu2 }
 0x3ba   : > { %v2978_v0 = vadd.f32 %v2916_v50, %v2700_v37  ;;  %v2641_v36 = vpop.f32.mrf.mxu1 }
 0x3bb   : > { %v2701_v52 = vadd.f32 %v2641_v36, %v2423_v34 }
 0x3bc   : > { %v6441_v4 = vpop.eup %6440  ;;  %v3014_v41 = vadd.f32 %v7876_v56, %v2978_v0  ;;  %v8162_v17 = vld [vmem:[#allocation3 + $0xc9] sm:$0xff] }
 0x3bd   : > { %9354 = vst [vmem:[#allocation27_spill] sm:$0xff] %v8162_v17  ;;  %v8164_v5 = vld [vmem:[#allocation3 + $0xc8] sm:$0xff]  ;;  %6031 = vmatmul.msk.f32.gmra.mxu3 %vm3061_vm3, %v8162_v17  ;;  %6082 = vmatmul.msk.f32.gmra.mxu1 %vm3061_vm3, %v8171_v48  ;;  %v3325_v28 = vpop.f32.mrf.mxu3 }
 0x3be   : > { %3124 = vst.msk [vmem:[#allocation3 + $0xd9] sm:$0xff] %vm3061_vm3, %v6441_v4  ;;  %6063 = vmatmul.msk.f32.gmra.mxu0 %vm3061_vm3, %v8164_v5  ;;  %6442 = vtanh.f32 %v3014_v41  ;;  %6116 = vmatmul.msk.f32.gmra.mxu2 %vm3061_vm3, %v7943_v1  ;;  %v8178_v8 = vadd.f32 %v3534_v12, %v3325_v28  ;;  %v8192_v1 = vld [vmem:[#allocation3 + $0x22] sm:$0xff] }
 0x3bf   : > { %v9359_v12 = vld [vmem:[#allocation19_spill] sm:$0xff] }
 0x3c0   : > { %v2424_v0 = vadd.f32 %v9359_v12, %v2145_v15 }
 0x3c1   : > { %v2919_v23 = vpop.f32.mrf.mxu2 }
 0x3c2   : > { %v2979_v16 = vadd.f32 %v2919_v23, %v2701_v52  ;;  %v2644_v27 = vpop.f32.mrf.mxu1  ;;  %v9360_v23 = vld [vmem:[#allocation4_spill] sm:$0xff] }
 0x3c3   : > { %v3537_v33 = vpop.f32.mrf.mxu0  ;;  %v2702_v36 = vadd.f32 %v2644_v27, %v2424_v0 }
 0x3c4   : > { %v6443_v11 = vpop.eup %6442  ;;  %v3015_v55 = vadd.f32 %v7876_v56, %v2979_v16  ;;  %v2146_v16 = vadd.f32 %v7910_v14, %v9360_v23 }
 0x3c5   : > { %v8183_v37 = vld [vmem:[#allocation3 + $0xd9] sm:$0xff]  ;;  %3125 = vst.msk [vmem:[#allocation3 + $0xe1] sm:$0xff] %vm3061_vm3, %v6443_v11  ;;  %6083 = vmatmul.msk.f32.gmra.mxu1 %vm3061_vm3, %v8192_v1 }
 0x3c6   : > { %9358 = vst [vmem:[#allocation24_spill] sm:$0xff] %v8183_v37  ;;  %v8185_v50 = vld [vmem:[#allocation3 + $0xd8] sm:$0xff]  ;;  %6032 = vmatmul.msk.f32.gmra.mxu3 %vm3061_vm3, %v8183_v37  ;;  %6444 = vtanh.f32 %v3015_v55  ;;  %6117 = vmatmul.msk.f32.gmra.mxu2 %vm3061_vm3, %v7956_v21 }
 0x3c7   : > { %6064 = vmatmul.msk.f32.gmra.mxu0 %vm3061_vm3, %v8185_v50  ;;  %v8213_v21 = vld [vmem:[#allocation3 + $0x32] sm:$0xff] }
 0x3c8   : > { %v3328_v4 = vpop.f32.mrf.mxu3 }
 0x3c9   : > { %v8199_v29 = vadd.f32 %v3537_v33, %v3328_v4  ;;  %v2922_v41 = vpop.f32.mrf.mxu2  ;;  %v9362_v33 = vld [vmem:[#allocation20_spill] sm:$0xff] }
 0x3ca   : > { %v2980_v25 = vadd.f32 %v2922_v41, %v2702_v36  ;;  %v2647_v52 = vpop.f32.mrf.mxu1  ;;  %v2425_v27 = vadd.f32 %v9362_v33, %v2146_v16 }
 0x3cb   : > { %v3540_v34 = vpop.f32.mrf.mxu0 }
 0x3cc   : > { %v6445_v28 = vpop.eup %6444  ;;  %v3016_v11 = vadd.f32 %v7876_v56, %v2980_v25  ;;  %v8204_v46 = vld [vmem:[#allocation3 + $0xe1] sm:$0xff]  ;;  %v2703_v14 = vadd.f32 %v2647_v52, %v2425_v27 }
 0x3cd   : > { %9361 = vst [vmem:[#allocation30_spill] sm:$0xff] %v8204_v46  ;;  %v8206_v13 = vld [vmem:[#allocation3 + $0xe0] sm:$0xff]  ;;  %6084 = vmatmul.msk.f32.gmra.mxu1 %vm3061_vm3, %v8213_v21 }
 0x3ce   : > { %3126 = vst.msk [vmem:[#allocation3 + $0xf1] sm:$0xff] %vm3061_vm3, %v6445_v28  ;;  %6033 = vmatmul.msk.f32.gmra.mxu3 %vm3061_vm3, %v8204_v46  ;;  %6446 = vtanh.f32 %v3016_v11  ;;  %6118 = vmatmul.msk.f32.gmra.mxu2 %vm3061_vm3, %v7971_v6  ;;  %v9363_v25 = vld [vmem:[#allocation6_spill] sm:$0xff] }
 0x3cf   : > { %6065 = vmatmul.msk.f32.gmra.mxu0 %vm3061_vm3, %v8206_v13  ;;  %v2147_v28 = vadd.f32 %v7925_v22, %v9363_v25  ;;  %v8234_v6 = vld [vmem:[#allocation3 + $0x3a] sm:$0xff]  ;;  %v9366_v25 = vld [vmem:[#allocation8_spill] sm:$0xff] }
 0x3d0   : > { %v3331_v15 = vpop.f32.mrf.mxu3 }
 0x3d1   : > { %v8220_v55 = vadd.f32 %v3540_v34, %v3331_v15  ;;  %v2925_v12 = vpop.f32.mrf.mxu2  ;;  %v9365_v34 = vld [vmem:[#allocation22_spill] sm:$0xff] }
 0x3d2   : > { %v2981_v0 = vadd.f32 %v2925_v12, %v2703_v14  ;;  %v2650_v4 = vpop.f32.mrf.mxu1  ;;  %v2426_v52 = vadd.f32 %v9365_v34, %v2147_v28 }
 0x3d3   : > { %v3543_v36 = vpop.f32.mrf.mxu0 }
 0x3d4   : > { %v6447_v41 = vpop.eup %6446  ;;  %v3017_v23 = vadd.f32 %v7876_v56, %v2981_v0  ;;  %v2704_v22 = vadd.f32 %v2650_v4, %v2426_v52 }
 0x3d5   : > { %v8225_v16 = vld [vmem:[#allocation3 + $0xf1] sm:$0xff]  ;;  %3127 = vst.msk [vmem:[#allocation3 + $0xf9] sm:$0xff] %vm3061_vm3, %v6447_v41  ;;  %6085 = vmatmul.msk.f32.gmra.mxu1 %vm3061_vm3, %v8234_v6 }
 0x3d6   : > { %9364 = vst [vmem:[#allocation29_spill] sm:$0xff] %v8225_v16  ;;  %v8227_v11 = vld [vmem:[#allocation3 + $0xf0] sm:$0xff]  ;;  %6034 = vmatmul.msk.f32.gmra.mxu3 %vm3061_vm3, %v8225_v16  ;;  %6448 = vtanh.f32 %v3017_v23  ;;  %6119 = vmatmul.msk.f32.gmra.mxu2 %vm3061_vm3, %v7988_v45  ;;  %v2148_v16 = vadd.f32 %v7940_v9, %v9366_v25  ;;  %v9368_v25 = vld [vmem:[#allocation7_spill] sm:$0xff] }
 0x3d7   : > { %6066 = vmatmul.msk.f32.gmra.mxu0 %vm3061_vm3, %v8227_v11  ;;  %v8255_v45 = vld [vmem:[#allocation3 + $0x4a] sm:$0xff] }
 0x3d8   : > { %v3334_v33 = vpop.f32.mrf.mxu3 }
 0x3d9   : > { %v8241_v27 = vadd.f32 %v3543_v36, %v3334_v33  ;;  %v2928_v14 = vpop.f32.mrf.mxu2  ;;  %v2427_v36 = vadd.f32 %v7927_v42, %v2148_v16 }
 0x3da   : > { %v2982_v15 = vadd.f32 %v2928_v14, %v2704_v22  ;;  %v2653_v0 = vpop.f32.mrf.mxu1 }
 0x3db   : > { %v3546_v12 = vpop.f32.mrf.mxu0  ;;  %v2705_v9 = vadd.f32 %v2653_v0, %v2427_v36 }
 0x3dc   : > { %v6449_v41 = vpop.eup %6448  ;;  %v3018_v28 = vadd.f32 %v7876_v56, %v2982_v15  ;;  %v8246_v23 = vld [vmem:[#allocation3 + $0xf9] sm:$0xff] }
 0x3dd   : > { %9367 = vst [vmem:[#allocation31_spill] sm:$0xff] %v8246_v23  ;;  %v8248_v34 = vld [vmem:[#allocation3 + $0xf8] sm:$0xff]  ;;  %6086 = vmatmul.msk.f32.gmra.mxu1 %vm3061_vm3, %v8255_v45 }
 0x3de   : > { %3128 = vst.msk [vmem:[#allocation3 + $0x109] sm:$0xff] %vm3061_vm3, %v6449_v41  ;;  %6035 = vmatmul.msk.f32.gmra.mxu3 %vm3061_vm3, %v8246_v23  ;;  %6450 = vtanh.f32 %v3018_v28  ;;  %6120 = vmatmul.msk.f32.gmra.mxu2 %vm3061_vm3, %v8004_v47  ;;  %v2149_v23 = vadd.f32 %v7964_v60, %v9368_v25  ;;  %v8276_v47 = vld [vmem:[#allocation3 + $0x52] sm:$0xff] }
 0x3df   : > { %6067 = vmatmul.msk.f32.gmra.mxu0 %vm3061_vm3, %v8248_v34 }
 0x3e0   : > { %v3337_v4 = vpop.f32.mrf.mxu3 }
 0x3e1   : > { %v8262_v52 = vadd.f32 %v3546_v12, %v3337_v4  ;;  %v2931_v22 = vpop.f32.mrf.mxu2  ;;  %v9370_v12 = vld [vmem:[#allocation21_spill] sm:$0xff] }
 0x3e2   : > { %v2983_v33 = vadd.f32 %v2931_v22, %v2705_v9  ;;  %v2656_v15 = vpop.f32.mrf.mxu1  ;;  %v2428_v0 = vadd.f32 %v9370_v12, %v2149_v23 }
 0x3e3   : > { %v3549_v14 = vpop.f32.mrf.mxu0 }
 0x3e4   : > { %v6451_v41 = vpop.eup %6450  ;;  %v3019_v42 = vadd.f32 %v7876_v56, %v2983_v33  ;;  %v2706_v60 = vadd.f32 %v2656_v15, %v2428_v0 }
 0x3e5   : > { %v8267_v16 = vld [vmem:[#allocation3 + $0x109] sm:$0xff]  ;;  %3129 = vst.msk [vmem:[#allocation3 + $0x111] sm:$0xff] %vm3061_vm3, %v6451_v41  ;;  %6087 = vmatmul.msk.f32.gmra.mxu1 %vm3061_vm3, %v8276_v47 }
 0x3e6   : > { %9369 = vst [vmem:[#allocation28_spill] sm:$0xff] %v8267_v16  ;;  %v8269_v28 = vld [vmem:[#allocation3 + $0x108] sm:$0xff]  ;;  %6036 = vmatmul.msk.f32.gmra.mxu3 %vm3061_vm3, %v8267_v16  ;;  %6452 = vtanh.f32 %v3019_v42  ;;  %6121 = vmatmul.msk.f32.gmra.mxu2 %vm3061_vm3, %v8018_v62  ;;  %v9371_v16 = vld [vmem:[#allocation9_spill] sm:$0xff] }
 0x3e7   : > { %6068 = vmatmul.msk.f32.gmra.mxu0 %vm3061_vm3, %v8269_v28  ;;  %v2150_v46 = vadd.f32 %v7981_v31, %v9371_v16  ;;  %v8297_v62 = vld [vmem:[#allocation3 + $0x62] sm:$0xff] }
 0x3e8   : > { %v3340_v36 = vpop.f32.mrf.mxu3 }
 0x3e9   : > { %v8283_v9 = vadd.f32 %v3549_v14, %v3340_v36  ;;  %v2934_v4 = vpop.f32.mrf.mxu2  ;;  %v2429_v14 = vadd.f32 %v7968_v3, %v2150_v46 }
 0x3ea   : > { %v2984_v22 = vadd.f32 %v2934_v4, %v2706_v60  ;;  %v2659_v41 = vpop.f32.mrf.mxu1 }
 0x3eb   : > { %v3552_v33 = vpop.f32.mrf.mxu0  ;;  %v2707_v31 = vadd.f32 %v2659_v41, %v2429_v14 }
 0x3ec   : > { %v6453_v25 = vpop.eup %6452  ;;  %v3020_v23 = vadd.f32 %v7876_v56, %v2984_v22  ;;  %v8288_v42 = vld [vmem:[#allocation3 + $0x111] sm:$0xff] }
 0x3ed   : > { %9372 = vst [vmem:[#allocation34_spill] sm:$0xff] %v8288_v42  ;;  %v8290_v12 = vld [vmem:[#allocation3 + $0x110] sm:$0xff]  ;;  %6088 = vmatmul.msk.f32.gmra.mxu1 %vm3061_vm3, %v8297_v62 }
 0x3ee   : > { %3130 = vst.msk [vmem:[#allocation3 + $0x121] sm:$0xff] %vm3061_vm3, %v6453_v25  ;;  %6037 = vmatmul.msk.f32.gmra.mxu3 %vm3061_vm3, %v8288_v42  ;;  %6454 = vtanh.f32 %v3020_v23  ;;  %6122 = vmatmul.msk.f32.gmra.mxu2 %vm3061_vm3, %v8032_v40  ;;  %v9373_v25 = vld [vmem:[#allocation11_spill] sm:$0xff] }
 0x3ef   : > { %6069 = vmatmul.msk.f32.gmra.mxu0 %vm3061_vm3, %v8290_v12  ;;  %v2151_v42 = vadd.f32 %v7997_v2, %v9373_v25  ;;  %v8318_v40 = vld [vmem:[#allocation3 + $0x6a] sm:$0xff]  ;;  %v9375_v25 = vld [vmem:[#allocation10_spill] sm:$0xff] }
 0x3f0   : > { %v3343_v15 = vpop.f32.mrf.mxu3 }
 0x3f1   : > { %v8304_v16 = vadd.f32 %v3552_v33, %v3343_v15  ;;  %v2937_v0 = vpop.f32.mrf.mxu2  ;;  %v2430_v33 = vadd.f32 %v7983_v57, %v2151_v42 }
 0x3f2   : > { %v2985_v60 = vadd.f32 %v2937_v0, %v2707_v31  ;;  %v2662_v4 = vpop.f32.mrf.mxu1 }
 0x3f3   : > { %v3555_v36 = vpop.f32.mrf.mxu0  ;;  %v2708_v2 = vadd.f32 %v2662_v4, %v2430_v33 }
 0x3f4   : > { %v6455_v22 = vpop.eup %6454  ;;  %v3021_v3 = vadd.f32 %v7876_v56, %v2985_v60 }
 0x3f5   : > { %v8309_v46 = vld [vmem:[#allocation3 + $0x121] sm:$0xff]  ;;  %3131 = vst.msk [vmem:[#allocation3 + $0x129] sm:$0xff] %vm3061_vm3, %v6455_v22  ;;  %6089 = vmatmul.msk.f32.gmra.mxu1 %vm3061_vm3, %v8318_v40 }
 0x3f6   : > { %9374 = vst [vmem:[#allocation33_spill] sm:$0xff] %v8309_v46  ;;  %v8311_v23 = vld [vmem:[#allocation3 + $0x120] sm:$0xff]  ;;  %6038 = vmatmul.msk.f32.gmra.mxu3 %vm3061_vm3, %v8309_v46  ;;  %6456 = vtanh.f32 %v3021_v3  ;;  %6123 = vmatmul.msk.f32.gmra.mxu2 %vm3061_vm3, %v8048_v38  ;;  %v2152_v46 = vadd.f32 %v8015_v44, %v9375_v25  ;;  %v9378_v25 = vld [vmem:[#allocation12_spill] sm:$0xff] }
 0x3f7   : > { %6070 = vmatmul.msk.f32.gmra.mxu0 %vm3061_vm3, %v8311_v23  ;;  %v8339_v38 = vld [vmem:[#allocation3 + $0x7a] sm:$0xff] }
 0x3f8   : > { %v3346_v41 = vpop.f32.mrf.mxu3 }
 0x3f9   : > { %v8325_v14 = vadd.f32 %v3555_v36, %v3346_v41  ;;  %v2940_v31 = vpop.f32.mrf.mxu2  ;;  %v9377_v36 = vld [vmem:[#allocation23_spill] sm:$0xff] }
 0x3fa   : > { %v2986_v15 = vadd.f32 %v2940_v31, %v2708_v2  ;;  %v2665_v60 = vpop.f32.mrf.mxu1  ;;  %v2431_v4 = vadd.f32 %v9377_v36, %v2152_v46  ;;  %v8353_v46 = vld [vmem:[%s9188_s4] ss:$0 sm:$0xff] }
 0x3fb   : > { %v3558_v0 = vpop.f32.mrf.mxu0 }
 0x3fc   : > { %v6457_v22 = vpop.eup %6456  ;;  %v3022_v57 = vadd.f32 %v7876_v56, %v2986_v15  ;;  %v8330_v42 = vld [vmem:[#allocation3 + $0x129] sm:$0xff]  ;;  %v2709_v56 = vadd.f32 %v2665_v60, %v2431_v4 }
 0x3fd   : > { %9376 = vst [vmem:[#allocation35_spill] sm:$0xff] %v8330_v42  ;;  %v8332_v3 = vld [vmem:[#allocation3 + $0x128] sm:$0xff]  ;;  %6090 = vmatmul.msk.f32.gmra.mxu1 %vm3061_vm3, %v8339_v38 }
 0x3fe   : > { %3132 = vst.msk [vmem:[#allocation3 + $0x139] sm:$0xff] %vm3061_vm3, %v6457_v22  ;;  %6039 = vmatmul.msk.f32.gmra.mxu3 %vm3061_vm3, %v8330_v42  ;;  %6458 = vtanh.f32 %v3022_v57  ;;  %6124 = vmatmul.msk.f32.gmra.mxu2 %vm3061_vm3, %v8072_v30  ;;  %v2153_v42 = vadd.f32 %v8039_v58, %v9378_v25  ;;  %v8365_v58 = vld [vmem:[#allocation3 + $0x82] sm:$0xff] }
 0x3ff   : > { %6071 = vmatmul.msk.f32.gmra.mxu0 %vm3061_vm3, %v8332_v3 }
 0x400   : > { %v3349_v44 = vpop.f32.mrf.mxu3 }
 0x401   : > { %v8346_v33 = vadd.f32 %v3558_v0, %v3349_v44  ;;  %v2943_v2 = vpop.f32.mrf.mxu2  ;;  %v2432_v0 = vadd.f32 %v8025_v39, %v2153_v42 }
 0x402   : > { %v2987_v41 = vadd.f32 %v2943_v2, %v2709_v56  ;;  %v2668_v15 = vpop.f32.mrf.mxu1 }
 0x403   : > { %v3561_v31 = vpop.f32.mrf.mxu0  ;;  %v2710_v36 = vadd.f32 %v2668_v15, %v2432_v0 }
 0x404   : > { %v6459_v22 = vpop.eup %6458  ;;  %v3023_v57 = vadd.f32 %v8353_v46, %v2987_v41 }
 0x405   : > { %v8356_v30 = vld [vmem:[#allocation3 + $0x139] sm:$0xff]  ;;  %3133 = vst.msk [vmem:[#allocation3 + $0x141] sm:$0xff] %vm3061_vm3, %v6459_v22  ;;  %6091 = vmatmul.msk.f32.gmra.mxu1 %vm3061_vm3, %v8365_v58 }
 0x406   : > { %9379 = vst [vmem:[#allocation32_spill] sm:$0xff] %v8356_v30  ;;  %v8358_v60 = vld [vmem:[#allocation3 + $0x138] sm:$0xff]  ;;  %6040 = vmatmul.msk.f32.gmra.mxu3 %vm3061_vm3, %v8356_v30  ;;  %6460 = vtanh.f32 %v3023_v57  ;;  %6125 = vmatmul.msk.f32.gmra.mxu2 %vm3061_vm3, %v8090_v49  ;;  %v9380_v30 = vld [vmem:[#allocation14_spill] sm:$0xff] }
 0x407   : > { %6072 = vmatmul.msk.f32.gmra.mxu0 %vm3061_vm3, %v8358_v60  ;;  %v2154_v37 = vadd.f32 %v8065_v19, %v9380_v30  ;;  %v8386_v49 = vld [vmem:[#allocation3 + $0x92] sm:$0xff] }
 0x408   : > { %v3352_v4 = vpop.f32.mrf.mxu3 }
 0x409   : > { %v8372_v56 = vadd.f32 %v3561_v31, %v3352_v4  ;;  %v2946_v44 = vpop.f32.mrf.mxu2  ;;  %v2433_v31 = vadd.f32 %v8043_v26, %v2154_v37 }
 0x40a   : > { %v2988_v2 = vadd.f32 %v2946_v44, %v2710_v36  ;;  %v2671_v22 = vpop.f32.mrf.mxu1 }
 0x40b   : > { %v3564_v41 = vpop.f32.mrf.mxu0  ;;  %v2711_v19 = vadd.f32 %v2671_v22, %v2433_v31  ;;  %v6283_v22 = vld [vmem:[%s9189_s5 + $0x88] sm:$0xff] }
 0x40c   : > { %v6461_v25 = vpop.eup %6460  ;;  %v3024_v39 = vadd.f32 %v8353_v46, %v2988_v2  ;;  %v8377_v42 = vld [vmem:[#allocation3 + $0x141] sm:$0xff]  ;;  %5429 = vmatpush.msra.mxu3 %v6283_v22 }
 0x40d   : > { %9381 = vst [vmem:[#allocation38_spill] sm:$0xff] %v8377_v42  ;;  %v8379_v57 = vld [vmem:[#allocation3 + $0x140] sm:$0xff]  ;;  %6092 = vmatmul.msk.f32.gmra.mxu1 %vm3061_vm3, %v8386_v49 }
 0x40e   : > { %3134 = vst.msk [vmem:[#allocation3 + $0x151] sm:$0xff] %vm3061_vm3, %v6461_v25  ;;  %6041 = vmatmul.msk.f32.gmra.mxu3 %vm3061_vm3, %v8377_v42  ;;  %6462 = vtanh.f32 %v3024_v39  ;;  %6126 = vmatmul.msk.f32.gmra.mxu2 %vm3061_vm3, %v8109_v54  ;;  %v9382_v25 = vld [vmem:[#allocation13_spill] sm:$0xff]  ;;  %v6181_v54 = vld [vmem:[%s9189_s5 + $0x58] sm:$0xff] }
 0x40f   : > { %6073 = vmatmul.msk.f32.gmra.mxu0 %vm3061_vm3, %v8379_v57  ;;  %v2155_v42 = vadd.f32 %v8083_v43, %v9382_v25  ;;  %v6249_v43 = vld [vmem:[%s9189_s5 + $0x78] sm:$0xff] }
 0x410   : > { %v3355_v15 = vpop.f32.mrf.mxu3  ;;  %4600 = vmatpush.msra.mxu0 %v6181_v54  ;;  %5153 = vmatpush.msra.mxu2 %v6249_v43 }
 0x411   : > { %v8393_v30 = vadd.f32 %v3564_v41, %v3355_v15  ;;  %v2949_v0 = vpop.f32.mrf.mxu2  ;;  %v8410_v41 = vld [vmem:[#allocation3 + $0x9a] sm:$0xff]  ;;  %v2434_v31 = vadd.f32 %v8067_v10, %v2155_v42 }
 0x412   : > { %v2989_v36 = vadd.f32 %v2949_v0, %v2711_v19  ;;  %v2674_v44 = vpop.f32.mrf.mxu1  ;;  %v6180_v19 = vld [vmem:[%s9189_s5 + $0x50] sm:$0xff]  ;;  %v6215_v15 = vld [vmem:[%s9189_s5 + $0x68] sm:$0xff] }
 0x413   : > { %v3567_v4 = vpop.f32.mrf.mxu0  ;;  %v2712_v0 = vadd.f32 %v2674_v44, %v2434_v31  ;;  %4877 = vmatpush.msra.mxu1 %v6215_v15  ;;  %4601 = vmatpush.msra.mxu0 %v6180_v19 }
 0x414   : > { %v6463_v2 = vpop.eup %6462  ;;  %v3025_v26 = vadd.f32 %v8353_v46, %v2989_v36 }
 0x415   : > { %v8398_v37 = vld [vmem:[#allocation3 + $0x151] sm:$0xff]  ;;  %3135 = vst.msk [vmem:[#allocation3 + $0x159] sm:$0xff] %vm3061_vm3, %v6463_v2  ;;  %6093 = vmatmul.msk.f32.gmra.mxu1 %vm3061_vm3, %v8410_v41 }
 0x416   : > { %9383 = vst [vmem:[#allocation37_spill] sm:$0xff] %v8398_v37  ;;  %v8400_v39 = vld [vmem:[#allocation3 + $0x150] sm:$0xff]  ;;  %6042 = vmatmul.msk.f32.gmra.mxu3 %vm3061_vm3, %v8398_v37  ;;  %6464 = vtanh.f32 %v3025_v26  ;;  %6127 = vmatmul.msk.f32.gmra.mxu2 %vm3061_vm3, %v8126_v20  ;;  %v9384_v37 = vld [vmem:[#allocation15_spill] sm:$0xff] }
 0x417   : > { %6074 = vmatmul.msk.f32.gmra.mxu0 %vm3061_vm3, %v8400_v39  ;;  %v2156_v7 = vadd.f32 %v8104_v35, %v9384_v37 }
 0x418   : > { %v3358_v36 = vpop.f32.mrf.mxu3 }
 0x419   : > { %v8429_v10 = vadd.f32 %v3567_v4, %v3358_v36  ;;  %v2952_v42 = vpop.f32.mrf.mxu2  ;;  %v8443_v4 = vld [vmem:[#allocation3 + $0xaa] sm:$0xff]  ;;  %v2435_v44 = vadd.f32 %v8087_v63, %v2156_v7  ;;  %v9385_v36 = vld [vmem:[#allocation17_spill] sm:$0xff] }
 0x41a   : > { %v2990_v2 = vadd.f32 %v2952_v42, %v2712_v0  ;;  %v2677_v25 = vpop.f32.mrf.mxu1  ;;  %v2157_v42 = vadd.f32 %v8134_v32, %v9385_v36 }
 0x41b   : > { %v3570_v20 = vpop.f32.mrf.mxu0  ;;  %v2713_v35 = vadd.f32 %v2677_v25, %v2435_v44 }
 0x41c   : > { %v6465_v26 = vpop.eup %6464  ;;  %v3026_v53 = vadd.f32 %v8353_v46, %v2990_v2  ;;  %v8434_v17 = vld [vmem:[#allocation3 + $0x159] sm:$0xff]  ;;  %v2436_v2 = vadd.f32 %v8117_v51, %v2157_v42 }
 0x41d   : > { %v8436_v54 = vld [vmem:[#allocation3 + $0x158] sm:$0xff]  ;;  %3136 = vst.msk [vmem:[#allocation3 + $0x169] sm:$0xff] %vm3061_vm3, %v6465_v26  ;;  %6094 = vmatmul.msk.f32.gmra.mxu1 %vm3061_vm3, %v8443_v4 }
 0x41e   : > { %6043 = vmatmul.msk.f32.gmra.mxu3 %vm3061_vm3, %v8434_v17  ;;  %6466 = vtanh.f32 %v3026_v53  ;;  %6128 = vmatmul.msk.f32.gmra.mxu2 %vm3061_vm3, %v8146_v18  ;;  %v8464_v18 = vld [vmem:[#allocation3 + $0xb2] sm:$0xff] }
 0x41f   : > { %6075 = vmatmul.msk.f32.gmra.mxu0 %vm3061_vm3, %v8436_v54 }
 0x420   : > { %v3361_v37 = vpop.f32.mrf.mxu3 }
 0x421   : > { %v8450_v43 = vadd.f32 %v3570_v20, %v3361_v37  ;;  %v2955_v22 = vpop.f32.mrf.mxu2 }
 0x422   : > { %v2991_v31 = vadd.f32 %v2955_v22, %v2713_v35  ;;  %v2680_v15 = vpop.f32.mrf.mxu1 }
 0x423   : > { %v3573_v19 = vpop.f32.mrf.mxu0  ;;  %v2714_v32 = vadd.f32 %v2680_v15, %v2436_v2  ;;  %v6473_v2 = vld [vmem:[#allocation3 + $0x19] sm:$0xff] }
 0x424   : > { %v6467_v0 = vpop.eup %6466  ;;  %v3027_v63 = vadd.f32 %v8353_v46, %v2991_v31  ;;  %v8455_v7 = vld [vmem:[#allocation3 + $0x169] sm:$0xff] }
 0x425   : > { %v8457_v53 = vld [vmem:[#allocation3 + $0x168] sm:$0xff]  ;;  %3137 = vst.msk [vmem:[#allocation3 + $0x171] sm:$0xff] %vm3061_vm3, %v6467_v0  ;;  %6095 = vmatmul.msk.f32.gmra.mxu1 %vm3061_vm3, %v8464_v18 }
 0x426   : > { %6044 = vmatmul.msk.f32.gmra.mxu3 %vm3061_vm3, %v8455_v7  ;;  %6468 = vtanh.f32 %v3027_v63  ;;  %6129 = vmatmul.msk.f32.gmra.mxu2 %vm3061_vm3, %v8164_v5  ;;  %v8485_v5 = vld [vmem:[#allocation3 + $0xc2] sm:$0xff] }
 0x427   : > { %6076 = vmatmul.msk.f32.gmra.mxu0 %vm3061_vm3, %v8457_v53 }
 0x428   : > { %v3364_v20 = vpop.f32.mrf.mxu3 }
 0x429   : > { %v8471_v25 = vadd.f32 %v3573_v19, %v3364_v20  ;;  %v2958_v26 = vpop.f32.mrf.mxu2 }
 0x42a   : > { %v2992_v44 = vadd.f32 %v2958_v26, %v2714_v32  ;;  %v8473_v37 = vpop.f32.mrf.mxu1  ;;  %v8499_v32 = vld [vmem:[#allocation3 + $0xca] sm:$0xff] }
 0x42b   : > { %v3576_v35 = vpop.f32.mrf.mxu0 }
 0x42c   : > { %v6469_v22 = vpop.eup %6468  ;;  %v3028_v31 = vadd.f32 %v8353_v46, %v2992_v44  ;;  %v8476_v51 = vld [vmem:[#allocation3 + $0x171] sm:$0xff] }
 0x42d   : > { %v8478_v0 = vld [vmem:[#allocation3 + $0x170] sm:$0xff]  ;;  %3138 = vst.msk [vmem:[#allocation3 + $0x181] sm:$0xff] %vm3061_vm3, %v6469_v22  ;;  %6096 = vmatmul.msk.f32.gmra.mxu1 %vm3061_vm3, %v8485_v5 }
 0x42e   : > { %6045 = vmatmul.msk.f32.gmra.mxu3 %vm3061_vm3, %v8476_v51  ;;  %6470 = vtanh.f32 %v3028_v31  ;;  %6130 = vmatmul.msk.f32.gmra.mxu2 %vm3061_vm3, %v8185_v50 }
 0x42f   : > { %6077 = vmatmul.msk.f32.gmra.mxu0 %vm3061_vm3, %v8478_v0 }
 0x430   : > { %v3367_v46 = vpop.f32.mrf.mxu3 }
 0x431   : > { %v8491_v19 = vadd.f32 %v3576_v35, %v3367_v46  ;;  %v8493_v15 = vpop.f32.mrf.mxu2  ;;  %v6474_v46 = vld [vmem:[#allocation3 + $0x21] sm:$0xff] }
 0x432   : > { %v3778_v42 = vpop.f32.mrf.mxu1 }
 0x433   : > { %v3579_v36 = vpop.f32.mrf.mxu0  ;;  %v3872_v50 = vadd.f32 %v3778_v42, %v8178_v8 }
 0x434   : > { %v6471_v63 = vpop.eup %6470 }
 0x435   : > { %3139 = vst.msk [vmem:[#allocation3 + $0x189] sm:$0xff] %vm3061_vm3, %v6471_v63  ;;  %6097 = vmatmul.msk.f32.gmra.mxu1 %vm3061_vm3, %v8499_v32 }
 0x436   : > { %6148 = vmatmul.msk.f32.vlgmr.msrb.gmra.mxu3 %vm3061_vm3, %v6473_v2  ;;  %6131 = vmatmul.msk.f32.gmra.mxu2 %vm3061_vm3, %v8206_v13 }
 0x437   : > { %6182 = vmatmul.msk.f32.vlgmr.msra.gmra.mxu0 %vm3061_vm3, %v8171_v48  ;;  %v8513_v48 = vld [vmem:[#allocation3 + $0xda] sm:$0xff] }
 0x438   : > { %v3370_v20 = vpop.f32.mrf.mxu3 }
 0x439   : > { %v8506_v26 = vadd.f32 %v3579_v36, %v3370_v20  ;;  %v4054_v44 = vpop.f32.mrf.mxu2  ;;  %v6475_v20 = vld [vmem:[#allocation3 + $0x31] sm:$0xff] }
 0x43a   : > { %v8508_v35 = vadd.f32 %v4054_v44, %v3872_v50  ;;  %v3781_v31 = vpop.f32.mrf.mxu1 }
 0x43b   : > { %v3582_v22 = vpop.f32.mrf.mxu0  ;;  %v3873_v8 = vadd.f32 %v3781_v31, %v8199_v29 }
 0x43d   : > { %6098 = vmatmul.msk.f32.gmra.mxu1 %vm3061_vm3, %v8513_v48 }
 0x43e   : > { %6149 = vmatmul.msk.f32.gmra.mxu3 %vm3061_vm3, %v6474_v46  ;;  %6132 = vmatmul.msk.f32.gmra.mxu2 %vm3061_vm3, %v8227_v11 }
 0x43f   : > { %6183 = vmatmul.msk.f32.gmra.mxu0 %vm3061_vm3, %v8192_v1  ;;  %v8527_v1 = vld [vmem:[#allocation3 + $0xe2] sm:$0xff] }
 0x440   : > { %v3373_v13 = vpop.f32.mrf.mxu3 }
 0x441   : > { %v8520_v36 = vadd.f32 %v3582_v22, %v3373_v13  ;;  %v4057_v42 = vpop.f32.mrf.mxu2  ;;  %v6476_v13 = vld [vmem:[#allocation3 + $0x39] sm:$0xff] }
 0x442   : > { %v8522_v63 = vadd.f32 %v4057_v42, %v3873_v8  ;;  %v3784_v50 = vpop.f32.mrf.mxu1 }
 0x443   : > { %v3874_v29 = vadd.f32 %v3784_v50, %v8220_v55 }
 0x444   : > { %v3585_v2 = vpop.f32.mrf.mxu0 }
 0x445   : > { %6099 = vmatmul.msk.f32.gmra.mxu1 %vm3061_vm3, %v8527_v1 }
 0x446   : > { %6150 = vmatmul.msk.f32.gmra.mxu3 %vm3061_vm3, %v6475_v20  ;;  %6133 = vmatmul.msk.f32.gmra.mxu2 %vm3061_vm3, %v8248_v34 }
 0x447   : > { %6184 = vmatmul.msk.f32.gmra.mxu0 %vm3061_vm3, %v8213_v21  ;;  %v8541_v21 = vld [vmem:[#allocation3 + $0xf2] sm:$0xff] }
 0x449   : > { %v3376_v11 = vpop.f32.mrf.mxu3  ;;  %v4060_v22 = vpop.f32.mrf.mxu2 }
 0x44a   : > { %v8534_v44 = vadd.f32 %v3585_v2, %v3376_v11  ;;  %v8536_v31 = vadd.f32 %v4060_v22, %v3874_v29  ;;  %v3787_v8 = vpop.f32.mrf.mxu1  ;;  %v6477_v11 = vld [vmem:[#allocation3 + $0x49] sm:$0xff] }
 0x44b   : > { %v3875_v55 = vadd.f32 %v3787_v8, %v8241_v27 }
 0x44c   : > { %v3588_v46 = vpop.f32.mrf.mxu0 }
 0x44d   : > { %6100 = vmatmul.msk.f32.gmra.mxu1 %vm3061_vm3, %v8541_v21 }
 0x44e   : > { %6151 = vmatmul.msk.f32.gmra.mxu3 %vm3061_vm3, %v6476_v13  ;;  %6134 = vmatmul.msk.f32.gmra.mxu2 %vm3061_vm3, %v8269_v28 }
 0x44f   : > { %6185 = vmatmul.msk.f32.gmra.mxu0 %vm3061_vm3, %v8234_v6  ;;  %v8555_v6 = vld [vmem:[#allocation3 + $0xfa] sm:$0xff] }
 0x451   : > { %v3379_v34 = vpop.f32.mrf.mxu3  ;;  %v4063_v2 = vpop.f32.mrf.mxu2 }
 0x452   : > { %v8548_v42 = vadd.f32 %v3588_v46, %v3379_v34  ;;  %v8550_v50 = vadd.f32 %v4063_v2, %v3875_v55  ;;  %v3790_v29 = vpop.f32.mrf.mxu1  ;;  %v6478_v34 = vld [vmem:[#allocation3 + $0x51] sm:$0xff] }
 0x453   : > { %v3876_v27 = vadd.f32 %v3790_v29, %v8262_v52 }
 0x454   : > { %v3591_v20 = vpop.f32.mrf.mxu0 }
 0x455   : > { %6101 = vmatmul.msk.f32.gmra.mxu1 %vm3061_vm3, %v8555_v6 }
 0x456   : > { %6152 = vmatmul.msk.f32.gmra.mxu3 %vm3061_vm3, %v6477_v11  ;;  %6135 = vmatmul.msk.f32.gmra.mxu2 %vm3061_vm3, %v8290_v12 }
 0x457   : > { %6186 = vmatmul.msk.f32.gmra.mxu0 %vm3061_vm3, %v8255_v45  ;;  %v8569_v45 = vld [vmem:[#allocation3 + $0x10a] sm:$0xff] }
 0x459   : > { %v3382_v28 = vpop.f32.mrf.mxu3  ;;  %v4066_v46 = vpop.f32.mrf.mxu2 }
 0x45a   : > { %v8562_v22 = vadd.f32 %v3591_v20, %v3382_v28  ;;  %v8564_v8 = vadd.f32 %v4066_v46, %v3876_v27  ;;  %v3793_v55 = vpop.f32.mrf.mxu1  ;;  %v6479_v28 = vld [vmem:[#allocation3 + $0x61] sm:$0xff] }
 0x45b   : > { %v3877_v52 = vadd.f32 %v3793_v55, %v8283_v9 }
 0x45c   : > { %v3594_v13 = vpop.f32.mrf.mxu0 }
 0x45d   : > { %6102 = vmatmul.msk.f32.gmra.mxu1 %vm3061_vm3, %v8569_v45 }
 0x45e   : > { %6153 = vmatmul.msk.f32.gmra.mxu3 %vm3061_vm3, %v6478_v34  ;;  %6136 = vmatmul.msk.f32.gmra.mxu2 %vm3061_vm3, %v8311_v23 }
 0x45f   : > { %6187 = vmatmul.msk.f32.gmra.mxu0 %vm3061_vm3, %v8276_v47  ;;  %v8583_v47 = vld [vmem:[#allocation3 + $0x112] sm:$0xff] }
 0x461   : > { %v3385_v12 = vpop.f32.mrf.mxu3  ;;  %v4069_v20 = vpop.f32.mrf.mxu2 }
 0x462   : > { %v8576_v2 = vadd.f32 %v3594_v13, %v3385_v12  ;;  %v8578_v29 = vadd.f32 %v4069_v20, %v3877_v52  ;;  %v3796_v27 = vpop.f32.mrf.mxu1  ;;  %v6480_v12 = vld [vmem:[#allocation3 + $0x69] sm:$0xff] }
 0x463   : > { %v3878_v9 = vadd.f32 %v3796_v27, %v8304_v16 }
 0x464   : > { %v3597_v11 = vpop.f32.mrf.mxu0 }
 0x465   : > { %6103 = vmatmul.msk.f32.gmra.mxu1 %vm3061_vm3, %v8583_v47 }
 0x466   : > { %6154 = vmatmul.msk.f32.gmra.mxu3 %vm3061_vm3, %v6479_v28  ;;  %6137 = vmatmul.msk.f32.gmra.mxu2 %vm3061_vm3, %v8332_v3 }
 0x467   : > { %6188 = vmatmul.msk.f32.gmra.mxu0 %vm3061_vm3, %v8297_v62  ;;  %v8597_v62 = vld [vmem:[#allocation3 + $0x122] sm:$0xff] }
 0x469   : > { %v3388_v23 = vpop.f32.mrf.mxu3  ;;  %v4072_v13 = vpop.f32.mrf.mxu2 }
 0x46a   : > { %v8590_v46 = vadd.f32 %v3597_v11, %v3388_v23  ;;  %v8592_v55 = vadd.f32 %v4072_v13, %v3878_v9  ;;  %v3799_v52 = vpop.f32.mrf.mxu1  ;;  %v6481_v23 = vld [vmem:[#allocation3 + $0x79] sm:$0xff] }
 0x46b   : > { %v3879_v16 = vadd.f32 %v3799_v52, %v8325_v14 }
 0x46c   : > { %v3600_v34 = vpop.f32.mrf.mxu0 }
 0x46d   : > { %6104 = vmatmul.msk.f32.gmra.mxu1 %vm3061_vm3, %v8597_v62 }
 0x46e   : > { %6155 = vmatmul.msk.f32.gmra.mxu3 %vm3061_vm3, %v6480_v12  ;;  %6138 = vmatmul.msk.f32.gmra.mxu2 %vm3061_vm3, %v8358_v60 }
 0x46f   : > { %6189 = vmatmul.msk.f32.gmra.mxu0 %vm3061_vm3, %v8318_v40  ;;  %v8611_v40 = vld [vmem:[#allocation3 + $0x12a] sm:$0xff] }
 0x471   : > { %v3391_v3 = vpop.f32.mrf.mxu3  ;;  %v4075_v11 = vpop.f32.mrf.mxu2 }
 0x472   : > { %v8604_v20 = vadd.f32 %v3600_v34, %v3391_v3  ;;  %v8606_v27 = vadd.f32 %v4075_v11, %v3879_v16  ;;  %v3802_v9 = vpop.f32.mrf.mxu1  ;;  %v6482_v3 = vld [vmem:[#allocation3 + $0x81] sm:$0xff] }
 0x473   : > { %v3880_v14 = vadd.f32 %v3802_v9, %v8346_v33 }
 0x474   : > { %v3603_v28 = vpop.f32.mrf.mxu0 }
 0x475   : > { %6105 = vmatmul.msk.f32.gmra.mxu1 %vm3061_vm3, %v8611_v40 }
 0x476   : > { %6156 = vmatmul.msk.f32.gmra.mxu3 %vm3061_vm3, %v6481_v23  ;;  %6139 = vmatmul.msk.f32.gmra.mxu2 %vm3061_vm3, %v8379_v57 }
 0x477   : > { %6190 = vmatmul.msk.f32.gmra.mxu0 %vm3061_vm3, %v8339_v38  ;;  %v8625_v38 = vld [vmem:[#allocation3 + $0x13a] sm:$0xff] }
 0x479   : > { %v3394_v60 = vpop.f32.mrf.mxu3  ;;  %v4078_v34 = vpop.f32.mrf.mxu2 }
 0x47a   : > { %v8618_v13 = vadd.f32 %v3603_v28, %v3394_v60  ;;  %v8620_v52 = vadd.f32 %v4078_v34, %v3880_v14  ;;  %v3805_v16 = vpop.f32.mrf.mxu1  ;;  %v6483_v60 = vld [vmem:[#allocation3 + $0x91] sm:$0xff] }
 0x47b   : > { %v3881_v33 = vadd.f32 %v3805_v16, %v8372_v56 }
 0x47c   : > { %v3606_v12 = vpop.f32.mrf.mxu0 }
 0x47d   : > { %6106 = vmatmul.msk.f32.gmra.mxu1 %vm3061_vm3, %v8625_v38 }
 0x47e   : > { %6157 = vmatmul.msk.f32.gmra.mxu3 %vm3061_vm3, %v6482_v3  ;;  %6140 = vmatmul.msk.f32.gmra.mxu2 %vm3061_vm3, %v8400_v39 }
 0x47f   : > { %6191 = vmatmul.msk.f32.gmra.mxu0 %vm3061_vm3, %v8365_v58  ;;  %v8639_v58 = vld [vmem:[#allocation3 + $0x142] sm:$0xff] }
 0x481   : > { %v3397_v57 = vpop.f32.mrf.mxu3  ;;  %v4081_v28 = vpop.f32.mrf.mxu2 }
 0x482   : > { %v8632_v11 = vadd.f32 %v3606_v12, %v3397_v57  ;;  %v8634_v9 = vadd.f32 %v4081_v28, %v3881_v33  ;;  %v3808_v14 = vpop.f32.mrf.mxu1  ;;  %v6484_v57 = vld [vmem:[#allocation3 + $0x99] sm:$0xff] }
 0x483   : > { %v3882_v56 = vadd.f32 %v3808_v14, %v8393_v30  ;;  %v6214_v30 = vld [vmem:[%s9189_s5 + $0x60] sm:$0xff] }
 0x484   : > { %v3609_v23 = vpop.f32.mrf.mxu0  ;;  %4878 = vmatpush.msra.mxu1 %v6214_v30 }
 0x485   : > { %6107 = vmatmul.msk.f32.gmra.mxu1 %vm3061_vm3, %v8639_v58 }
 0x486   : > { %6158 = vmatmul.msk.f32.gmra.mxu3 %vm3061_vm3, %v6483_v60  ;;  %6141 = vmatmul.msk.f32.gmra.mxu2 %vm3061_vm3, %v8436_v54  ;;  %v6248_v54 = vld [vmem:[%s9189_s5 + $0x70] sm:$0xff] }
 0x487   : > { %6192 = vmatmul.msk.f32.gmra.mxu0 %vm3061_vm3, %v8386_v49  ;;  %v8653_v49 = vld [vmem:[#allocation3 + $0x152] sm:$0xff]  ;;  %5154 = vmatpush.msra.mxu2 %v6248_v54  ;;  %v8692_v54 = vld [vmem:[#allocation3 + $0x16a] sm:$0xff] }
 0x489   : > { %v3400_v39 = vpop.f32.mrf.mxu3  ;;  %v4084_v12 = vpop.f32.mrf.mxu2 }
 0x48a   : > { %v8646_v34 = vadd.f32 %v3609_v23, %v3400_v39  ;;  %v8648_v16 = vadd.f32 %v4084_v12, %v3882_v56  ;;  %v3811_v33 = vpop.f32.mrf.mxu1  ;;  %v8674_v12 = vld [vmem:[#allocation3 + $0x15a] sm:$0xff] }
 0x48c   : > { %v3612_v3 = vpop.f32.mrf.mxu0 }
 0x48d   : > { %6108 = vmatmul.msk.f32.gmra.mxu1 %vm3061_vm3, %v8653_v49 }
 0x48e   : > { %6159 = vmatmul.msk.f32.gmra.mxu3 %vm3061_vm3, %v6484_v57  ;;  %6142 = vmatmul.msk.f32.gmra.mxu2 %vm3061_vm3, %v8457_v53 }
 0x48f   : > { %6193 = vmatmul.msk.f32.gmra.mxu0 %vm3061_vm3, %v8410_v41  ;;  %v3883_v41 = vadd.f32 %v3811_v33, %v8429_v10  ;;  %v6282_v10 = vld [vmem:[%s9189_s5 + $0x80] sm:$0xff] }
 0x490   : > { %5430 = vmatpush.msra.mxu3 %v6282_v10  ;;  %v8711_v10 = vld [vmem:[#allocation3 + $0x188] sm:$0xff] }
 0x491   : > { %v3403_v28 = vpop.f32.mrf.mxu3  ;;  %v4087_v14 = vpop.f32.mrf.mxu2  ;;  %9387 = vst [vmem:[#allocation36_spill] sm:$0xff] %v8711_v10 }
 0x492   : > { %v8666_v23 = vadd.f32 %v3612_v3, %v3403_v28  ;;  %v8668_v60 = vadd.f32 %v4087_v14, %v3883_v41  ;;  %v3814_v39 = vpop.f32.mrf.mxu1 }
 0x493   : > { %v3884_v53 = vadd.f32 %v3814_v39, %v8450_v43  ;;  %v8709_v39 = vld [vmem:[#allocation3 + $0x172] sm:$0xff] }
 0x494   : > { %v3615_v56 = vpop.f32.mrf.mxu0 }
 0x495   : > { %6109 = vmatmul.msk.f32.gmra.mxu1 %vm3061_vm3, %v8674_v12 }
 0x496   : > { %6160 = vmatmul.msk.f32.gmra.mxu3 %vm3061_vm3, %v8107_v24  ;;  %6143 = vmatmul.msk.f32.gmra.mxu2 %vm3061_vm3, %v8478_v0  ;;  %v8694_v0 = vld [vmem:[#allocation3 + $0x180] sm:$0xff] }
 0x497   : > { %6194 = vmatmul.msk.f32.gmra.mxu0 %vm3061_vm3, %v8443_v4  ;;  %9386 = vst [vmem:[#allocation39_spill] sm:$0xff] %v8694_v0 }
 0x499   : > { %v3406_v3 = vpop.f32.mrf.mxu3  ;;  %v4090_v33 = vpop.f32.mrf.mxu2 }
 0x49a   : > { %v8684_v24 = vadd.f32 %v3615_v56, %v3406_v3  ;;  %v8686_v4 = vadd.f32 %v4090_v33, %v3884_v53  ;;  %v3817_v30 = vpop.f32.mrf.mxu1 }
 0x49b   : > { %v3885_v43 = vadd.f32 %v3817_v30, %v8471_v25  ;;  %v9389_v30 = vld [vmem:[#allocation27_spill] sm:$0xff] }
 0x49c   : > { %v3618_v57 = vpop.f32.mrf.mxu0 }
 0x49d   : > { %6110 = vmatmul.msk.f32.gmra.mxu1 %vm3061_vm3, %v8692_v54 }
 0x49e   : > { %6161 = vmatmul.msk.f32.gmra.mxu3 %vm3061_vm3, %v8124_v59  ;;  %6144 = vmatmul.msk.f32.gmra.mxu2 %vm3061_vm3, %v8694_v0 }
 0x49f   : > { %6195 = vmatmul.msk.f32.gmra.mxu0 %vm3061_vm3, %v8464_v18 }
 0x4a1   : > { %v3409_v41 = vpop.f32.mrf.mxu3  ;;  %v4093_v14 = vpop.f32.mrf.mxu2 }
 0x4a2   : > { %v8701_v28 = vadd.f32 %v3618_v57, %v3409_v41  ;;  %v8703_v59 = vadd.f32 %v4093_v14, %v3885_v43  ;;  %v3820_v18 = vpop.f32.mrf.mxu1  ;;  %v4732_v43 = vld [vmem:[#allocation3 + $0x30] sm:$0xff] }
 0x4a3   : > { %v3886_v25 = vadd.f32 %v3820_v18, %v8491_v19  ;;  %v5008_v41 = vld [vmem:[#allocation3 + $0x31] sm:$0xff] }
 0x4a4   : > { %v3621_v56 = vpop.f32.mrf.mxu0 }
 0x4a5   : > { %6111 = vmatmul.msk.f32.gmra.mxu1 %vm3061_vm3, %v8709_v39 }
 0x4a6   : > { %6162 = vmatmul.msk.f32.gmra.mxu3 %vm3061_vm3, %v8144_v61  ;;  %6145 = vmatmul.msk.f32.gmra.mxu2 %vm3061_vm3, %v8711_v10 }
 0x4a7   : > { %6196 = vmatmul.msk.f32.gmra.mxu0 %vm3061_vm3, %v8485_v5 }
 0x4a9   : > { %v3412_v53 = vpop.f32.mrf.mxu3  ;;  %v4096_v33 = vpop.f32.mrf.mxu2 }
 0x4aa   : > { %v8718_v3 = vadd.f32 %v3621_v56, %v3412_v53  ;;  %v8720_v61 = vadd.f32 %v4096_v33, %v3886_v25  ;;  %v3823_v5 = vpop.f32.mrf.mxu1  ;;  %v9390_v33 = vld [vmem:[#allocation25_spill] sm:$0xff] }
 0x4ab   : > { %v3887_v19 = vadd.f32 %v3823_v5, %v8506_v26  ;;  %v4733_v26 = vld [vmem:[#allocation3 + $0x38] sm:$0xff] }
 0x4ac   : > { %9388 = vst [vmem:[#allocation42_spill] sm:$0xff] %v8720_v61  ;;  %v3624_v57 = vpop.f32.mrf.mxu0  ;;  %v9392_v61 = vld [vmem:[#allocation24_spill] sm:$0xff]  ;;  %v5009_v5 = vld [vmem:[#allocation3 + $0x39] sm:$0xff] }
 0x4ad   : > { %6216 = vmatmul.msk.f32.vlgmr.msra.gmra.mxu1 %vm3061_vm3, %v4732_v43 }
 0x4ae   : > { %6163 = vmatmul.msk.f32.gmra.mxu3 %vm3061_vm3, %v9389_v30  ;;  %6250 = vmatmul.msk.f32.vlgmr.msra.gmra.mxu2 %vm3061_vm3, %v5008_v41  ;;  %v9391_v30 = vld [vmem:[#allocation26_spill] sm:$0xff] }
 0x4af   : > { %6197 = vmatmul.msk.f32.gmra.mxu0 %vm3061_vm3, %v8499_v32  ;;  %v3532_v10 = vadd.f32 %v9391_v30, %v9390_v33  ;;  %v4734_v33 = vld [vmem:[#allocation3 + $0x48] sm:$0xff] }
 0x4b0   : > { %v5010_v30 = vld [vmem:[#allocation3 + $0x49] sm:$0xff] }
 0x4b1   : > { %v3415_v14 = vpop.f32.mrf.mxu3  ;;  %v4099_v18 = vpop.f32.mrf.mxu2  ;;  %v3871_v32 = vadd.f32 %v8473_v37, %v3532_v10 }
 0x4b2   : > { %v8729_v56 = vadd.f32 %v3624_v57, %v3415_v14  ;;  %v8731_v25 = vadd.f32 %v4099_v18, %v3887_v19  ;;  %v3826_v0 = vpop.f32.mrf.mxu1 }
 0x4b3   : > { %v4147_v57 = vadd.f32 %v8493_v15, %v3871_v32  ;;  %v3888_v43 = vadd.f32 %v3826_v0, %v8520_v36 }
 0x4b4   : > { %v4603_v53 = vpop.f32.mrf.mxu0 }
 0x4b5   : > { %6217 = vmatmul.msk.f32.gmra.mxu1 %vm3061_vm3, %v4733_v26 }
 0x4b6   : > { %6164 = vmatmul.msk.f32.gmra.mxu3 %vm3061_vm3, %v9392_v61  ;;  %6251 = vmatmul.msk.f32.gmra.mxu2 %vm3061_vm3, %v5009_v5 }
 0x4b7   : > { %6198 = vmatmul.msk.f32.gmra.mxu0 %vm3061_vm3, %v8513_v48  ;;  %v9393_v48 = vld [vmem:[#allocation30_spill] sm:$0xff] }
 0x4b9   : > { %v4327_v41 = vpop.f32.mrf.mxu3  ;;  %v4102_v14 = vpop.f32.mrf.mxu2 }
 0x4ba   : > { %v4423_v19 = vadd.f32 %v4327_v41, %v4147_v57  ;;  %v8744_v37 = vadd.f32 %v4102_v14, %v3888_v43  ;;  %v3829_v61 = vpop.f32.mrf.mxu1  ;;  %v9394_v43 = vld [vmem:[#allocation29_spill] sm:$0xff] }
 0x4bb   : > { %v3889_v15 = vadd.f32 %v3829_v61, %v8534_v44  ;;  %v5011_v41 = vld [vmem:[#allocation3 + $0x51] sm:$0xff] }
 0x4bc   : > { %v4606_v10 = vpop.f32.mrf.mxu0  ;;  %v8746_v18 = vadd.f32 %v4603_v53, %v4423_v19 }
 0x4bd   : > { %6218 = vmatmul.msk.f32.gmra.mxu1 %vm3061_vm3, %v4734_v33 }
 0x4be   : > { %6165 = vmatmul.msk.f32.gmra.mxu3 %vm3061_vm3, %v9393_v48  ;;  %6252 = vmatmul.msk.f32.gmra.mxu2 %vm3061_vm3, %v5010_v30  ;;  %v9395_v30 = vld [vmem:[#allocation31_spill] sm:$0xff] }
 0x4bf   : > { %6199 = vmatmul.msk.f32.gmra.mxu0 %vm3061_vm3, %v8527_v1  ;;  %v4735_v1 = vld [vmem:[#allocation3 + $0x50] sm:$0xff] }
 0x4c1   : > { %v4330_v36 = vpop.f32.mrf.mxu3  ;;  %v4105_v32 = vpop.f32.mrf.mxu2 }
 0x4c2   : > { %v4424_v0 = vadd.f32 %v4330_v36, %v8508_v35  ;;  %v8756_v53 = vadd.f32 %v4105_v32, %v3889_v15  ;;  %v3832_v5 = vpop.f32.mrf.mxu1  ;;  %v5012_v15 = vld [vmem:[#allocation3 + $0x61] sm:$0xff] }
 0x4c3   : > { %v3890_v35 = vadd.f32 %v3832_v5, %v8548_v42 }
 0x4c4   : > { %v4609_v26 = vpop.f32.mrf.mxu0  ;;  %v8758_v57 = vadd.f32 %v4606_v10, %v4424_v0 }
 0x4c5   : > { %6219 = vmatmul.msk.f32.gmra.mxu1 %vm3061_vm3, %v4735_v1  ;;  %v9396_v1 = vld [vmem:[#allocation28_spill] sm:$0xff] }
 0x4c6   : > { %6166 = vmatmul.msk.f32.gmra.mxu3 %vm3061_vm3, %v9394_v43  ;;  %6253 = vmatmul.msk.f32.gmra.mxu2 %vm3061_vm3, %v5011_v41  ;;  %v5013_v41 = vld [vmem:[#allocation3 + $0x69] sm:$0xff] }
 0x4c7   : > { %6200 = vmatmul.msk.f32.gmra.mxu0 %vm3061_vm3, %v8541_v21  ;;  %v4736_v21 = vld [vmem:[#allocation3 + $0x60] sm:$0xff] }
 0x4c9   : > { %v4333_v44 = vpop.f32.mrf.mxu3  ;;  %v4108_v14 = vpop.f32.mrf.mxu2 }
 0x4ca   : > { %v4425_v19 = vadd.f32 %v4333_v44, %v8522_v63  ;;  %v8768_v10 = vadd.f32 %v4108_v14, %v3890_v35  ;;  %v3835_v48 = vpop.f32.mrf.mxu1 }
 0x4cb   : > { %v3891_v63 = vadd.f32 %v3835_v48, %v8562_v22  ;;  %v9397_v48 = vld [vmem:[#allocation34_spill] sm:$0xff] }
 0x4cc   : > { %v4612_v61 = vpop.f32.mrf.mxu0  ;;  %v8770_v33 = vadd.f32 %v4609_v26, %v4425_v19 }
 0x4cd   : > { %6220 = vmatmul.msk.f32.gmra.mxu1 %vm3061_vm3, %v4736_v21 }
 0x4ce   : > { %6167 = vmatmul.msk.f32.gmra.mxu3 %vm3061_vm3, %v9395_v30  ;;  %6254 = vmatmul.msk.f32.gmra.mxu2 %vm3061_vm3, %v5012_v15  ;;  %v5014_v30 = vld [vmem:[#allocation3 + $0x79] sm:$0xff] }
 0x4cf   : > { %6201 = vmatmul.msk.f32.gmra.mxu0 %vm3061_vm3, %v8555_v6  ;;  %v4737_v6 = vld [vmem:[#allocation3 + $0x68] sm:$0xff] }
 0x4d1   : > { %v4336_v42 = vpop.f32.mrf.mxu3  ;;  %v4111_v0 = vpop.f32.mrf.mxu2 }
 0x4d2   : > { %v4426_v36 = vadd.f32 %v4336_v42, %v8536_v31  ;;  %v8780_v32 = vadd.f32 %v4111_v0, %v3891_v63  ;;  %v3838_v26 = vpop.f32.mrf.mxu1 }
 0x4d3   : > { %v3892_v31 = vadd.f32 %v3838_v26, %v8576_v2  ;;  %v9398_v26 = vld [vmem:[#allocation33_spill] sm:$0xff] }
 0x4d4   : > { %v8782_v5 = vadd.f32 %v4612_v61, %v4426_v36  ;;  %v4615_v43 = vpop.f32.mrf.mxu0 }
 0x4d5   : > { %6221 = vmatmul.msk.f32.gmra.mxu1 %vm3061_vm3, %v4737_v6 }
 0x4d6   : > { %6168 = vmatmul.msk.f32.gmra.mxu3 %vm3061_vm3, %v9396_v1  ;;  %6255 = vmatmul.msk.f32.gmra.mxu2 %vm3061_vm3, %v5013_v41 }
 0x4d7   : > { %6202 = vmatmul.msk.f32.gmra.mxu0 %vm3061_vm3, %v8569_v45  ;;  %v4738_v45 = vld [vmem:[#allocation3 + $0x78] sm:$0xff] }
 0x4d9   : > { %v4339_v22 = vpop.f32.mrf.mxu3  ;;  %v4114_v44 = vpop.f32.mrf.mxu2 }
 0x4da   : > { %v4427_v35 = vadd.f32 %v4339_v22, %v8550_v50  ;;  %v8792_v19 = vadd.f32 %v4114_v44, %v3892_v31  ;;  %v3841_v14 = vpop.f32.mrf.mxu1  ;;  %v9399_v44 = vld [vmem:[#allocation35_spill] sm:$0xff] }
 0x4db   : > { %v3893_v50 = vadd.f32 %v3841_v14, %v8590_v46  ;;  %v5016_v14 = vld [vmem:[#allocation3 + $0x91] sm:$0xff] }
 0x4dc   : > { %v8794_v61 = vadd.f32 %v4615_v43, %v4427_v35  ;;  %v4618_v21 = vpop.f32.mrf.mxu0  ;;  %v5015_v43 = vld [vmem:[#allocation3 + $0x81] sm:$0xff] }
 0x4dd   : > { %6222 = vmatmul.msk.f32.gmra.mxu1 %vm3061_vm3, %v4738_v45 }
 0x4de   : > { %6169 = vmatmul.msk.f32.gmra.mxu3 %vm3061_vm3, %v9397_v48  ;;  %6256 = vmatmul.msk.f32.gmra.mxu2 %vm3061_vm3, %v5014_v30 }
 0x4df   : > { %6203 = vmatmul.msk.f32.gmra.mxu0 %vm3061_vm3, %v8583_v47  ;;  %v4739_v47 = vld [vmem:[#allocation3 + $0x80] sm:$0xff] }
 0x4e1   : > { %v4342_v2 = vpop.f32.mrf.mxu3  ;;  %v4117_v63 = vpop.f32.mrf.mxu2 }
 0x4e2   : > { %v4428_v15 = vadd.f32 %v4342_v2, %v8564_v8  ;;  %v8804_v42 = vadd.f32 %v4117_v63, %v3893_v50  ;;  %v3844_v36 = vpop.f32.mrf.mxu1  ;;  %v5017_v63 = vld [vmem:[#allocation3 + $0x99] sm:$0xff] }
 0x4e3   : > { %v3894_v8 = vadd.f32 %v3844_v36, %v8604_v20 }
 0x4e4   : > { %v8806_v0 = vadd.f32 %v4618_v21, %v4428_v15  ;;  %v4621_v46 = vpop.f32.mrf.mxu0  ;;  %v9400_v15 = vld [vmem:[#allocation32_spill] sm:$0xff] }
 0x4e5   : > { %6223 = vmatmul.msk.f32.gmra.mxu1 %vm3061_vm3, %v4739_v47 }
 0x4e6   : > { %6170 = vmatmul.msk.f32.gmra.mxu3 %vm3061_vm3, %v9398_v26  ;;  %6257 = vmatmul.msk.f32.gmra.mxu2 %vm3061_vm3, %v5015_v43 }
 0x4e7   : > { %6204 = vmatmul.msk.f32.gmra.mxu0 %vm3061_vm3, %v8597_v62  ;;  %v4740_v62 = vld [vmem:[#allocation3 + $0x90] sm:$0xff] }
 0x4e9   : > { %v4345_v1 = vpop.f32.mrf.mxu3  ;;  %v4120_v41 = vpop.f32.mrf.mxu2 }
 0x4ea   : > { %v4429_v6 = vadd.f32 %v4345_v1, %v8578_v29  ;;  %v8816_v31 = vadd.f32 %v4120_v41, %v3894_v8  ;;  %v3847_v22 = vpop.f32.mrf.mxu1  ;;  %v5018_v8 = vld [vmem:[#allocation3 + $0xa9] sm:$0xff] }
 0x4eb   : > { %v3895_v29 = vadd.f32 %v3847_v22, %v8618_v13 }
 0x4ec   : > { %v8818_v35 = vadd.f32 %v4621_v46, %v4429_v6  ;;  %v4624_v30 = vpop.f32.mrf.mxu0  ;;  %v9401_v46 = vld [vmem:[#allocation38_spill] sm:$0xff] }
 0x4ed   : > { %6224 = vmatmul.msk.f32.gmra.mxu1 %vm3061_vm3, %v4740_v62  ;;  %v5019_v62 = vld [vmem:[#allocation3 + $0xb1] sm:$0xff] }
 0x4ee   : > { %6171 = vmatmul.msk.f32.gmra.mxu3 %vm3061_vm3, %v9399_v44  ;;  %6258 = vmatmul.msk.f32.gmra.mxu2 %vm3061_vm3, %v5016_v14  ;;  %v9402_v44 = vld [vmem:[#allocation37_spill] sm:$0xff] }
 0x4ef   : > { %6205 = vmatmul.msk.f32.gmra.mxu0 %vm3061_vm3, %v8611_v40  ;;  %v4741_v40 = vld [vmem:[#allocation3 + $0x98] sm:$0xff] }
 0x4f1   : > { %v4348_v20 = vpop.f32.mrf.mxu3  ;;  %v4123_v45 = vpop.f32.mrf.mxu2 }
 0x4f2   : > { %v4430_v48 = vadd.f32 %v4348_v20, %v8592_v55  ;;  %v8828_v21 = vadd.f32 %v4123_v45, %v3895_v29  ;;  %v3850_v50 = vpop.f32.mrf.mxu1  ;;  %v5020_v45 = vld [vmem:[#allocation3 + $0xc1] sm:$0xff] }
 0x4f3   : > { %v3896_v55 = vadd.f32 %v3850_v50, %v8632_v11 }
 0x4f4   : > { %v8830_v2 = vadd.f32 %v4624_v30, %v4430_v48 }
 0x4f5   : > { %6225 = vmatmul.msk.f32.gmra.mxu1 %vm3061_vm3, %v4741_v40 }
 0x4f6   : > { %6172 = vmatmul.msk.f32.gmra.mxu3 %vm3061_vm3, %v9400_v15  ;;  %6259 = vmatmul.msk.f32.gmra.mxu2 %vm3061_vm3, %v5017_v63 }
 0x4f7   : > { %6206 = vmatmul.msk.f32.gmra.mxu0 %vm3061_vm3, %v8625_v38  ;;  %v4742_v38 = vld [vmem:[#allocation3 + $0xa8] sm:$0xff] }
 0x4f9   : > { %v4351_v13 = vpop.f32.mrf.mxu3  ;;  %v4126_v26 = vpop.f32.mrf.mxu2 }
 0x4fa   : > { %v8840_v36 = vadd.f32 %v4351_v13, %v8606_v27  ;;  %v8842_v47 = vadd.f32 %v4126_v26, %v3896_v55  ;;  %v3853_v43 = vpop.f32.mrf.mxu1 }
 0x4fb   : > { %v3897_v11 = vadd.f32 %v3853_v43, %v8646_v34 }
 0x4fd   : > { %6226 = vmatmul.msk.f32.gmra.mxu1 %vm3061_vm3, %v4742_v38 }
 0x4fe   : > { %6173 = vmatmul.msk.f32.gmra.mxu3 %vm3061_vm3, %v9401_v46  ;;  %6260 = vmatmul.msk.f32.gmra.mxu2 %vm3061_vm3, %v5018_v8 }
 0x4ff   : > { %6207 = vmatmul.msk.f32.gmra.mxu0 %vm3061_vm3, %v8639_v58  ;;  %v4743_v58 = vld [vmem:[#allocation3 + $0xb0] sm:$0xff] }
 0x501   : > { %v4354_v27 = vpop.f32.mrf.mxu3  ;;  %v4129_v6 = vpop.f32.mrf.mxu2 }
 0x502   : > { %v8852_v1 = vadd.f32 %v4354_v27, %v8620_v52  ;;  %v8854_v41 = vadd.f32 %v4129_v6, %v3897_v11  ;;  %v3856_v22 = vpop.f32.mrf.mxu1  ;;  %v8906_v11 = vld [vmem:[#allocation3 + $0x182] sm:$0xff] }
 0x503   : > { %v3898_v34 = vadd.f32 %v3856_v22, %v8666_v23 }
 0x505   : > { %6227 = vmatmul.msk.f32.gmra.mxu1 %vm3061_vm3, %v4743_v58 }
 0x506   : > { %6174 = vmatmul.msk.f32.gmra.mxu3 %vm3061_vm3, %v9402_v44  ;;  %6261 = vmatmul.msk.f32.gmra.mxu2 %vm3061_vm3, %v5019_v62  ;;  %v8920_v62 = vld [vmem:[#allocation3 + $0x189] sm:$0xff] }
 0x507   : > { %6208 = vmatmul.msk.f32.gmra.mxu0 %vm3061_vm3, %v8653_v49  ;;  %v4744_v49 = vld [vmem:[#allocation3 + $0xc0] sm:$0xff] }
 0x509   : > { %v4357_v52 = vpop.f32.mrf.mxu3  ;;  %v4132_v29 = vpop.f32.mrf.mxu2 }
 0x50a   : > { %v8864_v14 = vadd.f32 %v4357_v52, %v8634_v9  ;;  %v8866_v20 = vadd.f32 %v4132_v29, %v3898_v34  ;;  %v3859_v48 = vpop.f32.mrf.mxu1  ;;  %v8922_v34 = vld [vmem:[#allocation3 + $0x18a] sm:$0xff] }
 0x50b   : > { %v3899_v23 = vadd.f32 %v3859_v48, %v8684_v24  ;;  %v4748_v52 = vld [vmem:[#allocation3 + $0xf0] sm:$0xff]  ;;  %v9403_v48 = vld [vmem:[#allocation42_spill] sm:$0xff] }
 0x50d   : > { %6228 = vmatmul.msk.f32.gmra.mxu1 %vm3061_vm3, %v4744_v49 }
 0x50e   : > { %6175 = vmatmul.msk.f32.gmra.mxu3 %vm3061_vm3, %v8434_v17  ;;  %6262 = vmatmul.msk.f32.gmra.mxu2 %vm3061_vm3, %v5020_v45  ;;  %v4745_v17 = vld [vmem:[#allocation3 + $0xc8] sm:$0xff] }
 0x50f   : > { %6209 = vmatmul.msk.f32.gmra.mxu0 %vm3061_vm3, %v8674_v12  ;;  %v5021_v12 = vld [vmem:[#allocation3 + $0xc9] sm:$0xff] }
 0x511   : > { %v4360_v9 = vpop.f32.mrf.mxu3  ;;  %v4135_v50 = vpop.f32.mrf.mxu2 }
 0x512   : > { %v8876_v30 = vadd.f32 %v4360_v9, %v8648_v16  ;;  %v8878_v15 = vadd.f32 %v4135_v50, %v3899_v23  ;;  %v3862_v40 = vpop.f32.mrf.mxu1  ;;  %v5284_v50 = vld [vmem:[#allocation3 + $0x32] sm:$0xff] }
 0x513   : > { %v3900_v24 = vadd.f32 %v3862_v40, %v8701_v28  ;;  %v4749_v40 = vld [vmem:[#allocation3 + $0xf8] sm:$0xff] }
 0x515   : > { %6229 = vmatmul.msk.f32.gmra.mxu1 %vm3061_vm3, %v4745_v17  ;;  %v5025_v17 = vld [vmem:[#allocation3 + $0xf9] sm:$0xff] }
 0x516   : > { %6176 = vmatmul.msk.f32.gmra.mxu3 %vm3061_vm3, %v8455_v7  ;;  %6263 = vmatmul.msk.f32.gmra.mxu2 %vm3061_vm3, %v5021_v12  ;;  %v4746_v7 = vld [vmem:[#allocation3 + $0xd8] sm:$0xff] }
 0x517   : > { %6210 = vmatmul.msk.f32.gmra.mxu0 %vm3061_vm3, %v8692_v54  ;;  %v5022_v54 = vld [vmem:[#allocation3 + $0xd9] sm:$0xff] }
 0x519   : > { %v4363_v16 = vpop.f32.mrf.mxu3  ;;  %v4138_v55 = vpop.f32.mrf.mxu2 }
 0x51a   : > { %v8888_v63 = vadd.f32 %v4363_v16, %v8668_v60  ;;  %v8890_v13 = vadd.f32 %v4138_v55, %v3900_v24  ;;  %v3865_v26 = vpop.f32.mrf.mxu1 }
 0x51b   : > { %v3901_v28 = vadd.f32 %v3865_v26, %v8718_v3  ;;  %v5023_v3 = vld [vmem:[#allocation3 + $0xe1] sm:$0xff] }
 0x51d   : > { %6230 = vmatmul.msk.f32.gmra.mxu1 %vm3061_vm3, %v4746_v7  ;;  %v5285_v7 = vld [vmem:[#allocation3 + $0x3a] sm:$0xff] }
 0x51e   : > { %6177 = vmatmul.msk.f32.gmra.mxu3 %vm3061_vm3, %v8476_v51  ;;  %6264 = vmatmul.msk.f32.gmra.mxu2 %vm3061_vm3, %v5022_v54  ;;  %v8904_v51 = vld [vmem:[#allocation3 + $0x181] sm:$0xff] }
 0x51f   : > { %6211 = vmatmul.msk.f32.gmra.mxu0 %vm3061_vm3, %v8709_v39  ;;  %v4747_v39 = vld [vmem:[#allocation3 + $0xe0] sm:$0xff]  ;;  %v4750_v54 = vld [vmem:[#allocation3 + $0x108] sm:$0xff] }
 0x521   : > { %v4366_v60 = vpop.f32.mrf.mxu3  ;;  %v4141_v46 = vpop.f32.mrf.mxu2 }
 0x522   : > { %v8900_v43 = vadd.f32 %v4366_v60, %v8686_v4  ;;  %v8902_v38 = vadd.f32 %v4141_v46, %v3901_v28  ;;  %v3868_v8 = vpop.f32.mrf.mxu1  ;;  %v5026_v28 = vld [vmem:[#allocation3 + $0x109] sm:$0xff] }
 0x523   : > { %v3902_v4 = vadd.f32 %v3868_v8, %v8729_v56  ;;  %v5024_v56 = vld [vmem:[#allocation3 + $0xf1] sm:$0xff] }
 0x525   : > { %6231 = vmatmul.msk.f32.gmra.mxu1 %vm3061_vm3, %v4747_v39 }
 0x526   : > { %6178 = vmatmul.msk.f32.gmra.mxu3 %vm3061_vm3, %v8904_v51  ;;  %6265 = vmatmul.msk.f32.gmra.mxu2 %vm3061_vm3, %v5023_v3  ;;  %v5286_v3 = vld [vmem:[#allocation3 + $0x4a] sm:$0xff] }
 0x527   : > { %6212 = vmatmul.msk.f32.gmra.mxu0 %vm3061_vm3, %v8906_v11 }
 0x529   : > { %v4369_v27 = vpop.f32.mrf.mxu3  ;;  %v4144_v22 = vpop.f32.mrf.mxu2 }
 0x52a   : > { %v8916_v6 = vadd.f32 %v4369_v27, %v8703_v59  ;;  %v8918_v44 = vadd.f32 %v4144_v22, %v3902_v4  ;;  %v4880_v58 = vpop.f32.mrf.mxu1  ;;  %v4751_v4 = vld [vmem:[#allocation3 + $0x110] sm:$0xff] }
 0x52b   : > { %v4976_v59 = vadd.f32 %v4880_v58, %v8746_v18  ;;  %v5027_v27 = vld [vmem:[#allocation3 + $0x111] sm:$0xff] }
 0x52d   : > { %6232 = vmatmul.msk.f32.gmra.mxu1 %vm3061_vm3, %v4748_v52 }
 0x52e   : > { %6179 = vmatmul.msk.f32.gmra.mxu3 %vm3061_vm3, %v8920_v62  ;;  %6266 = vmatmul.msk.f32.gmra.mxu2 %vm3061_vm3, %v5024_v56 }
 0x52f   : > { %6213 = vmatmul.msk.f32.gmra.mxu0 %vm3061_vm3, %v8922_v34 }
 0x531   : > { %v4372_v29 = vpop.f32.mrf.mxu3  ;;  %v5156_v45 = vpop.f32.mrf.mxu2 }
 0x532   : > { %v8932_v49 = vadd.f32 %v4372_v29, %v9403_v48  ;;  %v8934_v23 = vadd.f32 %v5156_v45, %v4976_v59  ;;  %v4883_v9 = vpop.f32.mrf.mxu1  ;;  %v5287_v59 = vld [vmem:[#allocation3 + $0x52] sm:$0xff]  ;;  %v4752_v29 = vld [vmem:[#allocation3 + $0x120] sm:$0xff] }
 0x533   : > { %v4977_v12 = vadd.f32 %v4883_v9, %v8758_v57  ;;  %v5028_v48 = vld [vmem:[#allocation3 + $0x121] sm:$0xff] }
 0x535   : > { %6233 = vmatmul.msk.f32.gmra.mxu1 %vm3061_vm3, %v4749_v40 }
 0x536   : > { %6284 = vmatmul.msk.f32.vlgmr.msra.gmra.mxu3 %vm3061_vm3, %v5284_v50  ;;  %6267 = vmatmul.msk.f32.gmra.mxu2 %vm3061_vm3, %v5025_v17  ;;  %v5288_v17 = vld [vmem:[#allocation3 + $0x62] sm:$0xff] }
 0x539   : > { %v4375_v18 = vpop.f32.mrf.mxu3  ;;  %v5159_v16 = vpop.f32.mrf.mxu2 }
 0x53a   : > { %v8941_v24 = vadd.f32 %v4375_v18, %v8731_v25  ;;  %v8943_v55 = vadd.f32 %v5159_v16, %v4977_v12  ;;  %v4886_v26 = vpop.f32.mrf.mxu1  ;;  %v4753_v12 = vld [vmem:[#allocation3 + $0x128] sm:$0xff] }
 0x53b   : > { %v4978_v60 = vadd.f32 %v4886_v26, %v8770_v33  ;;  %v5029_v18 = vld [vmem:[#allocation3 + $0x129] sm:$0xff] }
 0x53d   : > { %6234 = vmatmul.msk.f32.gmra.mxu1 %vm3061_vm3, %v4750_v54 }
 0x53e   : > { %6285 = vmatmul.msk.f32.gmra.mxu3 %vm3061_vm3, %v5285_v7  ;;  %6268 = vmatmul.msk.f32.gmra.mxu2 %vm3061_vm3, %v5026_v28  ;;  %v5289_v28 = vld [vmem:[#allocation3 + $0x6a] sm:$0xff] }
 0x541   : > { %v4378_v57 = vpop.f32.mrf.mxu3  ;;  %v5162_v25 = vpop.f32.mrf.mxu2 }
 0x542   : > { %v8950_v46 = vadd.f32 %v4378_v57, %v8744_v37  ;;  %v8952_v8 = vadd.f32 %v5162_v25, %v4978_v60  ;;  %v4889_v39 = vpop.f32.mrf.mxu1  ;;  %v4754_v60 = vld [vmem:[#allocation3 + $0x138] sm:$0xff] }
 0x543   : > { %v4979_v22 = vadd.f32 %v4889_v39, %v8782_v5  ;;  %v5030_v57 = vld [vmem:[#allocation3 + $0x139] sm:$0xff] }
 0x545   : > { %6235 = vmatmul.msk.f32.gmra.mxu1 %vm3061_vm3, %v4751_v4  ;;  %v5290_v4 = vld [vmem:[#allocation3 + $0x7a] sm:$0xff] }
 0x546   : > { %6286 = vmatmul.msk.f32.gmra.mxu3 %vm3061_vm3, %v5286_v3  ;;  %6269 = vmatmul.msk.f32.gmra.mxu2 %vm3061_vm3, %v5027_v27 }
 0x549   : > { %v4381_v33 = vpop.f32.mrf.mxu3  ;;  %v5165_v37 = vpop.f32.mrf.mxu2 }
 0x54a   : > { %v8959_v58 = vadd.f32 %v4381_v33, %v8756_v53  ;;  %v8961_v52 = vadd.f32 %v5165_v37, %v4979_v22  ;;  %v4892_v56 = vpop.f32.mrf.mxu1  ;;  %v4755_v22 = vld [vmem:[#allocation3 + $0x140] sm:$0xff] }
 0x54b   : > { %v4980_v45 = vadd.f32 %v4892_v56, %v8794_v61  ;;  %v5031_v33 = vld [vmem:[#allocation3 + $0x141] sm:$0xff] }
 0x54d   : > { %6236 = vmatmul.msk.f32.gmra.mxu1 %vm3061_vm3, %v4752_v29  ;;  %v5291_v29 = vld [vmem:[#allocation3 + $0x82] sm:$0xff] }
 0x54e   : > { %6287 = vmatmul.msk.f32.gmra.mxu3 %vm3061_vm3, %v5287_v59  ;;  %6270 = vmatmul.msk.f32.gmra.mxu2 %vm3061_vm3, %v5028_v48  ;;  %v4756_v48 = vld [vmem:[#allocation3 + $0x150] sm:$0xff] }
 0x551   : > { %v4384_v5 = vpop.f32.mrf.mxu3  ;;  %v5168_v53 = vpop.f32.mrf.mxu2 }
 0x552   : > { %v8968_v9 = vadd.f32 %v4384_v5, %v8768_v10  ;;  %v8970_v50 = vadd.f32 %v5168_v53, %v4980_v45  ;;  %v4895_v40 = vpop.f32.mrf.mxu1  ;;  %v5032_v45 = vld [vmem:[#allocation3 + $0x151] sm:$0xff] }
 0x553   : > { %v4981_v16 = vadd.f32 %v4895_v40, %v8806_v0  ;;  %v5033_v40 = vld [vmem:[#allocation3 + $0x159] sm:$0xff] }
 0x555   : > { %6237 = vmatmul.msk.f32.gmra.mxu1 %vm3061_vm3, %v4753_v12 }
 0x556   : > { %6288 = vmatmul.msk.f32.gmra.mxu3 %vm3061_vm3, %v5288_v17  ;;  %6271 = vmatmul.msk.f32.gmra.mxu2 %vm3061_vm3, %v5029_v18  ;;  %v5293_v18 = vld [vmem:[#allocation3 + $0x9a] sm:$0xff] }
 0x559   : > { %v4387_v61 = vpop.f32.mrf.mxu3  ;;  %v5171_v10 = vpop.f32.mrf.mxu2 }
 0x55a   : > { %v8977_v26 = vadd.f32 %v4387_v61, %v8780_v32  ;;  %v8979_v7 = vadd.f32 %v5171_v10, %v4981_v16  ;;  %v4898_v54 = vpop.f32.mrf.mxu1  ;;  %v4758_v16 = vld [vmem:[#allocation3 + $0x168] sm:$0xff] }
 0x55b   : > { %v4982_v25 = vadd.f32 %v4898_v54, %v8818_v35  ;;  %v5034_v61 = vld [vmem:[#allocation3 + $0x169] sm:$0xff] }
 0x55c   : > { %v5294_v54 = vld [vmem:[#allocation3 + $0xaa] sm:$0xff] }
 0x55d   : > { %6238 = vmatmul.msk.f32.gmra.mxu1 %vm3061_vm3, %v4754_v60  ;;  %v5035_v60 = vld [vmem:[#allocation3 + $0x171] sm:$0xff] }
 0x55e   : > { %6289 = vmatmul.msk.f32.gmra.mxu3 %vm3061_vm3, %v5289_v28  ;;  %6272 = vmatmul.msk.f32.gmra.mxu2 %vm3061_vm3, %v5030_v57  ;;  %v4759_v28 = vld [vmem:[#allocation3 + $0x170] sm:$0xff] }
 0x561   : > { %v4390_v0 = vpop.f32.mrf.mxu3  ;;  %v5174_v32 = vpop.f32.mrf.mxu2 }
 0x562   : > { %v8986_v39 = vadd.f32 %v4390_v0, %v8792_v19  ;;  %v8988_v3 = vadd.f32 %v5174_v32, %v4982_v25  ;;  %v4901_v27 = vpop.f32.mrf.mxu1  ;;  %v5295_v25 = vld [vmem:[#allocation3 + $0xb2] sm:$0xff]  ;;  %v9404_v0 = vld [vmem:[#allocation39_spill] sm:$0xff] }
 0x563   : > { %v4983_v37 = vadd.f32 %v4901_v27, %v8830_v2  ;;  %v5292_v2 = vld [vmem:[#allocation3 + $0x92] sm:$0xff] }
 0x564   : > { %v9405_v27 = vld [vmem:[#allocation36_spill] sm:$0xff] }
 0x565   : > { %6239 = vmatmul.msk.f32.gmra.mxu1 %vm3061_vm3, %v4755_v22 }
 0x566   : > { %6290 = vmatmul.msk.f32.gmra.mxu3 %vm3061_vm3, %v5290_v4  ;;  %6273 = vmatmul.msk.f32.gmra.mxu2 %vm3061_vm3, %v5031_v33  ;;  %v5296_v4 = vld [vmem:[#allocation3 + $0xc2] sm:$0xff]  ;;  %v4762_v33 = vld [vmem:[#allocation3 + $0x198] sm:$0xff] }
 0x569   : > { %v4393_v35 = vpop.f32.mrf.mxu3  ;;  %v5177_v19 = vpop.f32.mrf.mxu2 }
 0x56a   : > { %v8995_v56 = vadd.f32 %v4393_v35, %v8804_v42  ;;  %v8997_v59 = vadd.f32 %v5177_v19, %v4983_v37  ;;  %v4757_v42 = vld [vmem:[#allocation3 + $0x158] sm:$0xff]  ;;  %v4763_v19 = vld [vmem:[#allocation3 + $0x1a0] sm:$0xff] }
 0x56b   : > { %v5038_v37 = vld [vmem:[#allocation3 + $0x199] sm:$0xff] }
 0x56d   : > { %6240 = vmatmul.msk.f32.gmra.mxu1 %vm3061_vm3, %v4756_v48 }
 0x56e   : > { %6291 = vmatmul.msk.f32.gmra.mxu3 %vm3061_vm3, %v5291_v29  ;;  %6274 = vmatmul.msk.f32.gmra.mxu2 %vm3061_vm3, %v5032_v45  ;;  %v5039_v29 = vld [vmem:[#allocation3 + $0x1a1] sm:$0xff] }
 0x56f   : > { %v5299_v45 = vld [vmem:[#allocation3 + $0xe2] sm:$0xff] }
 0x571   : > { %v4396_v5 = vpop.f32.mrf.mxu3 }
 0x572   : > { %v9003_v53 = vadd.f32 %v4396_v5, %v8816_v31 }
 0x575   : > { %6241 = vmatmul.msk.f32.gmra.mxu1 %vm3061_vm3, %v4757_v42  ;;  %v9059_v42 = vld [vmem:[%s9190_s6] ss:$0 sm:$0xff] }
 0x576   : > { %6292 = vmatmul.msk.f32.gmra.mxu3 %vm3061_vm3, %v5292_v2  ;;  %6275 = vmatmul.msk.f32.gmra.mxu2 %vm3061_vm3, %v5033_v40  ;;  %v5300_v2 = vld [vmem:[#allocation3 + $0xf2] sm:$0xff] }
 0x579   : > { %v4399_v17 = vpop.f32.mrf.mxu3 }
 0x57a   : > { %v9009_v12 = vadd.f32 %v4399_v17, %v8828_v21 }
 0x57d   : > { %6242 = vmatmul.msk.f32.gmra.mxu1 %vm3061_vm3, %v4758_v16 }
 0x57e   : > { %6293 = vmatmul.msk.f32.gmra.mxu3 %vm3061_vm3, %v5293_v18  ;;  %6276 = vmatmul.msk.f32.gmra.mxu2 %vm3061_vm3, %v5034_v61  ;;  %v4627_v61 = vpop.f32.mrf.mxu0 }
 0x581   : > { %v4402_v31 = vpop.f32.mrf.mxu3 }
 0x582   : > { %v9015_v10 = vadd.f32 %v4402_v31, %v8842_v47  ;;  %v4904_v31 = vpop.f32.mrf.mxu1 }
 0x585   : > { %6243 = vmatmul.msk.f32.gmra.mxu1 %vm3061_vm3, %v4759_v28  ;;  %v5180_v28 = vpop.f32.mrf.mxu2 }
 0x586   : > { %6294 = vmatmul.msk.f32.gmra.mxu3 %vm3061_vm3, %v5294_v54  ;;  %6277 = vmatmul.msk.f32.gmra.mxu2 %vm3061_vm3, %v5035_v60  ;;  %v5302_v54 = vld [vmem:[#allocation3 + $0x10a] sm:$0xff] }
 0x589   : > { %v4405_v21 = vpop.f32.mrf.mxu3 }
 0x58a   : > { %v9021_v57 = vadd.f32 %v4405_v21, %v8854_v41 }
 0x58d   : > { %6244 = vmatmul.msk.f32.gmra.mxu1 %vm3061_vm3, %v9404_v0  ;;  %v5303_v0 = vld [vmem:[#allocation3 + $0x112] sm:$0xff] }
 0x58e   : > { %6295 = vmatmul.msk.f32.gmra.mxu3 %vm3061_vm3, %v5295_v25  ;;  %6278 = vmatmul.msk.f32.gmra.mxu2 %vm3061_vm3, %v8904_v51  ;;  %v5297_v51 = vld [vmem:[#allocation3 + $0xca] sm:$0xff] }
 0x591   : > { %v4408_v47 = vpop.f32.mrf.mxu3 }
 0x592   : > { %v9029_v32 = vadd.f32 %v4408_v47, %v8866_v20  ;;  %v4630_v47 = vpop.f32.mrf.mxu0 }
 0x595   : > { %6245 = vmatmul.msk.f32.gmra.mxu1 %vm3061_vm3, %v9405_v27 }
 0x596   : > { %6296 = vmatmul.msk.f32.gmra.mxu3 %vm3061_vm3, %v5296_v4  ;;  %6279 = vmatmul.msk.f32.gmra.mxu2 %vm3061_vm3, %v8920_v62  ;;  %v5298_v62 = vld [vmem:[#allocation3 + $0xda] sm:$0xff]  ;;  %v5183_v4 = vpop.f32.mrf.mxu2 }
 0x599   : > { %v4411_v41 = vpop.f32.mrf.mxu3 }
 0x59a   : > { %v9037_v22 = vadd.f32 %v4411_v41, %v8878_v15 }
 0x59d   : > { %6246 = vmatmul.msk.f32.gmra.mxu1 %vm3061_vm3, %v4762_v33 }
 0x59e   : > { %6297 = vmatmul.msk.f32.gmra.mxu3 %vm3061_vm3, %v5297_v51  ;;  %6280 = vmatmul.msk.f32.gmra.mxu2 %vm3061_vm3, %v5038_v37  ;;  %v5304_v37 = vld [vmem:[#allocation3 + $0x122] sm:$0xff] }
 0x5a1   : > { %v4414_v20 = vpop.f32.mrf.mxu3 }
 0x5a2   : > { %v9043_v35 = vadd.f32 %v4414_v20, %v8890_v13 }
 0x5a5   : > { %6247 = vmatmul.msk.f32.gmra.mxu1 %vm3061_vm3, %v4763_v19 }
 0x5a6   : > { %6298 = vmatmul.msk.f32.gmra.mxu3 %vm3061_vm3, %v5298_v62  ;;  %6281 = vmatmul.msk.f32.gmra.mxu2 %vm3061_vm3, %v5039_v29  ;;  %v5186_v29 = vpop.f32.mrf.mxu2 }
 0x5a9   : > { %v4417_v15 = vpop.f32.mrf.mxu3 }
 0x5aa   : > { %v9049_v48 = vadd.f32 %v4417_v15, %v8902_v38  ;;  %v5305_v15 = vld [vmem:[#allocation3 + $0x12a] sm:$0xff] }
 0x5ae   : > { %6299 = vmatmul.msk.f32.gmra.mxu3 %vm3061_vm3, %v5299_v45 }
 0x5b1   : > { %v4420_v5 = vpop.f32.mrf.mxu3 }
 0x5b2   : > { %v9053_v13 = vadd.f32 %v4420_v5, %v8918_v44  ;;  %v5301_v44 = vld [vmem:[#allocation3 + $0xfa] sm:$0xff] }
 0x5b6   : > { %6300 = vmatmul.msk.f32.gmra.mxu3 %vm3061_vm3, %v5300_v2 }
 0x5b9   : > { %v5432_v40 = vpop.f32.mrf.mxu3 }
 0x5ba   : > { %v5528_v17 = vadd.f32 %v5432_v40, %v8934_v23 }
 0x5bc   : > { %v5564_v38 = vadd.f32 %v9059_v42, %v5528_v17  ;;  %v5189_v17 = vpop.f32.mrf.mxu2 }
 0x5be   : > { %5596 = vst [vmem:[%s9067_s17] sm:$0xff] %v5564_v38  ;;  %6301 = vmatmul.msk.f32.gmra.mxu3 %vm3061_vm3, %v5301_v44  ;;  %v5306_v38 = vld [vmem:[#allocation3 + $0x13a] sm:$0xff] }
 0x5c1   : > { %v5435_v18 = vpop.f32.mrf.mxu3 }
 0x5c2   : > { %v5529_v16 = vadd.f32 %v5435_v18, %v8943_v55  ;;  %v4907_v55 = vpop.f32.mrf.mxu1 }
 0x5c4   : > { %v5565_v23 = vadd.f32 %v9059_v42, %v5529_v16 }
 0x5c6   : > { %5597 = vst [vmem:[%s9067_s17 + $0x8] sm:$0xff] %v5565_v23  ;;  %6302 = vmatmul.msk.f32.gmra.mxu3 %vm3061_vm3, %v5302_v54  ;;  %v5307_v54 = vld [vmem:[#allocation3 + $0x142] sm:$0xff] }
 0x5c9   : > { %v5438_v60 = vpop.f32.mrf.mxu3 }
 0x5ca   : > { %v5530_v21 = vadd.f32 %v5438_v60, %v8952_v8  ;;  %v4633_v8 = vpop.f32.mrf.mxu0  ;;  %v4910_v51 = vpop.f32.mrf.mxu1 }
 0x5cc   : > { %v5566_v25 = vadd.f32 %v9059_v42, %v5530_v21 }
 0x5ce   : > { %5598 = vst [vmem:[%s9067_s17 + $0x10] sm:$0xff] %v5566_v25  ;;  %6303 = vmatmul.msk.f32.gmra.mxu3 %vm3061_vm3, %v5303_v0  ;;  %v4707_v25 = vadd.f32 %v4627_v61, %v8840_v36  ;;  %v5309_v36 = vld [vmem:[#allocation3 + $0x15a] sm:$0xff] }
 0x5d1   : > { %v5441_v27 = vpop.f32.mrf.mxu3 }
 0x5d2   : > { %v5531_v41 = vadd.f32 %v5441_v27, %v8961_v52  ;;  %v4636_v45 = vpop.f32.mrf.mxu0  ;;  %v4913_v2 = vpop.f32.mrf.mxu1  ;;  %v5308_v27 = vld [vmem:[#allocation3 + $0x152] sm:$0xff] }
 0x5d4   : > { %v5567_v33 = vadd.f32 %v9059_v42, %v5531_v41 }
 0x5d6   : > { %5599 = vst [vmem:[%s9067_s17 + $0x18] sm:$0xff] %v5567_v33  ;;  %6304 = vmatmul.msk.f32.gmra.mxu3 %vm3061_vm3, %v5304_v37 }
 0x5d9   : > { %v5444_v20 = vpop.f32.mrf.mxu3 }
 0x5da   : > { %v5532_v19 = vadd.f32 %v5444_v20, %v8970_v50  ;;  %v4639_v18 = vpop.f32.mrf.mxu0  ;;  %v4916_v23 = vpop.f32.mrf.mxu1 }
 0x5dc   : > { %v5568_v62 = vadd.f32 %v9059_v42, %v5532_v19 }
 0x5de   : > { %5600 = vst [vmem:[%s9067_s17 + $0x20] sm:$0xff] %v5568_v62  ;;  %6305 = vmatmul.msk.f32.gmra.mxu3 %vm3061_vm3, %v5305_v15  ;;  %v4708_v15 = vadd.f32 %v4630_v47, %v8852_v1  ;;  %v5310_v1 = vld [vmem:[#allocation3 + $0x16a] sm:$0xff] }
 0x5e0   : > { %v4985_v61 = vadd.f32 %v4907_v55, %v4708_v15 }
 0x5e1   : > { %v5447_v52 = vpop.f32.mrf.mxu3 }
 0x5e2   : > { %v5533_v5 = vadd.f32 %v5447_v52, %v8979_v7  ;;  %v5192_v7 = vpop.f32.mrf.mxu2  ;;  %v4642_v41 = vpop.f32.mrf.mxu0 }
 0x5e3   : > { %v4919_v33 = vpop.f32.mrf.mxu1 }
 0x5e4   : > { %v5569_v40 = vadd.f32 %v9059_v42, %v5533_v5 }
 0x5e6   : > { %5601 = vst [vmem:[%s9067_s17 + $0x28] sm:$0xff] %v5569_v40  ;;  %6306 = vmatmul.msk.f32.gmra.mxu3 %vm3061_vm3, %v5306_v38 }
 0x5e9   : > { %v5450_v50 = vpop.f32.mrf.mxu3 }
 0x5ea   : > { %v5534_v44 = vadd.f32 %v5450_v50, %v8988_v3  ;;  %v4984_v3 = vadd.f32 %v4904_v31, %v4707_v25  ;;  %v5195_v20 = vpop.f32.mrf.mxu2  ;;  %v4645_v52 = vpop.f32.mrf.mxu0  ;;  %v5261_v31 = vadd.f32 %v5183_v4, %v4985_v61  ;;  %v4710_v4 = vadd.f32 %v4636_v45, %v8876_v30 }
 0x5eb   : > { %v4922_v5 = vpop.f32.mrf.mxu1 }
 0x5ec   : > { %v5570_v16 = vadd.f32 %v9059_v42, %v5534_v44  ;;  %v5260_v37 = vadd.f32 %v5180_v28, %v4984_v3  ;;  %v4709_v28 = vadd.f32 %v4633_v8, %v8864_v14  ;;  %v5311_v14 = vld [vmem:[#allocation3 + $0x172] sm:$0xff]  ;;  %v4987_v8 = vadd.f32 %v4913_v2, %v4710_v4 }
 0x5ee   : > { %5602 = vst [vmem:[%s9067_s17 + $0x30] sm:$0xff] %v5570_v16  ;;  %6307 = vmatmul.msk.f32.gmra.mxu3 %vm3061_vm3, %v5307_v54  ;;  %v4986_v47 = vadd.f32 %v4910_v51, %v4709_v28  ;;  %v5263_v51 = vadd.f32 %v5189_v17, %v4987_v8  ;;  %v4712_v17 = vadd.f32 %v4642_v41, %v8900_v43 }
 0x5f0   : > { %v5262_v55 = vadd.f32 %v5186_v29, %v4986_v47 }
 0x5f1   : > { %v5453_v60 = vpop.f32.mrf.mxu3 }
 0x5f2   : > { %v5535_v21 = vadd.f32 %v5453_v60, %v8997_v59  ;;  %v5198_v50 = vpop.f32.mrf.mxu2  ;;  %v4648_v54 = vpop.f32.mrf.mxu0 }
 0x5f4   : > { %v5571_v0 = vadd.f32 %v9059_v42, %v5535_v21  ;;  %v4925_v21 = vpop.f32.mrf.mxu1 }
 0x5f6   : > { %5603 = vst [vmem:[%s9067_s17 + $0x38] sm:$0xff] %v5571_v0  ;;  %6308 = vmatmul.msk.f32.gmra.mxu3 %vm3061_vm3, %v5308_v27 }
 0x5f9   : > { %v5456_v19 = vpop.f32.mrf.mxu3 }
 0x5fa   : > { %v5536_v62 = vadd.f32 %v5456_v19, %v5260_v37  ;;  %v5201_v0 = vpop.f32.mrf.mxu2  ;;  %v4651_v29 = vpop.f32.mrf.mxu0  ;;  %v4711_v37 = vadd.f32 %v4639_v18, %v8888_v63 }
 0x5fc   : > { %v5572_v59 = vadd.f32 %v9059_v42, %v5536_v62  ;;  %v4928_v62 = vpop.f32.mrf.mxu1  ;;  %v4988_v15 = vadd.f32 %v4916_v23, %v4711_v37 }
 0x5fe   : > { %5604 = vst [vmem:[%s9067_s17 + $0x40] sm:$0xff] %v5572_v59  ;;  %6309 = vmatmul.msk.f32.gmra.mxu3 %vm3061_vm3, %v5309_v36  ;;  %v5264_v45 = vadd.f32 %v5192_v7, %v4988_v15  ;;  %v4713_v7 = vadd.f32 %v4645_v52, %v8916_v6 }
 0x600   : > { %v4990_v43 = vadd.f32 %v4922_v5, %v4713_v7 }
 0x601   : > { %v5459_v40 = vpop.f32.mrf.mxu3 }
 0x602   : > { %v5537_v38 = vadd.f32 %v5459_v40, %v5261_v31  ;;  %v5204_v30 = vpop.f32.mrf.mxu2  ;;  %v4654_v61 = vpop.f32.mrf.mxu0  ;;  %v4989_v31 = vadd.f32 %v4919_v33, %v4712_v17  ;;  %v5266_v33 = vadd.f32 %v5198_v50, %v4990_v43 }
 0x604   : > { %v5573_v44 = vadd.f32 %v9059_v42, %v5537_v38  ;;  %v4931_v63 = vpop.f32.mrf.mxu1  ;;  %v5265_v18 = vadd.f32 %v5195_v20, %v4989_v31  ;;  %v5314_v38 = vld [vmem:[#allocation3 + $0x19a] sm:$0xff]  ;;  %v5315_v20 = vld [vmem:[#allocation3 + $0x1a2] sm:$0xff] }
 0x606   : > { %5605 = vst [vmem:[%s9067_s17 + $0x48] sm:$0xff] %v5573_v44  ;;  %6310 = vmatmul.msk.f32.gmra.mxu3 %vm3061_vm3, %v5310_v1 }
 0x609   : > { %v5462_v16 = vpop.f32.mrf.mxu3 }
 0x60a   : > { %v5538_v60 = vadd.f32 %v5462_v16, %v5262_v55  ;;  %v5207_v23 = vpop.f32.mrf.mxu2  ;;  %v4657_v41 = vpop.f32.mrf.mxu0  ;;  %v4714_v55 = vadd.f32 %v4648_v54, %v8932_v49 }
 0x60c   : > { %v5574_v25 = vadd.f32 %v9059_v42, %v5538_v60  ;;  %v4934_v44 = vpop.f32.mrf.mxu1  ;;  %v4991_v60 = vadd.f32 %v4925_v21, %v4714_v55 }
 0x60e   : > { %5606 = vst [vmem:[%s9067_s17 + $0x50] sm:$0xff] %v5574_v25  ;;  %6311 = vmatmul.msk.f32.gmra.mxu3 %vm3061_vm3, %v5311_v14  ;;  %v5267_v6 = vadd.f32 %v5201_v0, %v4991_v60  ;;  %v4715_v25 = vadd.f32 %v4651_v29, %v8941_v24 }
 0x611   : > { %v5465_v27 = vpop.f32.mrf.mxu3 }
 0x612   : > { %v5539_v3 = vadd.f32 %v5465_v27, %v5263_v51  ;;  %v5210_v47 = vpop.f32.mrf.mxu2  ;;  %v4660_v5 = vpop.f32.mrf.mxu0  ;;  %v4992_v51 = vadd.f32 %v4928_v62, %v4715_v25  ;;  %v4717_v62 = vadd.f32 %v4657_v41, %v8959_v58 }
 0x614   : > { %v5575_v19 = vadd.f32 %v9059_v42, %v5539_v3  ;;  %v4937_v50 = vpop.f32.mrf.mxu1  ;;  %v5268_v49 = vadd.f32 %v5204_v30, %v4992_v51  ;;  %v4716_v3 = vadd.f32 %v4654_v61, %v8950_v46 }
 0x616   : > { %5607 = vst [vmem:[%s9067_s17 + $0x58] sm:$0xff] %v5575_v19  ;;  %6312 = vmatmul.msk.f32.gmra.mxu3 %vm3061_vm3, %v8906_v11  ;;  %v4993_v19 = vadd.f32 %v4931_v63, %v4716_v3  ;;  %v4718_v63 = vadd.f32 %v4660_v5, %v8968_v9 }
 0x619   : > { %v5468_v2 = vpop.f32.mrf.mxu3 }
 0x61a   : > { %v5540_v59 = vadd.f32 %v5468_v2, %v5264_v45  ;;  %v5213_v8 = vpop.f32.mrf.mxu2  ;;  %v4663_v27 = vpop.f32.mrf.mxu0  ;;  %v5269_v45 = vadd.f32 %v5207_v23, %v4993_v19  ;;  %v4995_v23 = vadd.f32 %v4937_v50, %v4718_v63 }
 0x61b   : > { %v4719_v43 = vadd.f32 %v4663_v27, %v8977_v26 }
 0x61c   : > { %v5576_v36 = vadd.f32 %v9059_v42, %v5540_v59  ;;  %v4940_v37 = vpop.f32.mrf.mxu1  ;;  %v4994_v59 = vadd.f32 %v4934_v44, %v4717_v62 }
 0x61e   : > { %5608 = vst [vmem:[%s9067_s17 + $0x60] sm:$0xff] %v5576_v36  ;;  %6313 = vmatmul.msk.f32.gmra.mxu3 %vm3061_vm3, %v8922_v34  ;;  %v5270_v36 = vadd.f32 %v5210_v47, %v4994_v59 }
 0x621   : > { %v5471_v40 = vpop.f32.mrf.mxu3 }
 0x622   : > { %v5541_v11 = vadd.f32 %v5471_v40, %v5265_v18  ;;  %v5216_v15 = vpop.f32.mrf.mxu2  ;;  %v4666_v2 = vpop.f32.mrf.mxu0 }
 0x624   : > { %v5577_v28 = vadd.f32 %v9059_v42, %v5541_v11  ;;  %v4943_v17 = vpop.f32.mrf.mxu1  ;;  %v5271_v11 = vadd.f32 %v5213_v8, %v4995_v23 }
 0x626   : > { %5609 = vst [vmem:[%s9067_s17 + $0x68] sm:$0xff] %v5577_v28  ;;  %6314 = vmatmul.msk.f32.gmra.mxu3 %vm3061_vm3, %v5314_v38 }
 0x629   : > { %v5474_v1 = vpop.f32.mrf.mxu3 }
 0x62a   : > { %v5542_v34 = vadd.f32 %v5474_v1, %v5266_v33  ;;  %v5219_v46 = vpop.f32.mrf.mxu2  ;;  %v4669_v40 = vpop.f32.mrf.mxu0  ;;  %v4996_v33 = vadd.f32 %v4940_v37, %v4719_v43 }
 0x62c   : > { %v5578_v16 = vadd.f32 %v9059_v42, %v5542_v34  ;;  %v4946_v58 = vpop.f32.mrf.mxu1  ;;  %v5272_v44 = vadd.f32 %v5216_v15, %v4996_v33 }
 0x62e   : > { %5610 = vst [vmem:[%s9067_s17 + $0x70] sm:$0xff] %v5578_v16  ;;  %6315 = vmatmul.msk.f32.gmra.mxu3 %vm3061_vm3, %v5315_v20  ;;  %v4720_v20 = vadd.f32 %v4666_v2, %v8986_v39 }
 0x630   : > { %v4997_v60 = vadd.f32 %v4943_v17, %v4720_v20 }
 0x631   : > { %v5477_v52 = vpop.f32.mrf.mxu3 }
 0x632   : > { %v5543_v4 = vadd.f32 %v5477_v52, %v5267_v6  ;;  %v5222_v28 = vpop.f32.mrf.mxu2  ;;  %v4672_v9 = vpop.f32.mrf.mxu0  ;;  %v5273_v6 = vadd.f32 %v5219_v46, %v4997_v60 }
 0x634   : > { %v5579_v14 = vadd.f32 %v9059_v42, %v5543_v4  ;;  %v4949_v47 = vpop.f32.mrf.mxu1  ;;  %v4721_v4 = vadd.f32 %v4669_v40, %v8995_v56 }
 0x636   : > { %5611 = vst [vmem:[%s9067_s17 + $0x78] sm:$0xff] %v5579_v14  ;;  %v4998_v14 = vadd.f32 %v4946_v58, %v4721_v4 }
 0x638   : > { %v5274_v51 = vadd.f32 %v5222_v28, %v4998_v14 }
 0x639   : > { %v5480_v54 = vpop.f32.mrf.mxu3 }
 0x63a   : > { %v5544_v21 = vadd.f32 %v5480_v54, %v5268_v49  ;;  %v5225_v16 = vpop.f32.mrf.mxu2  ;;  %v4675_v5 = vpop.f32.mrf.mxu0  ;;  %v4722_v54 = vadd.f32 %v4672_v9, %v9003_v53 }
 0x63c   : > { %v5580_v0 = vadd.f32 %v9059_v42, %v5544_v21  ;;  %v4952_v25 = vpop.f32.mrf.mxu1  ;;  %v4999_v3 = vadd.f32 %v4949_v47, %v4722_v54 }
 0x63e   : > { %5612 = vst [vmem:[%s9067_s17 + $0x80] sm:$0xff] %v5580_v0  ;;  %v5275_v37 = vadd.f32 %v5225_v16, %v4999_v3 }
 0x641   : > { %v5483_v24 = vpop.f32.mrf.mxu3 }
 0x642   : > { %v5545_v29 = vadd.f32 %v5483_v24, %v5269_v45  ;;  %v5228_v8 = vpop.f32.mrf.mxu2  ;;  %v4678_v27 = vpop.f32.mrf.mxu0  ;;  %v4723_v45 = vadd.f32 %v4675_v5, %v9009_v12 }
 0x644   : > { %v5581_v30 = vadd.f32 %v9059_v42, %v5545_v29  ;;  %v4955_v0 = vpop.f32.mrf.mxu1  ;;  %v5000_v29 = vadd.f32 %v4952_v25, %v4723_v45 }
 0x646   : > { %5613 = vst [vmem:[%s9067_s17 + $0x88] sm:$0xff] %v5581_v30  ;;  %v5276_v30 = vadd.f32 %v5228_v8, %v5000_v29 }
 0x649   : > { %v5486_v61 = vpop.f32.mrf.mxu3 }
 0x64a   : > { %v5546_v31 = vadd.f32 %v5486_v61, %v5270_v36  ;;  %v5231_v56 = vpop.f32.mrf.mxu2  ;;  %v4681_v62 = vpop.f32.mrf.mxu0  ;;  %v4724_v36 = vadd.f32 %v4678_v27, %v9015_v10 }
 0x64b   : > { %v4725_v40 = vadd.f32 %v4681_v62, %v9021_v57 }
 0x64c   : > { %v5582_v18 = vadd.f32 %v9059_v42, %v5546_v31  ;;  %v4958_v53 = vpop.f32.mrf.mxu1  ;;  %v5001_v61 = vadd.f32 %v4955_v0, %v4724_v36 }
 0x64e   : > { %5614 = vst [vmem:[%s9067_s17 + $0x90] sm:$0xff] %v5582_v18  ;;  %v5277_v31 = vadd.f32 %v5231_v56, %v5001_v61 }
 0x651   : > { %v5489_v38 = vpop.f32.mrf.mxu3 }
 0x652   : > { %v5547_v7 = vadd.f32 %v5489_v38, %v5271_v11  ;;  %v5234_v17 = vpop.f32.mrf.mxu2  ;;  %v4684_v12 = vpop.f32.mrf.mxu0  ;;  %v5002_v38 = vadd.f32 %v4958_v53, %v4725_v40 }
 0x654   : > { %v5583_v41 = vadd.f32 %v9059_v42, %v5547_v7  ;;  %v4961_v23 = vpop.f32.mrf.mxu1  ;;  %v5278_v7 = vadd.f32 %v5234_v17, %v5002_v38 }
 0x656   : > { %5615 = vst [vmem:[%s9067_s17 + $0x98] sm:$0xff] %v5583_v41  ;;  %v4726_v41 = vadd.f32 %v4684_v12, %v9029_v32 }
 0x659   : > { %v5492_v1 = vpop.f32.mrf.mxu3 }
 0x65a   : > { %v5548_v34 = vadd.f32 %v5492_v1, %v5272_v44  ;;  %v5237_v58 = vpop.f32.mrf.mxu2  ;;  %v4687_v43 = vpop.f32.mrf.mxu0  ;;  %v5003_v1 = vadd.f32 %v4961_v23, %v4726_v41 }
 0x65b   : > { %v4727_v20 = vadd.f32 %v4687_v43, %v9037_v22 }
 0x65c   : > { %v5584_v55 = vadd.f32 %v9059_v42, %v5548_v34  ;;  %v4964_v44 = vpop.f32.mrf.mxu1  ;;  %v5279_v34 = vadd.f32 %v5237_v58, %v5003_v1 }
 0x65d   : > { %v5004_v60 = vadd.f32 %v4964_v44, %v4727_v20 }
 0x65e   : > { %5616 = vst [vmem:[%s9067_s17 + $0xa0] sm:$0xff] %v5584_v55 }
 0x661   : > { %v5495_v52 = vpop.f32.mrf.mxu3 }
 0x662   : > { %v5549_v26 = vadd.f32 %v5495_v52, %v5273_v6  ;;  %v5240_v9 = vpop.f32.mrf.mxu2  ;;  %v4690_v16 = vpop.f32.mrf.mxu0 }
 0x663   : > { %v5280_v52 = vadd.f32 %v5240_v9, %v5004_v60  ;;  %v4728_v4 = vadd.f32 %v4690_v16, %v9043_v35 }
 0x664   : > { %v5585_v50 = vadd.f32 %v9059_v42, %v5549_v26  ;;  %v4967_v6 = vpop.f32.mrf.mxu1 }
 0x665   : > { %v5005_v25 = vadd.f32 %v4967_v6, %v4728_v4 }
 0x666   : > { %5617 = vst [vmem:[%s9067_s17 + $0xa8] sm:$0xff] %v5585_v50 }
 0x669   : > { %v5498_v39 = vpop.f32.mrf.mxu3 }
 0x66a   : > { %v5550_v49 = vadd.f32 %v5498_v39, %v5274_v51  ;;  %v5243_v32 = vpop.f32.mrf.mxu2  ;;  %v4693_v14 = vpop.f32.mrf.mxu0 }
 0x66b   : > { %v5281_v8 = vadd.f32 %v5243_v32, %v5005_v25  ;;  %v4729_v54 = vadd.f32 %v4693_v14, %v9049_v48 }
 0x66c   : > { %v5586_v21 = vadd.f32 %v9059_v42, %v5550_v49  ;;  %v4970_v22 = vpop.f32.mrf.mxu1 }
 0x66d   : > { %v5006_v27 = vadd.f32 %v4970_v22, %v4729_v54 }
 0x66e   : > { %5618 = vst [vmem:[%s9067_s17 + $0xb0] sm:$0xff] %v5586_v21 }
 0x671   : > { %v5501_v19 = vpop.f32.mrf.mxu3 }
 0x672   : > { %v5551_v15 = vadd.f32 %v5501_v19, %v5275_v37  ;;  %v5246_v49 = vpop.f32.mrf.mxu2  ;;  %v4696_v37 = vpop.f32.mrf.mxu0 }
 0x673   : > { %v5282_v3 = vadd.f32 %v5246_v49, %v5006_v27  ;;  %v4730_v19 = vadd.f32 %v4696_v37, %v9053_v13 }
 0x674   : > { %v5587_v24 = vadd.f32 %v9059_v42, %v5551_v15  ;;  %v4973_v56 = vpop.f32.mrf.mxu1 }
 0x676   : > { %5619 = vst [vmem:[%s9067_s17 + $0xb8] sm:$0xff] %v5587_v24  ;;  %v5007_v24 = vadd.f32 %v4973_v56, %v4730_v19 }
 0x679   : > { %v5504_v2 = vpop.f32.mrf.mxu3 }
 0x67a   : > { %v5552_v59 = vadd.f32 %v5504_v2, %v5276_v30  ;;  %v5249_v45 = vpop.f32.mrf.mxu2 }
 0x67b   : > { %v5283_v29 = vadd.f32 %v5249_v45, %v5007_v24 }
 0x67c   : > { %v5588_v46 = vadd.f32 %v9059_v42, %v5552_v59 }
 0x67e   : > { %5620 = vst [vmem:[%s9067_s17 + $0xc0] sm:$0xff] %v5588_v46 }
 0x681   : > { %v5507_v63 = vpop.f32.mrf.mxu3 }
 0x682   : > { %v5553_v18 = vadd.f32 %v5507_v63, %v5277_v31 }
 0x684   : > { %v5589_v11 = vadd.f32 %v9059_v42, %v5553_v18 }
 0x686   : > { %5621 = vst [vmem:[%s9067_s17 + $0xc8] sm:$0xff] %v5589_v11 }
 0x689   : > { %v5510_v28 = vpop.f32.mrf.mxu3 }
 0x68a   : > { %v5554_v10 = vadd.f32 %v5510_v28, %v5278_v7 }
 0x68c   : > { %v5590_v33 = vadd.f32 %v9059_v42, %v5554_v10 }
 0x68e   : > { %5622 = vst [vmem:[%s9067_s17 + $0xd0] sm:$0xff] %v5590_v33 }
 0x691   : > { %v5513_v57 = vpop.f32.mrf.mxu3 }
 0x692   : > { %v5555_v47 = vadd.f32 %v5513_v57, %v5279_v34 }
 0x694   : > { %v5591_v55 = vadd.f32 %v9059_v42, %v5555_v47 }
 0x696   : > { %5623 = vst [vmem:[%s9067_s17 + $0xd8] sm:$0xff] %v5591_v55 }
 0x699   : > { %v5516_v26 = vpop.f32.mrf.mxu3 }
 0x69a   : > { %v5556_v5 = vadd.f32 %v5516_v26, %v5280_v52 }
 0x69c   : > { %v5592_v50 = vadd.f32 %v9059_v42, %v5556_v5 }
 0x69e   : > { %5624 = vst [vmem:[%s9067_s17 + $0xe0] sm:$0xff] %v5592_v50 }
 0x6a1   : > { %v5519_v51 = vpop.f32.mrf.mxu3 }
 0x6a2   : > { %v5557_v39 = vadd.f32 %v5519_v51, %v5281_v8 }
 0x6a4   : > { %v5593_v21 = vadd.f32 %v9059_v42, %v5557_v39 }
 0x6a6   : > { %5625 = vst [vmem:[%s9067_s17 + $0xe8] sm:$0xff] %v5593_v21 }
 0x6a9   : > { %v5522_v35 = vpop.f32.mrf.mxu3 }
 0x6aa   : > { %v5558_v0 = vadd.f32 %v5522_v35, %v5282_v3 }
 0x6ac   : > { %v5594_v15 = vadd.f32 %v9059_v42, %v5558_v0 }
 0x6ae   : > { %5626 = vst [vmem:[%s9067_s17 + $0xf0] sm:$0xff] %v5594_v15 }
 0x6b1   : > { %v5525_v62 = vpop.f32.mrf.mxu3 }
 0x6b2   : > { %v5559_v48 = vadd.f32 %v5525_v62, %v5283_v29 }
 0x6b4   : > { %v5595_v30 = vadd.f32 %v9059_v42, %v5559_v48 }
 0x6b6   : > { %5627 = vst [vmem:[%s9067_s17 + $0xf8] sm:$0xff] %v5595_v30 }
 0x6b7 PF: > { %s17_s24 = sadd.s32 1, %s6491_s24  }
 0x6b8   : > { %p14_p4 = scmp.ge.s32.totalorder %s17_s24, 4  }
 0x6ba   :  { %16 = sbr.rel (!%p14_p4) target bundleno = 1 (0x1), region = 100 }

</bundles_post_ra>
